<compile_context>
chip_gen: v7x
topology: tpu7x:2x2x1
jax: 0.10.0
libtpu: 0.0.40
codegen_flags: <defaults>
</compile_context>

<pallas_src>
import numpy as np
import jax
import jax.numpy as jnp
from jax.experimental import pallas as pl
from jax.experimental.pallas import tpu as pltpu

NEG_PAD = -10000.0  # same pseudo -inf pad value as the PyTorch module


# ----------------------------- planning helpers -------------------------------
def _round_up(a, b):
    return ((a + b - 1) // b) * b


def _vmem_footprint(lane_blk, out_size, n_dil, sp, shared_input, itemsize):
    """Per-grid-step VMEM bytes: double-buffered in/out blocks + scratch."""
    n_in = (out_size if shared_input else n_dil * out_size) * lane_blk
    n_out = n_dil * out_size * lane_blk
    n_scr = (sp if shared_input else n_dil * sp) * lane_blk
    return (2 * n_in + 2 * n_out + n_scr) * itemsize


def _plan_lane_block(L, out_size, n_dil, sp, shared_input, itemsize):
    """Pick the lane block (multiple of 128), padded lane extent and VMEM limit."""
    L128 = _round_up(L, 128)
    budget = 40 << 20                # leaves headroom inside v7x's 64 MiB VMEM
    lane_blk = 128
    for blk in (1024, 512, 256, 128):
        if blk > L128:
            continue
        if _vmem_footprint(blk, out_size, n_dil, sp, shared_input, itemsize) <= budget:
            lane_blk = blk
            break
    Lp = _round_up(L128, lane_blk)   # pad lanes; grid = cdiv(L, lane_blk)
    fp = _vmem_footprint(lane_blk, out_size, n_dil, sp, shared_input, itemsize)
    vmem_limit = min(64 << 20, max(int(fp * 1.5), 16 << 20))
    return lane_blk, Lp, Lp // lane_blk, vmem_limit


# ----------------------------- Pallas kernel ---------------------------------
def _make_pass_kernel(offs_list, out_size, lane_blk, shared_input, dtype):
    """Multi-scale 1-D max-plus dilation along the sublane (row) axis.

    Layout inside the kernel:
      rows (sublanes)  = sliding axis (NEG_PAD-padded in a VMEM scratch)
      lanes (last dim) = all non-sliding dims collapsed, lane_blk >= 128

    offs_list: per-scale numpy float32 tap offsets (already * se_coef), baked
               in as compile-time constants.
    shared_input: True  -> x_ref is (out_size, lane_blk), shared by all scales
                  False -> x_ref is (n_dil, out_size, lane_blk), one per scale
                           (per-scale scratch slot -> scales are independent).
    """
    widths = [(int(o.shape[0]) - 1) // 2 for o in offs_list]
    width_max = max(widths)
    sp = out_size + 2 * width_max      # rows in one padded scratch slot
    # Row (sliding-axis) sub-tile: keep each accumulator at <= ~8 vregs.
    row_tile = min(out_size, max(8, 8192 // lane_blk))

    def kernel(x_ref, out_ref, pad_ref):
        # ---- one-time NEG_PAD border fill ------------------------------
        # The scratch persists across grid steps and later steps only
        # rewrite the interior rows, so the fill runs on step 0 only.
        # (Grid axis is "arbitrary" => step 0 executes first, same core.)
        @pl.when(pl.program_id(0) == 0)
        def _fill_pads():
            if shared_input:
                neg = jnp.full((width_max, lane_blk), NEG_PAD, dtype=dtype)
                pad_ref[0:width_max, :] = neg
                pad_ref[width_max + out_size:sp, :] = neg
            else:
                for s, w in enumerate(widths):
                    neg = jnp.full((w, lane_blk), NEG_PAD, dtype=dtype)
                    pad_ref[s, 0:w, :] = neg
                    pad_ref[s, w + out_size:2 * w + out_size, :] = neg

        # ---- interior rows (every step) --------------------------------
        if shared_input:
            pad_ref[width_max:width_max + out_size, :] = x_ref[...]
        else:
            for s, w in enumerate(widths):
                pad_ref[s, w:w + out_size, :] = x_ref[s]

        # ---- tap loops ---------------------------------------------------
        for s, offs in enumerate(offs_list):
            n = int(offs.shape[0])
            w = widths[s]
            base = (width_max - w) if shared_input else 0

            for r0 in range(0, out_size, row_tile):
                rt = min(row_tile, out_size - r0)
                lo = base + r0

                if shared_input:
                    def term(j, _lo=lo, _rt=rt, _offs=offs):
                        v = pad_ref[_lo + j:_lo + j + _rt, :]
                        o = float(_offs[j])
                        return v if o == 0.0 else v - o
                else:
                    def term(j, _lo=lo, _rt=rt, _offs=offs, _s=s):
                        v = pad_ref[_s, _lo + j:_lo + j + _rt, :]
                        o = float(_offs[j])
                        return v if o == 0.0 else v - o

                # Interleaved accumulators: break the n-deep dependent vmax
                # chain into independent chains (ILP on the VALU), merged last.
                num_acc = min(n, 2 if rt * lane_blk >= 8192 else 4)
                accs = [term(jj) for jj in range(num_acc)]
                for j in range(num_acc, n):
                    accs[j % num_acc] = jnp.maximum(accs[j % num_acc], term(j))
                acc = accs[0]
                for a in accs[1:]:
                    acc = jnp.maximum(acc, a)

                out_ref[s, r0:r0 + rt, :] = acc

    return kernel, sp


def _multi_scale_pass(x2, offs_list, shared_input):
    """One 1-D dilation pass (all scales fused) via a single pallas_call.

    x2: (out_size, L) if shared_input else (n_dil, out_size, L).
    returns: (n_dil, out_size, L)
    """
    n_dil = len(offs_list)
    if shared_input:
        out_size, L = x2.shape
    else:
        assert x2.shape[0] == n_dil
        out_size, L = x2.shape[1], x2.shape[2]

    widths = [(int(o.shape[0]) - 1) // 2 for o in offs_list]
    sp = out_size + 2 * max(widths)
    itemsize = np.dtype(x2.dtype).itemsize
    lane_blk, Lp, n_blocks, vmem_limit = _plan_lane_block(
        L, out_size, n_dil, sp, shared_input, itemsize)

    if Lp != L:
        pad = [(0, 0)] * (x2.ndim - 1) + [(0, Lp - L)]
        x2 = jnp.pad(x2, pad)

    kernel, sp = _make_pass_kernel(offs_list, out_size, lane_blk,
                                   shared_input, x2.dtype)

    if shared_input:
        in_spec = pl.BlockSpec((out_size, lane_blk), lambda i: (0, i))
        scratch = pltpu.VMEM((sp, lane_blk), x2.dtype)
    else:
        in_spec = pl.BlockSpec((n_dil, out_size, lane_blk), lambda i: (0, 0, i))
        scratch = pltpu.VMEM((n_dil, sp, lane_blk), x2.dtype)

    out = pl.pallas_call(
        kernel,
        out_shape=jax.ShapeDtypeStruct((n_dil, out_size, Lp), x2.dtype),
        grid=(n_blocks,),
        in_specs=[in_spec],
        out_specs=pl.BlockSpec((n_dil, out_size, lane_blk), lambda i: (0, 0, i)),
        scratch_shapes=[scratch],
        compiler_params=pltpu.CompilerParams(
            # "arbitrary": required so the pl.when(program_id==0) pad fill
            # runs first and on the same core that owns the scratch.
            dimension_semantics=("arbitrary",),
            vmem_limit_bytes=vmem_limit),
    )(x2)
    return out[:, :, :L] if Lp != L else out


# ----------------------------- module wrapper --------------------------------
def make_dilation2d_params(se_coef=0.5, base=2.0, zero_scale=1.0, n_scales=4):
    """Deterministic parameter setup mirroring Dilation2d.__init__."""
    k = np.arange(1, n_scales)
    dilations = np.power(base, k)
    scales = list(zero_scale ** 2 * (dilations ** 2 - 1.0))
    widths = [4 * int(np.ceil(np.sqrt(s))) for s in scales]
    ses = [
        np.asarray([1.0 / (4.0 * s) * (xx ** 2) for xx in range(-w, w + 1)],
                   dtype=np.float32)
        for s, w in zip(scales, widths)
    ]
    return float(se_coef), ses


def dilation2d_forward(x, se_coef, ses):
    """Equivalent of Dilation2d.forward: (N, C, H, W) -> (N, C, S, H, W)."""
    B, C, H, W = x.shape
    n_dil = len(ses)
    offs_list = [np.float32(se_coef) * np.asarray(se, np.float32) for se in ses]

    # ---- W pass: slide along W; layout (W, B*C*H)  [lanes = B*C*H] ----------
    xw = jnp.transpose(x, (3, 0, 1, 2)).reshape(W, B * C * H)
    t1 = _multi_scale_pass(xw, offs_list, shared_input=True)   # (n_dil, W, BCH)

    # ---- relayout (n_dil, W, B, C, H) -> (n_dil, H, B*C*W) ------------------
    # TODO(synk): this transpose (and the final one below) are standalone XLA
    # HBM passes; folding them into the Pallas out_specs needs a lane-sliding
    # second pass and is left for a follow-up.
    t1 = (t1.reshape(n_dil, W, B, C, H)
            .transpose(0, 4, 2, 3, 1)
            .reshape(n_dil, H, B * C * W))

    # ---- H pass: slide along H; layout (H, B*C*W)  [lanes = B*C*W] ----------
    t2 = _multi_scale_pass(t1, offs_list, shared_input=False)  # (n_dil, H, BCW)

    # ---- back to (B, C, n_dil, H, W) and prepend the identity slice ---------
    d = t2.reshape(n_dil, H, B, C, W).transpose(2, 3, 0, 1, 4)
    return jnp.concatenate([x[:, :, None, :, :], d], axis=2)


# --------------------- pure-JAX reference (for validation) -------------------
def _dilation2d_ref(x, se_coef, ses):
    B, C, H, W = x.shape
    outs = [x]
    for se_np in ses:
        se = jnp.asarray(se_np, jnp.float32)
        n = se.shape[0]
        width = (n - 1) // 2
        off = (se_coef * se)[None, None, :, None, None]
        xp = jnp.pad(x, ((0, 0), (0, 0), (0, 0), (width, width)),
                     constant_values=NEG_PAD)
        wins = jnp.stack([xp[..., j:j + W] for j in range(n)], axis=2)
        tmp = jnp.max(wins - off, axis=2)
        tp = jnp.pad(tmp, ((0, 0), (0, 0), (width, width), (0, 0)),
                     constant_values=NEG_PAD)
        wins = jnp.stack([tp[..., j:j + H, :] for j in range(n)], axis=2)
        outs.append(jnp.max(wins - off, axis=2))
    return jnp.stack(outs, axis=2)


if __name__ == "__main__":
    # n_scales=4 -> scales [3, 15, 63], widths [8, 16, 32], SE lengths [17, 33, 65].
    se_coef, ses = make_dilation2d_params(se_coef=0.5, base=2.0,
                                          zero_scale=1.0, n_scales=4)

    key = jax.random.PRNGKey(0)
    x = jax.random.normal(key, (2, 4, 16, 16), dtype=jnp.float32)

    fwd = jax.jit(lambda v: dilation2d_forward(v, se_coef, ses))
    out = jax.block_until_ready(fwd(x))

    ref = jax.block_until_ready(_dilation2d_ref(x, se_coef, ses))
    assert out.shape == (2, 4, 4, 16, 16), out.shape
    np.testing.assert_allclose(np.asarray(out), np.asarray(ref),
                               rtol=1e-5, atol=1e-5)

    print("KERNEL_OK")
</pallas_src>

<mosaic_0001>
module attributes {stable_mosaic.version = 11 : i64} {
  func.func @kernel(%arg0: i32, %arg1: memref<16x128xf32, #tpu.memory_space<vmem>>, %arg2: memref<3x16x128xf32, #tpu.memory_space<vmem>>, %arg3: memref<80x128xf32, #tpu.memory_space<vmem>>) attributes {dimension_semantics = [#tpu.dimension_semantics<arbitrary>], iteration_bounds = array<i64: 1>, scalar_prefetch = 0 : i64, scratch_operands = 1 : i64, tpu.core_type = #tpu.core_type<tc>, window_params = [{transform_indices = @transform_0, window_bounds = array<i64: 16, 128>}, {transform_indices = @transform_1, window_bounds = array<i64: 3, 16, 128>}]} {
    %c0_i32 = arith.constant 0 : i32
    %0 = arith.cmpi eq, %arg0, %c0_i32 : i32
    %1 = arith.extui %0 : i1 to i32
    %c0_i32_0 = arith.constant 0 : i32
    %2 = arith.cmpi ne, %1, %c0_i32_0 : i32
    scf.if %2 {
      %cst_290 = arith.constant -1.000000e+04 : f32
      %465 = vector.broadcast %cst_290 : f32 to vector<32x128xf32>
      %c0_291 = arith.constant 0 : index
      %c0_292 = arith.constant 0 : index
      %466 = vector.load %arg3[%c0_291, %c0_292] : memref<80x128xf32, #tpu.memory_space<vmem>>, vector<32x128xf32>
      tpu.vector_store %arg3[%c0_291, %c0_292], %465 {strides = array<i32>} : memref<80x128xf32, #tpu.memory_space<vmem>>, vector<32x128xf32>,
      %c48_293 = arith.constant 48 : index
      %c0_294 = arith.constant 0 : index
      %467 = vector.load %arg3[%c48_293, %c0_294] : memref<80x128xf32, #tpu.memory_space<vmem>>, vector<32x128xf32>
      tpu.vector_store %arg3[%c48_293, %c0_294], %465 {strides = array<i32>} : memref<80x128xf32, #tpu.memory_space<vmem>>, vector<32x128xf32>,
    } else {
    }
    %c0 = arith.constant 0 : index
    %c0_1 = arith.constant 0 : index
    %3 = vector.load %arg1[%c0, %c0_1] : memref<16x128xf32, #tpu.memory_space<vmem>>, vector<16x128xf32>
    %c32 = arith.constant 32 : index
    %c0_2 = arith.constant 0 : index
    %4 = vector.load %arg3[%c32, %c0_2] : memref<80x128xf32, #tpu.memory_space<vmem>>, vector<16x128xf32>
    tpu.vector_store %arg3[%c32, %c0_2], %3 {strides = array<i32>} : memref<80x128xf32, #tpu.memory_space<vmem>>, vector<16x128xf32>,
    %c24 = arith.constant 24 : index
    %c0_3 = arith.constant 0 : index
    %5 = vector.load %arg3[%c24, %c0_3] : memref<80x128xf32, #tpu.memory_space<vmem>>, vector<16x128xf32>
    %cst = arith.constant 2.66666675 : f32
    %6 = vector.broadcast %cst : f32 to vector<16x128xf32>
    %7 = arith.subf %5, %6 : vector<16x128xf32>
    %c25 = arith.constant 25 : index
    %c0_4 = arith.constant 0 : index
    %8 = vector.load %arg3[%c25, %c0_4] : memref<80x128xf32, #tpu.memory_space<vmem>>, vector<16x128xf32>
    %cst_5 = arith.constant 2.04166675 : f32
    %9 = vector.broadcast %cst_5 : f32 to vector<16x128xf32>
    %10 = arith.subf %8, %9 : vector<16x128xf32>
    %c26 = arith.constant 26 : index
    %c0_6 = arith.constant 0 : index
    %11 = vector.load %arg3[%c26, %c0_6] : memref<80x128xf32, #tpu.memory_space<vmem>>, vector<16x128xf32>
    %cst_7 = arith.constant 1.500000e+00 : f32
    %12 = vector.broadcast %cst_7 : f32 to vector<16x128xf32>
    %13 = arith.subf %11, %12 : vector<16x128xf32>
    %c27 = arith.constant 27 : index
    %c0_8 = arith.constant 0 : index
    %14 = vector.load %arg3[%c27, %c0_8] : memref<80x128xf32, #tpu.memory_space<vmem>>, vector<16x128xf32>
    %cst_9 = arith.constant 1.04166663 : f32
    %15 = vector.broadcast %cst_9 : f32 to vector<16x128xf32>
    %16 = arith.subf %14, %15 : vector<16x128xf32>
    %c28 = arith.constant 28 : index
    %c0_10 = arith.constant 0 : index
    %17 = vector.load %arg3[%c28, %c0_10] : memref<80x128xf32, #tpu.memory_space<vmem>>, vector<16x128xf32>
    %cst_11 = arith.constant 0.666666686 : f32
    %18 = vector.broadcast %cst_11 : f32 to vector<16x128xf32>
    %19 = arith.subf %17, %18 : vector<16x128xf32>
    %20 = arith.maximumf %7, %19 : vector<16x128xf32>
    %c29 = arith.constant 29 : index
    %c0_12 = arith.constant 0 : index
    %21 = vector.load %arg3[%c29, %c0_12] : memref<80x128xf32, #tpu.memory_space<vmem>>, vector<16x128xf32>
    %cst_13 = arith.constant 3.750000e-01 : f32
    %22 = vector.broadcast %cst_13 : f32 to vector<16x128xf32>
    %23 = arith.subf %21, %22 : vector<16x128xf32>
    %24 = arith.maximumf %10, %23 : vector<16x128xf32>
    %c30 = arith.constant 30 : index
    %c0_14 = arith.constant 0 : index
    %25 = vector.load %arg3[%c30, %c0_14] : memref<80x128xf32, #tpu.memory_space<vmem>>, vector<16x128xf32>
    %cst_15 = arith.constant 0.166666672 : f32
    %26 = vector.broadcast %cst_15 : f32 to vector<16x128xf32>
    %27 = arith.subf %25, %26 : vector<16x128xf32>
    %28 = arith.maximumf %13, %27 : vector<16x128xf32>
    %c31 = arith.constant 31 : index
    %c0_16 = arith.constant 0 : index
    %29 = vector.load %arg3[%c31, %c0_16] : memref<80x128xf32, #tpu.memory_space<vmem>>, vector<16x128xf32>
    %cst_17 = arith.constant 0.0416666679 : f32
    %30 = vector.broadcast %cst_17 : f32 to vector<16x128xf32>
    %31 = arith.subf %29, %30 : vector<16x128xf32>
    %32 = arith.maximumf %16, %31 : vector<16x128xf32>
    %c32_18 = arith.constant 32 : index
    %c0_19 = arith.constant 0 : index
    %33 = vector.load %arg3[%c32_18, %c0_19] : memref<80x128xf32, #tpu.memory_space<vmem>>, vector<16x128xf32>
    %34 = arith.maximumf %20, %33 : vector<16x128xf32>
    %c33 = arith.constant 33 : index
    %c0_20 = arith.constant 0 : index
    %35 = vector.load %arg3[%c33, %c0_20] : memref<80x128xf32, #tpu.memory_space<vmem>>, vector<16x128xf32>
    %cst_21 = arith.constant 0.0416666679 : f32
    %36 = vector.broadcast %cst_21 : f32 to vector<16x128xf32>
    %37 = arith.subf %35, %36 : vector<16x128xf32>
    %38 = arith.maximumf %24, %37 : vector<16x128xf32>
    %c34 = arith.constant 34 : index
    %c0_22 = arith.constant 0 : index
    %39 = vector.load %arg3[%c34, %c0_22] : memref<80x128xf32, #tpu.memory_space<vmem>>, vector<16x128xf32>
    %cst_23 = arith.constant 0.166666672 : f32
    %40 = vector.broadcast %cst_23 : f32 to vector<16x128xf32>
    %41 = arith.subf %39, %40 : vector<16x128xf32>
    %42 = arith.maximumf %28, %41 : vector<16x128xf32>
    %c35 = arith.constant 35 : index
    %c0_24 = arith.constant 0 : index
    %43 = vector.load %arg3[%c35, %c0_24] : memref<80x128xf32, #tpu.memory_space<vmem>>, vector<16x128xf32>
    %cst_25 = arith.constant 3.750000e-01 : f32
    %44 = vector.broadcast %cst_25 : f32 to vector<16x128xf32>
    %45 = arith.subf %43, %44 : vector<16x128xf32>
    %46 = arith.maximumf %32, %45 : vector<16x128xf32>
    %c36 = arith.constant 36 : index
    %c0_26 = arith.constant 0 : index
    %47 = vector.load %arg3[%c36, %c0_26] : memref<80x128xf32, #tpu.memory_space<vmem>>, vector<16x128xf32>
    %cst_27 = arith.constant 0.666666686 : f32
    %48 = vector.broadcast %cst_27 : f32 to vector<16x128xf32>
    %49 = arith.subf %47, %48 : vector<16x128xf32>
    %50 = arith.maximumf %34, %49 : vector<16x128xf32>
    %c37 = arith.constant 37 : index
    %c0_28 = arith.constant 0 : index
    %51 = vector.load %arg3[%c37, %c0_28] : memref<80x128xf32, #tpu.memory_space<vmem>>, vector<16x128xf32>
    %cst_29 = arith.constant 1.04166663 : f32
    %52 = vector.broadcast %cst_29 : f32 to vector<16x128xf32>
    %53 = arith.subf %51, %52 : vector<16x128xf32>
    %54 = arith.maximumf %38, %53 : vector<16x128xf32>
    %c38 = arith.constant 38 : index
    %c0_30 = arith.constant 0 : index
    %55 = vector.load %arg3[%c38, %c0_30] : memref<80x128xf32, #tpu.memory_space<vmem>>, vector<16x128xf32>
    %cst_31 = arith.constant 1.500000e+00 : f32
    %56 = vector.broadcast %cst_31 : f32 to vector<16x128xf32>
    %57 = arith.subf %55, %56 : vector<16x128xf32>
    %58 = arith.maximumf %42, %57 : vector<16x128xf32>
    %c39 = arith.constant 39 : index
    %c0_32 = arith.constant 0 : index
    %59 = vector.load %arg3[%c39, %c0_32] : memref<80x128xf32, #tpu.memory_space<vmem>>, vector<16x128xf32>
    %cst_33 = arith.constant 2.04166675 : f32
    %60 = vector.broadcast %cst_33 : f32 to vector<16x128xf32>
    %61 = arith.subf %59, %60 : vector<16x128xf32>
    %62 = arith.maximumf %46, %61 : vector<16x128xf32>
    %c40 = arith.constant 40 : index
    %c0_34 = arith.constant 0 : index
    %63 = vector.load %arg3[%c40, %c0_34] : memref<80x128xf32, #tpu.memory_space<vmem>>, vector<16x128xf32>
    %cst_35 = arith.constant 2.66666675 : f32
    %64 = vector.broadcast %cst_35 : f32 to vector<16x128xf32>
    %65 = arith.subf %63, %64 : vector<16x128xf32>
    %66 = arith.maximumf %50, %65 : vector<16x128xf32>
    %67 = arith.maximumf %66, %54 : vector<16x128xf32>
    %68 = arith.maximumf %67, %58 : vector<16x128xf32>
    %69 = arith.maximumf %68, %62 : vector<16x128xf32>
    %c0_36 = arith.constant 0 : index
    %c0_37 = arith.constant 0 : index
    %c0_38 = arith.constant 0 : index
    %70 = vector.load %arg2[%c0_36, %c0_37, %c0_38] : memref<3x16x128xf32, #tpu.memory_space<vmem>>, vector<1x16x128xf32>
    %71 = vector.shape_cast %70 : vector<1x16x128xf32> to vector<16x128xf32>
    %72 = vector.shape_cast %69 : vector<16x128xf32> to vector<1x16x128xf32>
    tpu.vector_store %arg2[%c0_36, %c0_37, %c0_38], %72 {strides = array<i32>} : memref<3x16x128xf32, #tpu.memory_space<vmem>>, vector<1x16x128xf32>,
    %c16 = arith.constant 16 : index
    %c0_39 = arith.constant 0 : index
    %73 = vector.load %arg3[%c16, %c0_39] : memref<80x128xf32, #tpu.memory_space<vmem>>, vector<16x128xf32>
    %cst_40 = arith.constant 2.13333344 : f32
    %74 = vector.broadcast %cst_40 : f32 to vector<16x128xf32>
    %75 = arith.subf %73, %74 : vector<16x128xf32>
    %c17 = arith.constant 17 : index
    %c0_41 = arith.constant 0 : index
    %76 = vector.load %arg3[%c17, %c0_41] : memref<80x128xf32, #tpu.memory_space<vmem>>, vector<16x128xf32>
    %cst_42 = arith.constant 1.875000e+00 : f32
    %77 = vector.broadcast %cst_42 : f32 to vector<16x128xf32>
    %78 = arith.subf %76, %77 : vector<16x128xf32>
    %c18 = arith.constant 18 : index
    %c0_43 = arith.constant 0 : index
    %79 = vector.load %arg3[%c18, %c0_43] : memref<80x128xf32, #tpu.memory_space<vmem>>, vector<16x128xf32>
    %cst_44 = arith.constant 1.63333333 : f32
    %80 = vector.broadcast %cst_44 : f32 to vector<16x128xf32>
    %81 = arith.subf %79, %80 : vector<16x128xf32>
    %c19 = arith.constant 19 : index
    %c0_45 = arith.constant 0 : index
    %82 = vector.load %arg3[%c19, %c0_45] : memref<80x128xf32, #tpu.memory_space<vmem>>, vector<16x128xf32>
    %cst_46 = arith.constant 1.4083333 : f32
    %83 = vector.broadcast %cst_46 : f32 to vector<16x128xf32>
    %84 = arith.subf %82, %83 : vector<16x128xf32>
    %c20 = arith.constant 20 : index
    %c0_47 = arith.constant 0 : index
    %85 = vector.load %arg3[%c20, %c0_47] : memref<80x128xf32, #tpu.memory_space<vmem>>, vector<16x128xf32>
    %cst_48 = arith.constant 1.200000e+00 : f32
    %86 = vector.broadcast %cst_48 : f32 to vector<16x128xf32>
    %87 = arith.subf %85, %86 : vector<16x128xf32>
    %88 = arith.maximumf %75, %87 : vector<16x128xf32>
    %c21 = arith.constant 21 : index
    %c0_49 = arith.constant 0 : index
    %89 = vector.load %arg3[%c21, %c0_49] : memref<80x128xf32, #tpu.memory_space<vmem>>, vector<16x128xf32>
    %cst_50 = arith.constant 1.00833333 : f32
    %90 = vector.broadcast %cst_50 : f32 to vector<16x128xf32>
    %91 = arith.subf %89, %90 : vector<16x128xf32>
    %92 = arith.maximumf %78, %91 : vector<16x128xf32>
    %c22 = arith.constant 22 : index
    %c0_51 = arith.constant 0 : index
    %93 = vector.load %arg3[%c22, %c0_51] : memref<80x128xf32, #tpu.memory_space<vmem>>, vector<16x128xf32>
    %cst_52 = arith.constant 0.833333313 : f32
    %94 = vector.broadcast %cst_52 : f32 to vector<16x128xf32>
    %95 = arith.subf %93, %94 : vector<16x128xf32>
    %96 = arith.maximumf %81, %95 : vector<16x128xf32>
    %c23 = arith.constant 23 : index
    %c0_53 = arith.constant 0 : index
    %97 = vector.load %arg3[%c23, %c0_53] : memref<80x128xf32, #tpu.memory_space<vmem>>, vector<16x128xf32>
    %cst_54 = arith.constant 6.750000e-01 : f32
    %98 = vector.broadcast %cst_54 : f32 to vector<16x128xf32>
    %99 = arith.subf %97, %98 : vector<16x128xf32>
    %100 = arith.maximumf %84, %99 : vector<16x128xf32>
    %c24_55 = arith.constant 24 : index
    %c0_56 = arith.constant 0 : index
    %101 = vector.load %arg3[%c24_55, %c0_56] : memref<80x128xf32, #tpu.memory_space<vmem>>, vector<16x128xf32>
    %cst_57 = arith.constant 0.533333361 : f32
    %102 = vector.broadcast %cst_57 : f32 to vector<16x128xf32>
    %103 = arith.subf %101, %102 : vector<16x128xf32>
    %104 = arith.maximumf %88, %103 : vector<16x128xf32>
    %c25_58 = arith.constant 25 : index
    %c0_59 = arith.constant 0 : index
    %105 = vector.load %arg3[%c25_58, %c0_59] : memref<80x128xf32, #tpu.memory_space<vmem>>, vector<16x128xf32>
    %cst_60 = arith.constant 0.408333331 : f32
    %106 = vector.broadcast %cst_60 : f32 to vector<16x128xf32>
    %107 = arith.subf %105, %106 : vector<16x128xf32>
    %108 = arith.maximumf %92, %107 : vector<16x128xf32>
    %c26_61 = arith.constant 26 : index
    %c0_62 = arith.constant 0 : index
    %109 = vector.load %arg3[%c26_61, %c0_62] : memref<80x128xf32, #tpu.memory_space<vmem>>, vector<16x128xf32>
    %cst_63 = arith.constant 3.000000e-01 : f32
    %110 = vector.broadcast %cst_63 : f32 to vector<16x128xf32>
    %111 = arith.subf %109, %110 : vector<16x128xf32>
    %112 = arith.maximumf %96, %111 : vector<16x128xf32>
    %c27_64 = arith.constant 27 : index
    %c0_65 = arith.constant 0 : index
    %113 = vector.load %arg3[%c27_64, %c0_65] : memref<80x128xf32, #tpu.memory_space<vmem>>, vector<16x128xf32>
    %cst_66 = arith.constant 0.208333328 : f32
    %114 = vector.broadcast %cst_66 : f32 to vector<16x128xf32>
    %115 = arith.subf %113, %114 : vector<16x128xf32>
    %116 = arith.maximumf %100, %115 : vector<16x128xf32>
    %c28_67 = arith.constant 28 : index
    %c0_68 = arith.constant 0 : index
    %117 = vector.load %arg3[%c28_67, %c0_68] : memref<80x128xf32, #tpu.memory_space<vmem>>, vector<16x128xf32>
    %cst_69 = arith.constant 0.13333334 : f32
    %118 = vector.broadcast %cst_69 : f32 to vector<16x128xf32>
    %119 = arith.subf %117, %118 : vector<16x128xf32>
    %120 = arith.maximumf %104, %119 : vector<16x128xf32>
    %c29_70 = arith.constant 29 : index
    %c0_71 = arith.constant 0 : index
    %121 = vector.load %arg3[%c29_70, %c0_71] : memref<80x128xf32, #tpu.memory_space<vmem>>, vector<16x128xf32>
    %cst_72 = arith.constant 7.500000e-02 : f32
    %122 = vector.broadcast %cst_72 : f32 to vector<16x128xf32>
    %123 = arith.subf %121, %122 : vector<16x128xf32>
    %124 = arith.maximumf %108, %123 : vector<16x128xf32>
    %c30_73 = arith.constant 30 : index
    %c0_74 = arith.constant 0 : index
    %125 = vector.load %arg3[%c30_73, %c0_74] : memref<80x128xf32, #tpu.memory_space<vmem>>, vector<16x128xf32>
    %cst_75 = arith.constant 0.0333333351 : f32
    %126 = vector.broadcast %cst_75 : f32 to vector<16x128xf32>
    %127 = arith.subf %125, %126 : vector<16x128xf32>
    %128 = arith.maximumf %112, %127 : vector<16x128xf32>
    %c31_76 = arith.constant 31 : index
    %c0_77 = arith.constant 0 : index
    %129 = vector.load %arg3[%c31_76, %c0_77] : memref<80x128xf32, #tpu.memory_space<vmem>>, vector<16x128xf32>
    %cst_78 = arith.constant 0.00833333377 : f32
    %130 = vector.broadcast %cst_78 : f32 to vector<16x128xf32>
    %131 = arith.subf %129, %130 : vector<16x128xf32>
    %132 = arith.maximumf %116, %131 : vector<16x128xf32>
    %c32_79 = arith.constant 32 : index
    %c0_80 = arith.constant 0 : index
    %133 = vector.load %arg3[%c32_79, %c0_80] : memref<80x128xf32, #tpu.memory_space<vmem>>, vector<16x128xf32>
    %134 = arith.maximumf %120, %133 : vector<16x128xf32>
    %c33_81 = arith.constant 33 : index
    %c0_82 = arith.constant 0 : index
    %135 = vector.load %arg3[%c33_81, %c0_82] : memref<80x128xf32, #tpu.memory_space<vmem>>, vector<16x128xf32>
    %cst_83 = arith.constant 0.00833333377 : f32
    %136 = vector.broadcast %cst_83 : f32 to vector<16x128xf32>
    %137 = arith.subf %135, %136 : vector<16x128xf32>
    %138 = arith.maximumf %124, %137 : vector<16x128xf32>
    %c34_84 = arith.constant 34 : index
    %c0_85 = arith.constant 0 : index
    %139 = vector.load %arg3[%c34_84, %c0_85] : memref<80x128xf32, #tpu.memory_space<vmem>>, vector<16x128xf32>
    %cst_86 = arith.constant 0.0333333351 : f32
    %140 = vector.broadcast %cst_86 : f32 to vector<16x128xf32>
    %141 = arith.subf %139, %140 : vector<16x128xf32>
    %142 = arith.maximumf %128, %141 : vector<16x128xf32>
    %c35_87 = arith.constant 35 : index
    %c0_88 = arith.constant 0 : index
    %143 = vector.load %arg3[%c35_87, %c0_88] : memref<80x128xf32, #tpu.memory_space<vmem>>, vector<16x128xf32>
    %cst_89 = arith.constant 7.500000e-02 : f32
    %144 = vector.broadcast %cst_89 : f32 to vector<16x128xf32>
    %145 = arith.subf %143, %144 : vector<16x128xf32>
    %146 = arith.maximumf %132, %145 : vector<16x128xf32>
    %c36_90 = arith.constant 36 : index
    %c0_91 = arith.constant 0 : index
    %147 = vector.load %arg3[%c36_90, %c0_91] : memref<80x128xf32, #tpu.memory_space<vmem>>, vector<16x128xf32>
    %cst_92 = arith.constant 0.13333334 : f32
    %148 = vector.broadcast %cst_92 : f32 to vector<16x128xf32>
    %149 = arith.subf %147, %148 : vector<16x128xf32>
    %150 = arith.maximumf %134, %149 : vector<16x128xf32>
    %c37_93 = arith.constant 37 : index
    %c0_94 = arith.constant 0 : index
    %151 = vector.load %arg3[%c37_93, %c0_94] : memref<80x128xf32, #tpu.memory_space<vmem>>, vector<16x128xf32>
    %cst_95 = arith.constant 0.208333328 : f32
    %152 = vector.broadcast %cst_95 : f32 to vector<16x128xf32>
    %153 = arith.subf %151, %152 : vector<16x128xf32>
    %154 = arith.maximumf %138, %153 : vector<16x128xf32>
    %c38_96 = arith.constant 38 : index
    %c0_97 = arith.constant 0 : index
    %155 = vector.load %arg3[%c38_96, %c0_97] : memref<80x128xf32, #tpu.memory_space<vmem>>, vector<16x128xf32>
    %cst_98 = arith.constant 3.000000e-01 : f32
    %156 = vector.broadcast %cst_98 : f32 to vector<16x128xf32>
    %157 = arith.subf %155, %156 : vector<16x128xf32>
    %158 = arith.maximumf %142, %157 : vector<16x128xf32>
    %c39_99 = arith.constant 39 : index
    %c0_100 = arith.constant 0 : index
    %159 = vector.load %arg3[%c39_99, %c0_100] : memref<80x128xf32, #tpu.memory_space<vmem>>, vector<16x128xf32>
    %cst_101 = arith.constant 0.408333331 : f32
    %160 = vector.broadcast %cst_101 : f32 to vector<16x128xf32>
    %161 = arith.subf %159, %160 : vector<16x128xf32>
    %162 = arith.maximumf %146, %161 : vector<16x128xf32>
    %c40_102 = arith.constant 40 : index
    %c0_103 = arith.constant 0 : index
    %163 = vector.load %arg3[%c40_102, %c0_103] : memref<80x128xf32, #tpu.memory_space<vmem>>, vector<16x128xf32>
    %cst_104 = arith.constant 0.533333361 : f32
    %164 = vector.broadcast %cst_104 : f32 to vector<16x128xf32>
    %165 = arith.subf %163, %164 : vector<16x128xf32>
    %166 = arith.maximumf %150, %165 : vector<16x128xf32>
    %c41 = arith.constant 41 : index
    %c0_105 = arith.constant 0 : index
    %167 = vector.load %arg3[%c41, %c0_105] : memref<80x128xf32, #tpu.memory_space<vmem>>, vector<16x128xf32>
    %cst_106 = arith.constant 6.750000e-01 : f32
    %168 = vector.broadcast %cst_106 : f32 to vector<16x128xf32>
    %169 = arith.subf %167, %168 : vector<16x128xf32>
    %170 = arith.maximumf %154, %169 : vector<16x128xf32>
    %c42 = arith.constant 42 : index
    %c0_107 = arith.constant 0 : index
    %171 = vector.load %arg3[%c42, %c0_107] : memref<80x128xf32, #tpu.memory_space<vmem>>, vector<16x128xf32>
    %cst_108 = arith.constant 0.833333313 : f32
    %172 = vector.broadcast %cst_108 : f32 to vector<16x128xf32>
    %173 = arith.subf %171, %172 : vector<16x128xf32>
    %174 = arith.maximumf %158, %173 : vector<16x128xf32>
    %c43 = arith.constant 43 : index
    %c0_109 = arith.constant 0 : index
    %175 = vector.load %arg3[%c43, %c0_109] : memref<80x128xf32, #tpu.memory_space<vmem>>, vector<16x128xf32>
    %cst_110 = arith.constant 1.00833333 : f32
    %176 = vector.broadcast %cst_110 : f32 to vector<16x128xf32>
    %177 = arith.subf %175, %176 : vector<16x128xf32>
    %178 = arith.maximumf %162, %177 : vector<16x128xf32>
    %c44 = arith.constant 44 : index
    %c0_111 = arith.constant 0 : index
    %179 = vector.load %arg3[%c44, %c0_111] : memref<80x128xf32, #tpu.memory_space<vmem>>, vector<16x128xf32>
    %cst_112 = arith.constant 1.200000e+00 : f32
    %180 = vector.broadcast %cst_112 : f32 to vector<16x128xf32>
    %181 = arith.subf %179, %180 : vector<16x128xf32>
    %182 = arith.maximumf %166, %181 : vector<16x128xf32>
    %c45 = arith.constant 45 : index
    %c0_113 = arith.constant 0 : index
    %183 = vector.load %arg3[%c45, %c0_113] : memref<80x128xf32, #tpu.memory_space<vmem>>, vector<16x128xf32>
    %cst_114 = arith.constant 1.4083333 : f32
    %184 = vector.broadcast %cst_114 : f32 to vector<16x128xf32>
    %185 = arith.subf %183, %184 : vector<16x128xf32>
    %186 = arith.maximumf %170, %185 : vector<16x128xf32>
    %c46 = arith.constant 46 : index
    %c0_115 = arith.constant 0 : index
    %187 = vector.load %arg3[%c46, %c0_115] : memref<80x128xf32, #tpu.memory_space<vmem>>, vector<16x128xf32>
    %cst_116 = arith.constant 1.63333333 : f32
    %188 = vector.broadcast %cst_116 : f32 to vector<16x128xf32>
    %189 = arith.subf %187, %188 : vector<16x128xf32>
    %190 = arith.maximumf %174, %189 : vector<16x128xf32>
    %c47 = arith.constant 47 : index
    %c0_117 = arith.constant 0 : index
    %191 = vector.load %arg3[%c47, %c0_117] : memref<80x128xf32, #tpu.memory_space<vmem>>, vector<16x128xf32>
    %cst_118 = arith.constant 1.875000e+00 : f32
    %192 = vector.broadcast %cst_118 : f32 to vector<16x128xf32>
    %193 = arith.subf %191, %192 : vector<16x128xf32>
    %194 = arith.maximumf %178, %193 : vector<16x128xf32>
    %c48 = arith.constant 48 : index
    %c0_119 = arith.constant 0 : index
    %195 = vector.load %arg3[%c48, %c0_119] : memref<80x128xf32, #tpu.memory_space<vmem>>, vector<16x128xf32>
    %cst_120 = arith.constant 2.13333344 : f32
    %196 = vector.broadcast %cst_120 : f32 to vector<16x128xf32>
    %197 = arith.subf %195, %196 : vector<16x128xf32>
    %198 = arith.maximumf %182, %197 : vector<16x128xf32>
    %199 = arith.maximumf %198, %186 : vector<16x128xf32>
    %200 = arith.maximumf %199, %190 : vector<16x128xf32>
    %201 = arith.maximumf %200, %194 : vector<16x128xf32>
    %c1 = arith.constant 1 : index
    %c0_121 = arith.constant 0 : index
    %c0_122 = arith.constant 0 : index
    %202 = vector.load %arg2[%c1, %c0_121, %c0_122] : memref<3x16x128xf32, #tpu.memory_space<vmem>>, vector<1x16x128xf32>
    %203 = vector.shape_cast %202 : vector<1x16x128xf32> to vector<16x128xf32>
    %204 = vector.shape_cast %201 : vector<16x128xf32> to vector<1x16x128xf32>
    tpu.vector_store %arg2[%c1, %c0_121, %c0_122], %204 {strides = array<i32>} : memref<3x16x128xf32, #tpu.memory_space<vmem>>, vector<1x16x128xf32>,
    %c0_123 = arith.constant 0 : index
    %c0_124 = arith.constant 0 : index
    %205 = vector.load %arg3[%c0_123, %c0_124] : memref<80x128xf32, #tpu.memory_space<vmem>>, vector<16x128xf32>
    %cst_125 = arith.constant 2.03174615 : f32
    %206 = vector.broadcast %cst_125 : f32 to vector<16x128xf32>
    %207 = arith.subf %205, %206 : vector<16x128xf32>
    %c1_126 = arith.constant 1 : index
    %c0_127 = arith.constant 0 : index
    %208 = vector.load %arg3[%c1_126, %c0_127] : memref<80x128xf32, #tpu.memory_space<vmem>>, vector<16x128xf32>
    %cst_128 = arith.constant 1.90674603 : f32
    %209 = vector.broadcast %cst_128 : f32 to vector<16x128xf32>
    %210 = arith.subf %208, %209 : vector<16x128xf32>
    %c2 = arith.constant 2 : index
    %c0_129 = arith.constant 0 : index
    %211 = vector.load %arg3[%c2, %c0_129] : memref<80x128xf32, #tpu.memory_space<vmem>>, vector<16x128xf32>
    %cst_130 = arith.constant 1.78571427 : f32
    %212 = vector.broadcast %cst_130 : f32 to vector<16x128xf32>
    %213 = arith.subf %211, %212 : vector<16x128xf32>
    %c3 = arith.constant 3 : index
    %c0_131 = arith.constant 0 : index
    %214 = vector.load %arg3[%c3, %c0_131] : memref<80x128xf32, #tpu.memory_space<vmem>>, vector<16x128xf32>
    %cst_132 = arith.constant 1.66865075 : f32
    %215 = vector.broadcast %cst_132 : f32 to vector<16x128xf32>
    %216 = arith.subf %214, %215 : vector<16x128xf32>
    %c4 = arith.constant 4 : index
    %c0_133 = arith.constant 0 : index
    %217 = vector.load %arg3[%c4, %c0_133] : memref<80x128xf32, #tpu.memory_space<vmem>>, vector<16x128xf32>
    %cst_134 = arith.constant 1.55555558 : f32
    %218 = vector.broadcast %cst_134 : f32 to vector<16x128xf32>
    %219 = arith.subf %217, %218 : vector<16x128xf32>
    %220 = arith.maximumf %207, %219 : vector<16x128xf32>
    %c5 = arith.constant 5 : index
    %c0_135 = arith.constant 0 : index
    %221 = vector.load %arg3[%c5, %c0_135] : memref<80x128xf32, #tpu.memory_space<vmem>>, vector<16x128xf32>
    %cst_136 = arith.constant 1.44642854 : f32
    %222 = vector.broadcast %cst_136 : f32 to vector<16x128xf32>
    %223 = arith.subf %221, %222 : vector<16x128xf32>
    %224 = arith.maximumf %210, %223 : vector<16x128xf32>
    %c6 = arith.constant 6 : index
    %c0_137 = arith.constant 0 : index
    %225 = vector.load %arg3[%c6, %c0_137] : memref<80x128xf32, #tpu.memory_space<vmem>>, vector<16x128xf32>
    %cst_138 = arith.constant 1.34126985 : f32
    %226 = vector.broadcast %cst_138 : f32 to vector<16x128xf32>
    %227 = arith.subf %225, %226 : vector<16x128xf32>
    %228 = arith.maximumf %213, %227 : vector<16x128xf32>
    %c7 = arith.constant 7 : index
    %c0_139 = arith.constant 0 : index
    %229 = vector.load %arg3[%c7, %c0_139] : memref<80x128xf32, #tpu.memory_space<vmem>>, vector<16x128xf32>
    %cst_140 = arith.constant 1.2400794 : f32
    %230 = vector.broadcast %cst_140 : f32 to vector<16x128xf32>
    %231 = arith.subf %229, %230 : vector<16x128xf32>
    %232 = arith.maximumf %216, %231 : vector<16x128xf32>
    %c8 = arith.constant 8 : index
    %c0_141 = arith.constant 0 : index
    %233 = vector.load %arg3[%c8, %c0_141] : memref<80x128xf32, #tpu.memory_space<vmem>>, vector<16x128xf32>
    %cst_142 = arith.constant 1.14285719 : f32
    %234 = vector.broadcast %cst_142 : f32 to vector<16x128xf32>
    %235 = arith.subf %233, %234 : vector<16x128xf32>
    %236 = arith.maximumf %220, %235 : vector<16x128xf32>
    %c9 = arith.constant 9 : index
    %c0_143 = arith.constant 0 : index
    %237 = vector.load %arg3[%c9, %c0_143] : memref<80x128xf32, #tpu.memory_space<vmem>>, vector<16x128xf32>
    %cst_144 = arith.constant 1.04960322 : f32
    %238 = vector.broadcast %cst_144 : f32 to vector<16x128xf32>
    %239 = arith.subf %237, %238 : vector<16x128xf32>
    %240 = arith.maximumf %224, %239 : vector<16x128xf32>
    %c10 = arith.constant 10 : index
    %c0_145 = arith.constant 0 : index
    %241 = vector.load %arg3[%c10, %c0_145] : memref<80x128xf32, #tpu.memory_space<vmem>>, vector<16x128xf32>
    %cst_146 = arith.constant 0.960317432 : f32
    %242 = vector.broadcast %cst_146 : f32 to vector<16x128xf32>
    %243 = arith.subf %241, %242 : vector<16x128xf32>
    %244 = arith.maximumf %228, %243 : vector<16x128xf32>
    %c11 = arith.constant 11 : index
    %c0_147 = arith.constant 0 : index
    %245 = vector.load %arg3[%c11, %c0_147] : memref<80x128xf32, #tpu.memory_space<vmem>>, vector<16x128xf32>
    %cst_148 = arith.constant 8.750000e-01 : f32
    %246 = vector.broadcast %cst_148 : f32 to vector<16x128xf32>
    %247 = arith.subf %245, %246 : vector<16x128xf32>
    %248 = arith.maximumf %232, %247 : vector<16x128xf32>
    %c12 = arith.constant 12 : index
    %c0_149 = arith.constant 0 : index
    %249 = vector.load %arg3[%c12, %c0_149] : memref<80x128xf32, #tpu.memory_space<vmem>>, vector<16x128xf32>
    %cst_150 = arith.constant 0.793650805 : f32
    %250 = vector.broadcast %cst_150 : f32 to vector<16x128xf32>
    %251 = arith.subf %249, %250 : vector<16x128xf32>
    %252 = arith.maximumf %236, %251 : vector<16x128xf32>
    %c13 = arith.constant 13 : index
    %c0_151 = arith.constant 0 : index
    %253 = vector.load %arg3[%c13, %c0_151] : memref<80x128xf32, #tpu.memory_space<vmem>>, vector<16x128xf32>
    %cst_152 = arith.constant 0.716269851 : f32
    %254 = vector.broadcast %cst_152 : f32 to vector<16x128xf32>
    %255 = arith.subf %253, %254 : vector<16x128xf32>
    %256 = arith.maximumf %240, %255 : vector<16x128xf32>
    %c14 = arith.constant 14 : index
    %c0_153 = arith.constant 0 : index
    %257 = vector.load %arg3[%c14, %c0_153] : memref<80x128xf32, #tpu.memory_space<vmem>>, vector<16x128xf32>
    %cst_154 = arith.constant 0.642857134 : f32
    %258 = vector.broadcast %cst_154 : f32 to vector<16x128xf32>
    %259 = arith.subf %257, %258 : vector<16x128xf32>
    %260 = arith.maximumf %244, %259 : vector<16x128xf32>
    %c15 = arith.constant 15 : index
    %c0_155 = arith.constant 0 : index
    %261 = vector.load %arg3[%c15, %c0_155] : memref<80x128xf32, #tpu.memory_space<vmem>>, vector<16x128xf32>
    %cst_156 = arith.constant 0.573412716 : f32
    %262 = vector.broadcast %cst_156 : f32 to vector<16x128xf32>
    %263 = arith.subf %261, %262 : vector<16x128xf32>
    %264 = arith.maximumf %248, %263 : vector<16x128xf32>
    %c16_157 = arith.constant 16 : index
    %c0_158 = arith.constant 0 : index
    %265 = vector.load %arg3[%c16_157, %c0_158] : memref<80x128xf32, #tpu.memory_space<vmem>>, vector<16x128xf32>
    %cst_159 = arith.constant 0.507936537 : f32
    %266 = vector.broadcast %cst_159 : f32 to vector<16x128xf32>
    %267 = arith.subf %265, %266 : vector<16x128xf32>
    %268 = arith.maximumf %252, %267 : vector<16x128xf32>
    %c17_160 = arith.constant 17 : index
    %c0_161 = arith.constant 0 : index
    %269 = vector.load %arg3[%c17_160, %c0_161] : memref<80x128xf32, #tpu.memory_space<vmem>>, vector<16x128xf32>
    %cst_162 = arith.constant 0.446428567 : f32
    %270 = vector.broadcast %cst_162 : f32 to vector<16x128xf32>
    %271 = arith.subf %269, %270 : vector<16x128xf32>
    %272 = arith.maximumf %256, %271 : vector<16x128xf32>
    %c18_163 = arith.constant 18 : index
    %c0_164 = arith.constant 0 : index
    %273 = vector.load %arg3[%c18_163, %c0_164] : memref<80x128xf32, #tpu.memory_space<vmem>>, vector<16x128xf32>
    %cst_165 = arith.constant 0.388888896 : f32
    %274 = vector.broadcast %cst_165 : f32 to vector<16x128xf32>
    %275 = arith.subf %273, %274 : vector<16x128xf32>
    %276 = arith.maximumf %260, %275 : vector<16x128xf32>
    %c19_166 = arith.constant 19 : index
    %c0_167 = arith.constant 0 : index
    %277 = vector.load %arg3[%c19_166, %c0_167] : memref<80x128xf32, #tpu.memory_space<vmem>>, vector<16x128xf32>
    %cst_168 = arith.constant 0.335317463 : f32
    %278 = vector.broadcast %cst_168 : f32 to vector<16x128xf32>
    %279 = arith.subf %277, %278 : vector<16x128xf32>
    %280 = arith.maximumf %264, %279 : vector<16x128xf32>
    %c20_169 = arith.constant 20 : index
    %c0_170 = arith.constant 0 : index
    %281 = vector.load %arg3[%c20_169, %c0_170] : memref<80x128xf32, #tpu.memory_space<vmem>>, vector<16x128xf32>
    %cst_171 = arith.constant 0.285714298 : f32
    %282 = vector.broadcast %cst_171 : f32 to vector<16x128xf32>
    %283 = arith.subf %281, %282 : vector<16x128xf32>
    %284 = arith.maximumf %268, %283 : vector<16x128xf32>
    %c21_172 = arith.constant 21 : index
    %c0_173 = arith.constant 0 : index
    %285 = vector.load %arg3[%c21_172, %c0_173] : memref<80x128xf32, #tpu.memory_space<vmem>>, vector<16x128xf32>
    %cst_174 = arith.constant 0.240079358 : f32
    %286 = vector.broadcast %cst_174 : f32 to vector<16x128xf32>
    %287 = arith.subf %285, %286 : vector<16x128xf32>
    %288 = arith.maximumf %272, %287 : vector<16x128xf32>
    %c22_175 = arith.constant 22 : index
    %c0_176 = arith.constant 0 : index
    %289 = vector.load %arg3[%c22_175, %c0_176] : memref<80x128xf32, #tpu.memory_space<vmem>>, vector<16x128xf32>
    %cst_177 = arith.constant 0.198412701 : f32
    %290 = vector.broadcast %cst_177 : f32 to vector<16x128xf32>
    %291 = arith.subf %289, %290 : vector<16x128xf32>
    %292 = arith.maximumf %276, %291 : vector<16x128xf32>
    %c23_178 = arith.constant 23 : index
    %c0_179 = arith.constant 0 : index
    %293 = vector.load %arg3[%c23_178, %c0_179] : memref<80x128xf32, #tpu.memory_space<vmem>>, vector<16x128xf32>
    %cst_180 = arith.constant 0.160714284 : f32
    %294 = vector.broadcast %cst_180 : f32 to vector<16x128xf32>
    %295 = arith.subf %293, %294 : vector<16x128xf32>
    %296 = arith.maximumf %280, %295 : vector<16x128xf32>
    %c24_181 = arith.constant 24 : index
    %c0_182 = arith.constant 0 : index
    %297 = vector.load %arg3[%c24_181, %c0_182] : memref<80x128xf32, #tpu.memory_space<vmem>>, vector<16x128xf32>
    %cst_183 = arith.constant 0.126984134 : f32
    %298 = vector.broadcast %cst_183 : f32 to vector<16x128xf32>
    %299 = arith.subf %297, %298 : vector<16x128xf32>
    %300 = arith.maximumf %284, %299 : vector<16x128xf32>
    %c25_184 = arith.constant 25 : index
    %c0_185 = arith.constant 0 : index
    %301 = vector.load %arg3[%c25_184, %c0_185] : memref<80x128xf32, #tpu.memory_space<vmem>>, vector<16x128xf32>
    %cst_186 = arith.constant 0.0972222238 : f32
    %302 = vector.broadcast %cst_186 : f32 to vector<16x128xf32>
    %303 = arith.subf %301, %302 : vector<16x128xf32>
    %304 = arith.maximumf %288, %303 : vector<16x128xf32>
    %c26_187 = arith.constant 26 : index
    %c0_188 = arith.constant 0 : index
    %305 = vector.load %arg3[%c26_187, %c0_188] : memref<80x128xf32, #tpu.memory_space<vmem>>, vector<16x128xf32>
    %cst_189 = arith.constant 0.0714285746 : f32
    %306 = vector.broadcast %cst_189 : f32 to vector<16x128xf32>
    %307 = arith.subf %305, %306 : vector<16x128xf32>
    %308 = arith.maximumf %292, %307 : vector<16x128xf32>
    %c27_190 = arith.constant 27 : index
    %c0_191 = arith.constant 0 : index
    %309 = vector.load %arg3[%c27_190, %c0_191] : memref<80x128xf32, #tpu.memory_space<vmem>>, vector<16x128xf32>
    %cst_192 = arith.constant 0.0496031754 : f32
    %310 = vector.broadcast %cst_192 : f32 to vector<16x128xf32>
    %311 = arith.subf %309, %310 : vector<16x128xf32>
    %312 = arith.maximumf %296, %311 : vector<16x128xf32>
    %c28_193 = arith.constant 28 : index
    %c0_194 = arith.constant 0 : index
    %313 = vector.load %arg3[%c28_193, %c0_194] : memref<80x128xf32, #tpu.memory_space<vmem>>, vector<16x128xf32>
    %cst_195 = arith.constant 0.0317460336 : f32
    %314 = vector.broadcast %cst_195 : f32 to vector<16x128xf32>
    %315 = arith.subf %313, %314 : vector<16x128xf32>
    %316 = arith.maximumf %300, %315 : vector<16x128xf32>
    %c29_196 = arith.constant 29 : index
    %c0_197 = arith.constant 0 : index
    %317 = vector.load %arg3[%c29_196, %c0_197] : memref<80x128xf32, #tpu.memory_space<vmem>>, vector<16x128xf32>
    %cst_198 = arith.constant 0.0178571437 : f32
    %318 = vector.broadcast %cst_198 : f32 to vector<16x128xf32>
    %319 = arith.subf %317, %318 : vector<16x128xf32>
    %320 = arith.maximumf %304, %319 : vector<16x128xf32>
    %c30_199 = arith.constant 30 : index
    %c0_200 = arith.constant 0 : index
    %321 = vector.load %arg3[%c30_199, %c0_200] : memref<80x128xf32, #tpu.memory_space<vmem>>, vector<16x128xf32>
    %cst_201 = arith.constant 0.00793650839 : f32
    %322 = vector.broadcast %cst_201 : f32 to vector<16x128xf32>
    %323 = arith.subf %321, %322 : vector<16x128xf32>
    %324 = arith.maximumf %308, %323 : vector<16x128xf32>
    %c31_202 = arith.constant 31 : index
    %c0_203 = arith.constant 0 : index
    %325 = vector.load %arg3[%c31_202, %c0_203] : memref<80x128xf32, #tpu.memory_space<vmem>>, vector<16x128xf32>
    %cst_204 = arith.constant 0.0019841271 : f32
    %326 = vector.broadcast %cst_204 : f32 to vector<16x128xf32>
    %327 = arith.subf %325, %326 : vector<16x128xf32>
    %328 = arith.maximumf %312, %327 : vector<16x128xf32>
    %c32_205 = arith.constant 32 : index
    %c0_206 = arith.constant 0 : index
    %329 = vector.load %arg3[%c32_205, %c0_206] : memref<80x128xf32, #tpu.memory_space<vmem>>, vector<16x128xf32>
    %330 = arith.maximumf %316, %329 : vector<16x128xf32>
    %c33_207 = arith.constant 33 : index
    %c0_208 = arith.constant 0 : index
    %331 = vector.load %arg3[%c33_207, %c0_208] : memref<80x128xf32, #tpu.memory_space<vmem>>, vector<16x128xf32>
    %cst_209 = arith.constant 0.0019841271 : f32
    %332 = vector.broadcast %cst_209 : f32 to vector<16x128xf32>
    %333 = arith.subf %331, %332 : vector<16x128xf32>
    %334 = arith.maximumf %320, %333 : vector<16x128xf32>
    %c34_210 = arith.constant 34 : index
    %c0_211 = arith.constant 0 : index
    %335 = vector.load %arg3[%c34_210, %c0_211] : memref<80x128xf32, #tpu.memory_space<vmem>>, vector<16x128xf32>
    %cst_212 = arith.constant 0.00793650839 : f32
    %336 = vector.broadcast %cst_212 : f32 to vector<16x128xf32>
    %337 = arith.subf %335, %336 : vector<16x128xf32>
    %338 = arith.maximumf %324, %337 : vector<16x128xf32>
    %c35_213 = arith.constant 35 : index
    %c0_214 = arith.constant 0 : index
    %339 = vector.load %arg3[%c35_213, %c0_214] : memref<80x128xf32, #tpu.memory_space<vmem>>, vector<16x128xf32>
    %cst_215 = arith.constant 0.0178571437 : f32
    %340 = vector.broadcast %cst_215 : f32 to vector<16x128xf32>
    %341 = arith.subf %339, %340 : vector<16x128xf32>
    %342 = arith.maximumf %328, %341 : vector<16x128xf32>
    %c36_216 = arith.constant 36 : index
    %c0_217 = arith.constant 0 : index
    %343 = vector.load %arg3[%c36_216, %c0_217] : memref<80x128xf32, #tpu.memory_space<vmem>>, vector<16x128xf32>
    %cst_218 = arith.constant 0.0317460336 : f32
    %344 = vector.broadcast %cst_218 : f32 to vector<16x128xf32>
    %345 = arith.subf %343, %344 : vector<16x128xf32>
    %346 = arith.maximumf %330, %345 : vector<16x128xf32>
    %c37_219 = arith.constant 37 : index
    %c0_220 = arith.constant 0 : index
    %347 = vector.load %arg3[%c37_219, %c0_220] : memref<80x128xf32, #tpu.memory_space<vmem>>, vector<16x128xf32>
    %cst_221 = arith.constant 0.0496031754 : f32
    %348 = vector.broadcast %cst_221 : f32 to vector<16x128xf32>
    %349 = arith.subf %347, %348 : vector<16x128xf32>
    %350 = arith.maximumf %334, %349 : vector<16x128xf32>
    %c38_222 = arith.constant 38 : index
    %c0_223 = arith.constant 0 : index
    %351 = vector.load %arg3[%c38_222, %c0_223] : memref<80x128xf32, #tpu.memory_space<vmem>>, vector<16x128xf32>
    %cst_224 = arith.constant 0.0714285746 : f32
    %352 = vector.broadcast %cst_224 : f32 to vector<16x128xf32>
    %353 = arith.subf %351, %352 : vector<16x128xf32>
    %354 = arith.maximumf %338, %353 : vector<16x128xf32>
    %c39_225 = arith.constant 39 : index
    %c0_226 = arith.constant 0 : index
    %355 = vector.load %arg3[%c39_225, %c0_226] : memref<80x128xf32, #tpu.memory_space<vmem>>, vector<16x128xf32>
    %cst_227 = arith.constant 0.0972222238 : f32
    %356 = vector.broadcast %cst_227 : f32 to vector<16x128xf32>
    %357 = arith.subf %355, %356 : vector<16x128xf32>
    %358 = arith.maximumf %342, %357 : vector<16x128xf32>
    %c40_228 = arith.constant 40 : index
    %c0_229 = arith.constant 0 : index
    %359 = vector.load %arg3[%c40_228, %c0_229] : memref<80x128xf32, #tpu.memory_space<vmem>>, vector<16x128xf32>
    %cst_230 = arith.constant 0.126984134 : f32
    %360 = vector.broadcast %cst_230 : f32 to vector<16x128xf32>
    %361 = arith.subf %359, %360 : vector<16x128xf32>
    %362 = arith.maximumf %346, %361 : vector<16x128xf32>
    %c41_231 = arith.constant 41 : index
    %c0_232 = arith.constant 0 : index
    %363 = vector.load %arg3[%c41_231, %c0_232] : memref<80x128xf32, #tpu.memory_space<vmem>>, vector<16x128xf32>
    %cst_233 = arith.constant 0.160714284 : f32
    %364 = vector.broadcast %cst_233 : f32 to vector<16x128xf32>
    %365 = arith.subf %363, %364 : vector<16x128xf32>
    %366 = arith.maximumf %350, %365 : vector<16x128xf32>
    %c42_234 = arith.constant 42 : index
    %c0_235 = arith.constant 0 : index
    %367 = vector.load %arg3[%c42_234, %c0_235] : memref<80x128xf32, #tpu.memory_space<vmem>>, vector<16x128xf32>
    %cst_236 = arith.constant 0.198412701 : f32
    %368 = vector.broadcast %cst_236 : f32 to vector<16x128xf32>
    %369 = arith.subf %367, %368 : vector<16x128xf32>
    %370 = arith.maximumf %354, %369 : vector<16x128xf32>
    %c43_237 = arith.constant 43 : index
    %c0_238 = arith.constant 0 : index
    %371 = vector.load %arg3[%c43_237, %c0_238] : memref<80x128xf32, #tpu.memory_space<vmem>>, vector<16x128xf32>
    %cst_239 = arith.constant 0.240079358 : f32
    %372 = vector.broadcast %cst_239 : f32 to vector<16x128xf32>
    %373 = arith.subf %371, %372 : vector<16x128xf32>
    %374 = arith.maximumf %358, %373 : vector<16x128xf32>
    %c44_240 = arith.constant 44 : index
    %c0_241 = arith.constant 0 : index
    %375 = vector.load %arg3[%c44_240, %c0_241] : memref<80x128xf32, #tpu.memory_space<vmem>>, vector<16x128xf32>
    %cst_242 = arith.constant 0.285714298 : f32
    %376 = vector.broadcast %cst_242 : f32 to vector<16x128xf32>
    %377 = arith.subf %375, %376 : vector<16x128xf32>
    %378 = arith.maximumf %362, %377 : vector<16x128xf32>
    %c45_243 = arith.constant 45 : index
    %c0_244 = arith.constant 0 : index
    %379 = vector.load %arg3[%c45_243, %c0_244] : memref<80x128xf32, #tpu.memory_space<vmem>>, vector<16x128xf32>
    %cst_245 = arith.constant 0.335317463 : f32
    %380 = vector.broadcast %cst_245 : f32 to vector<16x128xf32>
    %381 = arith.subf %379, %380 : vector<16x128xf32>
    %382 = arith.maximumf %366, %381 : vector<16x128xf32>
    %c46_246 = arith.constant 46 : index
    %c0_247 = arith.constant 0 : index
    %383 = vector.load %arg3[%c46_246, %c0_247] : memref<80x128xf32, #tpu.memory_space<vmem>>, vector<16x128xf32>
    %cst_248 = arith.constant 0.388888896 : f32
    %384 = vector.broadcast %cst_248 : f32 to vector<16x128xf32>
    %385 = arith.subf %383, %384 : vector<16x128xf32>
    %386 = arith.maximumf %370, %385 : vector<16x128xf32>
    %c47_249 = arith.constant 47 : index
    %c0_250 = arith.constant 0 : index
    %387 = vector.load %arg3[%c47_249, %c0_250] : memref<80x128xf32, #tpu.memory_space<vmem>>, vector<16x128xf32>
    %cst_251 = arith.constant 0.446428567 : f32
    %388 = vector.broadcast %cst_251 : f32 to vector<16x128xf32>
    %389 = arith.subf %387, %388 : vector<16x128xf32>
    %390 = arith.maximumf %374, %389 : vector<16x128xf32>
    %c48_252 = arith.constant 48 : index
    %c0_253 = arith.constant 0 : index
    %391 = vector.load %arg3[%c48_252, %c0_253] : memref<80x128xf32, #tpu.memory_space<vmem>>, vector<16x128xf32>
    %cst_254 = arith.constant 0.507936537 : f32
    %392 = vector.broadcast %cst_254 : f32 to vector<16x128xf32>
    %393 = arith.subf %391, %392 : vector<16x128xf32>
    %394 = arith.maximumf %378, %393 : vector<16x128xf32>
    %c49 = arith.constant 49 : index
    %c0_255 = arith.constant 0 : index
    %395 = vector.load %arg3[%c49, %c0_255] : memref<80x128xf32, #tpu.memory_space<vmem>>, vector<16x128xf32>
    %cst_256 = arith.constant 0.573412716 : f32
    %396 = vector.broadcast %cst_256 : f32 to vector<16x128xf32>
    %397 = arith.subf %395, %396 : vector<16x128xf32>
    %398 = arith.maximumf %382, %397 : vector<16x128xf32>
    %c50 = arith.constant 50 : index
    %c0_257 = arith.constant 0 : index
    %399 = vector.load %arg3[%c50, %c0_257] : memref<80x128xf32, #tpu.memory_space<vmem>>, vector<16x128xf32>
    %cst_258 = arith.constant 0.642857134 : f32
    %400 = vector.broadcast %cst_258 : f32 to vector<16x128xf32>
    %401 = arith.subf %399, %400 : vector<16x128xf32>
    %402 = arith.maximumf %386, %401 : vector<16x128xf32>
    %c51 = arith.constant 51 : index
    %c0_259 = arith.constant 0 : index
    %403 = vector.load %arg3[%c51, %c0_259] : memref<80x128xf32, #tpu.memory_space<vmem>>, vector<16x128xf32>
    %cst_260 = arith.constant 0.716269851 : f32
    %404 = vector.broadcast %cst_260 : f32 to vector<16x128xf32>
    %405 = arith.subf %403, %404 : vector<16x128xf32>
    %406 = arith.maximumf %390, %405 : vector<16x128xf32>
    %c52 = arith.constant 52 : index
    %c0_261 = arith.constant 0 : index
    %407 = vector.load %arg3[%c52, %c0_261] : memref<80x128xf32, #tpu.memory_space<vmem>>, vector<16x128xf32>
    %cst_262 = arith.constant 0.793650805 : f32
    %408 = vector.broadcast %cst_262 : f32 to vector<16x128xf32>
    %409 = arith.subf %407, %408 : vector<16x128xf32>
    %410 = arith.maximumf %394, %409 : vector<16x128xf32>
    %c53 = arith.constant 53 : index
    %c0_263 = arith.constant 0 : index
    %411 = vector.load %arg3[%c53, %c0_263] : memref<80x128xf32, #tpu.memory_space<vmem>>, vector<16x128xf32>
    %cst_264 = arith.constant 8.750000e-01 : f32
    %412 = vector.broadcast %cst_264 : f32 to vector<16x128xf32>
    %413 = arith.subf %411, %412 : vector<16x128xf32>
    %414 = arith.maximumf %398, %413 : vector<16x128xf32>
    %c54 = arith.constant 54 : index
    %c0_265 = arith.constant 0 : index
    %415 = vector.load %arg3[%c54, %c0_265] : memref<80x128xf32, #tpu.memory_space<vmem>>, vector<16x128xf32>
    %cst_266 = arith.constant 0.960317432 : f32
    %416 = vector.broadcast %cst_266 : f32 to vector<16x128xf32>
    %417 = arith.subf %415, %416 : vector<16x128xf32>
    %418 = arith.maximumf %402, %417 : vector<16x128xf32>
    %c55 = arith.constant 55 : index
    %c0_267 = arith.constant 0 : index
    %419 = vector.load %arg3[%c55, %c0_267] : memref<80x128xf32, #tpu.memory_space<vmem>>, vector<16x128xf32>
    %cst_268 = arith.constant 1.04960322 : f32
    %420 = vector.broadcast %cst_268 : f32 to vector<16x128xf32>
    %421 = arith.subf %419, %420 : vector<16x128xf32>
    %422 = arith.maximumf %406, %421 : vector<16x128xf32>
    %c56 = arith.constant 56 : index
    %c0_269 = arith.constant 0 : index
    %423 = vector.load %arg3[%c56, %c0_269] : memref<80x128xf32, #tpu.memory_space<vmem>>, vector<16x128xf32>
    %cst_270 = arith.constant 1.14285719 : f32
    %424 = vector.broadcast %cst_270 : f32 to vector<16x128xf32>
    %425 = arith.subf %423, %424 : vector<16x128xf32>
    %426 = arith.maximumf %410, %425 : vector<16x128xf32>
    %c57 = arith.constant 57 : index
    %c0_271 = arith.constant 0 : index
    %427 = vector.load %arg3[%c57, %c0_271] : memref<80x128xf32, #tpu.memory_space<vmem>>, vector<16x128xf32>
    %cst_272 = arith.constant 1.2400794 : f32
    %428 = vector.broadcast %cst_272 : f32 to vector<16x128xf32>
    %429 = arith.subf %427, %428 : vector<16x128xf32>
    %430 = arith.maximumf %414, %429 : vector<16x128xf32>
    %c58 = arith.constant 58 : index
    %c0_273 = arith.constant 0 : index
    %431 = vector.load %arg3[%c58, %c0_273] : memref<80x128xf32, #tpu.memory_space<vmem>>, vector<16x128xf32>
    %cst_274 = arith.constant 1.34126985 : f32
    %432 = vector.broadcast %cst_274 : f32 to vector<16x128xf32>
    %433 = arith.subf %431, %432 : vector<16x128xf32>
    %434 = arith.maximumf %418, %433 : vector<16x128xf32>
    %c59 = arith.constant 59 : index
    %c0_275 = arith.constant 0 : index
    %435 = vector.load %arg3[%c59, %c0_275] : memref<80x128xf32, #tpu.memory_space<vmem>>, vector<16x128xf32>
    %cst_276 = arith.constant 1.44642854 : f32
    %436 = vector.broadcast %cst_276 : f32 to vector<16x128xf32>
    %437 = arith.subf %435, %436 : vector<16x128xf32>
    %438 = arith.maximumf %422, %437 : vector<16x128xf32>
    %c60 = arith.constant 60 : index
    %c0_277 = arith.constant 0 : index
    %439 = vector.load %arg3[%c60, %c0_277] : memref<80x128xf32, #tpu.memory_space<vmem>>, vector<16x128xf32>
    %cst_278 = arith.constant 1.55555558 : f32
    %440 = vector.broadcast %cst_278 : f32 to vector<16x128xf32>
    %441 = arith.subf %439, %440 : vector<16x128xf32>
    %442 = arith.maximumf %426, %441 : vector<16x128xf32>
    %c61 = arith.constant 61 : index
    %c0_279 = arith.constant 0 : index
    %443 = vector.load %arg3[%c61, %c0_279] : memref<80x128xf32, #tpu.memory_space<vmem>>, vector<16x128xf32>
    %cst_280 = arith.constant 1.66865075 : f32
    %444 = vector.broadcast %cst_280 : f32 to vector<16x128xf32>
    %445 = arith.subf %443, %444 : vector<16x128xf32>
    %446 = arith.maximumf %430, %445 : vector<16x128xf32>
    %c62 = arith.constant 62 : index
    %c0_281 = arith.constant 0 : index
    %447 = vector.load %arg3[%c62, %c0_281] : memref<80x128xf32, #tpu.memory_space<vmem>>, vector<16x128xf32>
    %cst_282 = arith.constant 1.78571427 : f32
    %448 = vector.broadcast %cst_282 : f32 to vector<16x128xf32>
    %449 = arith.subf %447, %448 : vector<16x128xf32>
    %450 = arith.maximumf %434, %449 : vector<16x128xf32>
    %c63 = arith.constant 63 : index
    %c0_283 = arith.constant 0 : index
    %451 = vector.load %arg3[%c63, %c0_283] : memref<80x128xf32, #tpu.memory_space<vmem>>, vector<16x128xf32>
    %cst_284 = arith.constant 1.90674603 : f32
    %452 = vector.broadcast %cst_284 : f32 to vector<16x128xf32>
    %453 = arith.subf %451, %452 : vector<16x128xf32>
    %454 = arith.maximumf %438, %453 : vector<16x128xf32>
    %c64 = arith.constant 64 : index
    %c0_285 = arith.constant 0 : index
    %455 = vector.load %arg3[%c64, %c0_285] : memref<80x128xf32, #tpu.memory_space<vmem>>, vector<16x128xf32>
    %cst_286 = arith.constant 2.03174615 : f32
    %456 = vector.broadcast %cst_286 : f32 to vector<16x128xf32>
    %457 = arith.subf %455, %456 : vector<16x128xf32>
    %458 = arith.maximumf %442, %457 : vector<16x128xf32>
    %459 = arith.maximumf %458, %446 : vector<16x128xf32>
    %460 = arith.maximumf %459, %450 : vector<16x128xf32>
    %461 = arith.maximumf %460, %454 : vector<16x128xf32>
    %c2_287 = arith.constant 2 : index
    %c0_288 = arith.constant 0 : index
    %c0_289 = arith.constant 0 : index
    %462 = vector.load %arg2[%c2_287, %c0_288, %c0_289] : memref<3x16x128xf32, #tpu.memory_space<vmem>>, vector<1x16x128xf32>
    %463 = vector.shape_cast %462 : vector<1x16x128xf32> to vector<16x128xf32>
    %464 = vector.shape_cast %461 : vector<16x128xf32> to vector<1x16x128xf32>
    tpu.vector_store %arg2[%c2_287, %c0_288, %c0_289], %464 {strides = array<i32>} : memref<3x16x128xf32, #tpu.memory_space<vmem>>, vector<1x16x128xf32>,
    return
  }
  func.func @transform_0(%arg0: i32) -> (i32, i32) {
    %c0_i32 = arith.constant 0 : i32
    %c0_i32_0 = arith.constant 0 : i32
    return %c0_i32, %arg0 : i32, i32
  }
  func.func @transform_1(%arg0: i32) -> (i32, i32, i32) {
    %c0_i32 = arith.constant 0 : i32
    %c0_i32_0 = arith.constant 0 : i32
    %c0_i32_1 = arith.constant 0 : i32
    return %c0_i32, %c0_i32_0, %arg0 : i32, i32, i32
  }
}

module attributes {stable_mosaic.version = 11 : i64} {
  func.func @kernel(%arg0: i32, %arg1: memref<3x16x128xf32, #tpu.memory_space<vmem>>, %arg2: memref<3x16x128xf32, #tpu.memory_space<vmem>>, %arg3: memref<3x80x128xf32, #tpu.memory_space<vmem>>) attributes {dimension_semantics = [#tpu.dimension_semantics<arbitrary>], iteration_bounds = array<i64: 1>, scalar_prefetch = 0 : i64, scratch_operands = 1 : i64, tpu.core_type = #tpu.core_type<tc>, window_params = [{transform_indices = @transform_0, window_bounds = array<i64: 3, 16, 128>}, {transform_indices = @transform_1, window_bounds = array<i64: 3, 16, 128>}]} {
    %c0_i32 = arith.constant 0 : i32
    %0 = arith.cmpi eq, %arg0, %c0_i32 : i32
    %1 = arith.extui %0 : i1 to i32
    %c0_i32_0 = arith.constant 0 : i32
    %2 = arith.cmpi ne, %1, %c0_i32_0 : i32
    scf.if %2 {
      %cst_419 = arith.constant -1.000000e+04 : f32
      %593 = vector.broadcast %cst_419 : f32 to vector<8x128xf32>
      %c0_420 = arith.constant 0 : index
      %c0_421 = arith.constant 0 : index
      %c0_422 = arith.constant 0 : index
      %594 = vector.load %arg3[%c0_420, %c0_421, %c0_422] : memref<3x80x128xf32, #tpu.memory_space<vmem>>, vector<1x8x128xf32>
      %595 = vector.shape_cast %594 : vector<1x8x128xf32> to vector<8x128xf32>
      %596 = vector.shape_cast %593 : vector<8x128xf32> to vector<1x8x128xf32>
      tpu.vector_store %arg3[%c0_420, %c0_421, %c0_422], %596 {strides = array<i32>} : memref<3x80x128xf32, #tpu.memory_space<vmem>>, vector<1x8x128xf32>,
      %c0_423 = arith.constant 0 : index
      %c24_424 = arith.constant 24 : index
      %c0_425 = arith.constant 0 : index
      %597 = vector.load %arg3[%c0_423, %c24_424, %c0_425] : memref<3x80x128xf32, #tpu.memory_space<vmem>>, vector<1x8x128xf32>
      %598 = vector.shape_cast %597 : vector<1x8x128xf32> to vector<8x128xf32>
      %599 = vector.shape_cast %593 : vector<8x128xf32> to vector<1x8x128xf32>
      tpu.vector_store %arg3[%c0_423, %c24_424, %c0_425], %599 {strides = array<i32>} : memref<3x80x128xf32, #tpu.memory_space<vmem>>, vector<1x8x128xf32>,
      %cst_426 = arith.constant -1.000000e+04 : f32
      %600 = vector.broadcast %cst_426 : f32 to vector<16x128xf32>
      %c1_427 = arith.constant 1 : index
      %c0_428 = arith.constant 0 : index
      %c0_429 = arith.constant 0 : index
      %601 = vector.load %arg3[%c1_427, %c0_428, %c0_429] : memref<3x80x128xf32, #tpu.memory_space<vmem>>, vector<1x16x128xf32>
      %602 = vector.shape_cast %601 : vector<1x16x128xf32> to vector<16x128xf32>
      %603 = vector.shape_cast %600 : vector<16x128xf32> to vector<1x16x128xf32>
      tpu.vector_store %arg3[%c1_427, %c0_428, %c0_429], %603 {strides = array<i32>} : memref<3x80x128xf32, #tpu.memory_space<vmem>>, vector<1x16x128xf32>,
      %c1_430 = arith.constant 1 : index
      %c32_431 = arith.constant 32 : index
      %c0_432 = arith.constant 0 : index
      %604 = vector.load %arg3[%c1_430, %c32_431, %c0_432] : memref<3x80x128xf32, #tpu.memory_space<vmem>>, vector<1x16x128xf32>
      %605 = vector.shape_cast %604 : vector<1x16x128xf32> to vector<16x128xf32>
      %606 = vector.shape_cast %600 : vector<16x128xf32> to vector<1x16x128xf32>
      tpu.vector_store %arg3[%c1_430, %c32_431, %c0_432], %606 {strides = array<i32>} : memref<3x80x128xf32, #tpu.memory_space<vmem>>, vector<1x16x128xf32>,
      %cst_433 = arith.constant -1.000000e+04 : f32
      %607 = vector.broadcast %cst_433 : f32 to vector<32x128xf32>
      %c2_434 = arith.constant 2 : index
      %c0_435 = arith.constant 0 : index
      %c0_436 = arith.constant 0 : index
      %608 = vector.load %arg3[%c2_434, %c0_435, %c0_436] : memref<3x80x128xf32, #tpu.memory_space<vmem>>, vector<1x32x128xf32>
      %609 = vector.shape_cast %608 : vector<1x32x128xf32> to vector<32x128xf32>
      %610 = vector.shape_cast %607 : vector<32x128xf32> to vector<1x32x128xf32>
      tpu.vector_store %arg3[%c2_434, %c0_435, %c0_436], %610 {strides = array<i32>} : memref<3x80x128xf32, #tpu.memory_space<vmem>>, vector<1x32x128xf32>,
      %c2_437 = arith.constant 2 : index
      %c48_438 = arith.constant 48 : index
      %c0_439 = arith.constant 0 : index
      %611 = vector.load %arg3[%c2_437, %c48_438, %c0_439] : memref<3x80x128xf32, #tpu.memory_space<vmem>>, vector<1x32x128xf32>
      %612 = vector.shape_cast %611 : vector<1x32x128xf32> to vector<32x128xf32>
      %613 = vector.shape_cast %607 : vector<32x128xf32> to vector<1x32x128xf32>
      tpu.vector_store %arg3[%c2_437, %c48_438, %c0_439], %613 {strides = array<i32>} : memref<3x80x128xf32, #tpu.memory_space<vmem>>, vector<1x32x128xf32>,
    } else {
    }
    %c0 = arith.constant 0 : index
    %c0_1 = arith.constant 0 : index
    %c0_2 = arith.constant 0 : index
    %3 = vector.load %arg1[%c0, %c0_1, %c0_2] : memref<3x16x128xf32, #tpu.memory_space<vmem>>, vector<1x16x128xf32>
    %4 = vector.shape_cast %3 : vector<1x16x128xf32> to vector<16x128xf32>
    %c0_3 = arith.constant 0 : index
    %c8 = arith.constant 8 : index
    %c0_4 = arith.constant 0 : index
    %5 = vector.load %arg3[%c0_3, %c8, %c0_4] : memref<3x80x128xf32, #tpu.memory_space<vmem>>, vector<1x16x128xf32>
    %6 = vector.shape_cast %5 : vector<1x16x128xf32> to vector<16x128xf32>
    %7 = vector.shape_cast %4 : vector<16x128xf32> to vector<1x16x128xf32>
    tpu.vector_store %arg3[%c0_3, %c8, %c0_4], %7 {strides = array<i32>} : memref<3x80x128xf32, #tpu.memory_space<vmem>>, vector<1x16x128xf32>,
    %c1 = arith.constant 1 : index
    %c0_5 = arith.constant 0 : index
    %c0_6 = arith.constant 0 : index
    %8 = vector.load %arg1[%c1, %c0_5, %c0_6] : memref<3x16x128xf32, #tpu.memory_space<vmem>>, vector<1x16x128xf32>
    %9 = vector.shape_cast %8 : vector<1x16x128xf32> to vector<16x128xf32>
    %c1_7 = arith.constant 1 : index
    %c16 = arith.constant 16 : index
    %c0_8 = arith.constant 0 : index
    %10 = vector.load %arg3[%c1_7, %c16, %c0_8] : memref<3x80x128xf32, #tpu.memory_space<vmem>>, vector<1x16x128xf32>
    %11 = vector.shape_cast %10 : vector<1x16x128xf32> to vector<16x128xf32>
    %12 = vector.shape_cast %9 : vector<16x128xf32> to vector<1x16x128xf32>
    tpu.vector_store %arg3[%c1_7, %c16, %c0_8], %12 {strides = array<i32>} : memref<3x80x128xf32, #tpu.memory_space<vmem>>, vector<1x16x128xf32>,
    %c2 = arith.constant 2 : index
    %c0_9 = arith.constant 0 : index
    %c0_10 = arith.constant 0 : index
    %13 = vector.load %arg1[%c2, %c0_9, %c0_10] : memref<3x16x128xf32, #tpu.memory_space<vmem>>, vector<1x16x128xf32>
    %14 = vector.shape_cast %13 : vector<1x16x128xf32> to vector<16x128xf32>
    %c2_11 = arith.constant 2 : index
    %c32 = arith.constant 32 : index
    %c0_12 = arith.constant 0 : index
    %15 = vector.load %arg3[%c2_11, %c32, %c0_12] : memref<3x80x128xf32, #tpu.memory_space<vmem>>, vector<1x16x128xf32>
    %16 = vector.shape_cast %15 : vector<1x16x128xf32> to vector<16x128xf32>
    %17 = vector.shape_cast %14 : vector<16x128xf32> to vector<1x16x128xf32>
    tpu.vector_store %arg3[%c2_11, %c32, %c0_12], %17 {strides = array<i32>} : memref<3x80x128xf32, #tpu.memory_space<vmem>>, vector<1x16x128xf32>,
    %c0_13 = arith.constant 0 : index
    %c0_14 = arith.constant 0 : index
    %c0_15 = arith.constant 0 : index
    %18 = vector.load %arg3[%c0_13, %c0_14, %c0_15] : memref<3x80x128xf32, #tpu.memory_space<vmem>>, vector<1x16x128xf32>
    %19 = vector.shape_cast %18 : vector<1x16x128xf32> to vector<16x128xf32>
    %cst = arith.constant 2.66666675 : f32
    %20 = vector.broadcast %cst : f32 to vector<16x128xf32>
    %21 = arith.subf %19, %20 : vector<16x128xf32>
    %c0_16 = arith.constant 0 : index
    %c1_17 = arith.constant 1 : index
    %c0_18 = arith.constant 0 : index
    %22 = vector.load %arg3[%c0_16, %c1_17, %c0_18] : memref<3x80x128xf32, #tpu.memory_space<vmem>>, vector<1x16x128xf32>
    %23 = vector.shape_cast %22 : vector<1x16x128xf32> to vector<16x128xf32>
    %cst_19 = arith.constant 2.04166675 : f32
    %24 = vector.broadcast %cst_19 : f32 to vector<16x128xf32>
    %25 = arith.subf %23, %24 : vector<16x128xf32>
    %c0_20 = arith.constant 0 : index
    %c2_21 = arith.constant 2 : index
    %c0_22 = arith.constant 0 : index
    %26 = vector.load %arg3[%c0_20, %c2_21, %c0_22] : memref<3x80x128xf32, #tpu.memory_space<vmem>>, vector<1x16x128xf32>
    %27 = vector.shape_cast %26 : vector<1x16x128xf32> to vector<16x128xf32>
    %cst_23 = arith.constant 1.500000e+00 : f32
    %28 = vector.broadcast %cst_23 : f32 to vector<16x128xf32>
    %29 = arith.subf %27, %28 : vector<16x128xf32>
    %c0_24 = arith.constant 0 : index
    %c3 = arith.constant 3 : index
    %c0_25 = arith.constant 0 : index
    %30 = vector.load %arg3[%c0_24, %c3, %c0_25] : memref<3x80x128xf32, #tpu.memory_space<vmem>>, vector<1x16x128xf32>
    %31 = vector.shape_cast %30 : vector<1x16x128xf32> to vector<16x128xf32>
    %cst_26 = arith.constant 1.04166663 : f32
    %32 = vector.broadcast %cst_26 : f32 to vector<16x128xf32>
    %33 = arith.subf %31, %32 : vector<16x128xf32>
    %c0_27 = arith.constant 0 : index
    %c4 = arith.constant 4 : index
    %c0_28 = arith.constant 0 : index
    %34 = vector.load %arg3[%c0_27, %c4, %c0_28] : memref<3x80x128xf32, #tpu.memory_space<vmem>>, vector<1x16x128xf32>
    %35 = vector.shape_cast %34 : vector<1x16x128xf32> to vector<16x128xf32>
    %cst_29 = arith.constant 0.666666686 : f32
    %36 = vector.broadcast %cst_29 : f32 to vector<16x128xf32>
    %37 = arith.subf %35, %36 : vector<16x128xf32>
    %38 = arith.maximumf %21, %37 : vector<16x128xf32>
    %c0_30 = arith.constant 0 : index
    %c5 = arith.constant 5 : index
    %c0_31 = arith.constant 0 : index
    %39 = vector.load %arg3[%c0_30, %c5, %c0_31] : memref<3x80x128xf32, #tpu.memory_space<vmem>>, vector<1x16x128xf32>
    %40 = vector.shape_cast %39 : vector<1x16x128xf32> to vector<16x128xf32>
    %cst_32 = arith.constant 3.750000e-01 : f32
    %41 = vector.broadcast %cst_32 : f32 to vector<16x128xf32>
    %42 = arith.subf %40, %41 : vector<16x128xf32>
    %43 = arith.maximumf %25, %42 : vector<16x128xf32>
    %c0_33 = arith.constant 0 : index
    %c6 = arith.constant 6 : index
    %c0_34 = arith.constant 0 : index
    %44 = vector.load %arg3[%c0_33, %c6, %c0_34] : memref<3x80x128xf32, #tpu.memory_space<vmem>>, vector<1x16x128xf32>
    %45 = vector.shape_cast %44 : vector<1x16x128xf32> to vector<16x128xf32>
    %cst_35 = arith.constant 0.166666672 : f32
    %46 = vector.broadcast %cst_35 : f32 to vector<16x128xf32>
    %47 = arith.subf %45, %46 : vector<16x128xf32>
    %48 = arith.maximumf %29, %47 : vector<16x128xf32>
    %c0_36 = arith.constant 0 : index
    %c7 = arith.constant 7 : index
    %c0_37 = arith.constant 0 : index
    %49 = vector.load %arg3[%c0_36, %c7, %c0_37] : memref<3x80x128xf32, #tpu.memory_space<vmem>>, vector<1x16x128xf32>
    %50 = vector.shape_cast %49 : vector<1x16x128xf32> to vector<16x128xf32>
    %cst_38 = arith.constant 0.0416666679 : f32
    %51 = vector.broadcast %cst_38 : f32 to vector<16x128xf32>
    %52 = arith.subf %50, %51 : vector<16x128xf32>
    %53 = arith.maximumf %33, %52 : vector<16x128xf32>
    %c0_39 = arith.constant 0 : index
    %c8_40 = arith.constant 8 : index
    %c0_41 = arith.constant 0 : index
    %54 = vector.load %arg3[%c0_39, %c8_40, %c0_41] : memref<3x80x128xf32, #tpu.memory_space<vmem>>, vector<1x16x128xf32>
    %55 = vector.shape_cast %54 : vector<1x16x128xf32> to vector<16x128xf32>
    %56 = arith.maximumf %38, %55 : vector<16x128xf32>
    %c0_42 = arith.constant 0 : index
    %c9 = arith.constant 9 : index
    %c0_43 = arith.constant 0 : index
    %57 = vector.load %arg3[%c0_42, %c9, %c0_43] : memref<3x80x128xf32, #tpu.memory_space<vmem>>, vector<1x16x128xf32>
    %58 = vector.shape_cast %57 : vector<1x16x128xf32> to vector<16x128xf32>
    %cst_44 = arith.constant 0.0416666679 : f32
    %59 = vector.broadcast %cst_44 : f32 to vector<16x128xf32>
    %60 = arith.subf %58, %59 : vector<16x128xf32>
    %61 = arith.maximumf %43, %60 : vector<16x128xf32>
    %c0_45 = arith.constant 0 : index
    %c10 = arith.constant 10 : index
    %c0_46 = arith.constant 0 : index
    %62 = vector.load %arg3[%c0_45, %c10, %c0_46] : memref<3x80x128xf32, #tpu.memory_space<vmem>>, vector<1x16x128xf32>
    %63 = vector.shape_cast %62 : vector<1x16x128xf32> to vector<16x128xf32>
    %cst_47 = arith.constant 0.166666672 : f32
    %64 = vector.broadcast %cst_47 : f32 to vector<16x128xf32>
    %65 = arith.subf %63, %64 : vector<16x128xf32>
    %66 = arith.maximumf %48, %65 : vector<16x128xf32>
    %c0_48 = arith.constant 0 : index
    %c11 = arith.constant 11 : index
    %c0_49 = arith.constant 0 : index
    %67 = vector.load %arg3[%c0_48, %c11, %c0_49] : memref<3x80x128xf32, #tpu.memory_space<vmem>>, vector<1x16x128xf32>
    %68 = vector.shape_cast %67 : vector<1x16x128xf32> to vector<16x128xf32>
    %cst_50 = arith.constant 3.750000e-01 : f32
    %69 = vector.broadcast %cst_50 : f32 to vector<16x128xf32>
    %70 = arith.subf %68, %69 : vector<16x128xf32>
    %71 = arith.maximumf %53, %70 : vector<16x128xf32>
    %c0_51 = arith.constant 0 : index
    %c12 = arith.constant 12 : index
    %c0_52 = arith.constant 0 : index
    %72 = vector.load %arg3[%c0_51, %c12, %c0_52] : memref<3x80x128xf32, #tpu.memory_space<vmem>>, vector<1x16x128xf32>
    %73 = vector.shape_cast %72 : vector<1x16x128xf32> to vector<16x128xf32>
    %cst_53 = arith.constant 0.666666686 : f32
    %74 = vector.broadcast %cst_53 : f32 to vector<16x128xf32>
    %75 = arith.subf %73, %74 : vector<16x128xf32>
    %76 = arith.maximumf %56, %75 : vector<16x128xf32>
    %c0_54 = arith.constant 0 : index
    %c13 = arith.constant 13 : index
    %c0_55 = arith.constant 0 : index
    %77 = vector.load %arg3[%c0_54, %c13, %c0_55] : memref<3x80x128xf32, #tpu.memory_space<vmem>>, vector<1x16x128xf32>
    %78 = vector.shape_cast %77 : vector<1x16x128xf32> to vector<16x128xf32>
    %cst_56 = arith.constant 1.04166663 : f32
    %79 = vector.broadcast %cst_56 : f32 to vector<16x128xf32>
    %80 = arith.subf %78, %79 : vector<16x128xf32>
    %81 = arith.maximumf %61, %80 : vector<16x128xf32>
    %c0_57 = arith.constant 0 : index
    %c14 = arith.constant 14 : index
    %c0_58 = arith.constant 0 : index
    %82 = vector.load %arg3[%c0_57, %c14, %c0_58] : memref<3x80x128xf32, #tpu.memory_space<vmem>>, vector<1x16x128xf32>
    %83 = vector.shape_cast %82 : vector<1x16x128xf32> to vector<16x128xf32>
    %cst_59 = arith.constant 1.500000e+00 : f32
    %84 = vector.broadcast %cst_59 : f32 to vector<16x128xf32>
    %85 = arith.subf %83, %84 : vector<16x128xf32>
    %86 = arith.maximumf %66, %85 : vector<16x128xf32>
    %c0_60 = arith.constant 0 : index
    %c15 = arith.constant 15 : index
    %c0_61 = arith.constant 0 : index
    %87 = vector.load %arg3[%c0_60, %c15, %c0_61] : memref<3x80x128xf32, #tpu.memory_space<vmem>>, vector<1x16x128xf32>
    %88 = vector.shape_cast %87 : vector<1x16x128xf32> to vector<16x128xf32>
    %cst_62 = arith.constant 2.04166675 : f32
    %89 = vector.broadcast %cst_62 : f32 to vector<16x128xf32>
    %90 = arith.subf %88, %89 : vector<16x128xf32>
    %91 = arith.maximumf %71, %90 : vector<16x128xf32>
    %c0_63 = arith.constant 0 : index
    %c16_64 = arith.constant 16 : index
    %c0_65 = arith.constant 0 : index
    %92 = vector.load %arg3[%c0_63, %c16_64, %c0_65] : memref<3x80x128xf32, #tpu.memory_space<vmem>>, vector<1x16x128xf32>
    %93 = vector.shape_cast %92 : vector<1x16x128xf32> to vector<16x128xf32>
    %cst_66 = arith.constant 2.66666675 : f32
    %94 = vector.broadcast %cst_66 : f32 to vector<16x128xf32>
    %95 = arith.subf %93, %94 : vector<16x128xf32>
    %96 = arith.maximumf %76, %95 : vector<16x128xf32>
    %97 = arith.maximumf %96, %81 : vector<16x128xf32>
    %98 = arith.maximumf %97, %86 : vector<16x128xf32>
    %99 = arith.maximumf %98, %91 : vector<16x128xf32>
    %c0_67 = arith.constant 0 : index
    %c0_68 = arith.constant 0 : index
    %c0_69 = arith.constant 0 : index
    %100 = vector.load %arg2[%c0_67, %c0_68, %c0_69] : memref<3x16x128xf32, #tpu.memory_space<vmem>>, vector<1x16x128xf32>
    %101 = vector.shape_cast %100 : vector<1x16x128xf32> to vector<16x128xf32>
    %102 = vector.shape_cast %99 : vector<16x128xf32> to vector<1x16x128xf32>
    tpu.vector_store %arg2[%c0_67, %c0_68, %c0_69], %102 {strides = array<i32>} : memref<3x16x128xf32, #tpu.memory_space<vmem>>, vector<1x16x128xf32>,
    %c1_70 = arith.constant 1 : index
    %c0_71 = arith.constant 0 : index
    %c0_72 = arith.constant 0 : index
    %103 = vector.load %arg3[%c1_70, %c0_71, %c0_72] : memref<3x80x128xf32, #tpu.memory_space<vmem>>, vector<1x16x128xf32>
    %104 = vector.shape_cast %103 : vector<1x16x128xf32> to vector<16x128xf32>
    %cst_73 = arith.constant 2.13333344 : f32
    %105 = vector.broadcast %cst_73 : f32 to vector<16x128xf32>
    %106 = arith.subf %104, %105 : vector<16x128xf32>
    %c1_74 = arith.constant 1 : index
    %c1_75 = arith.constant 1 : index
    %c0_76 = arith.constant 0 : index
    %107 = vector.load %arg3[%c1_74, %c1_75, %c0_76] : memref<3x80x128xf32, #tpu.memory_space<vmem>>, vector<1x16x128xf32>
    %108 = vector.shape_cast %107 : vector<1x16x128xf32> to vector<16x128xf32>
    %cst_77 = arith.constant 1.875000e+00 : f32
    %109 = vector.broadcast %cst_77 : f32 to vector<16x128xf32>
    %110 = arith.subf %108, %109 : vector<16x128xf32>
    %c1_78 = arith.constant 1 : index
    %c2_79 = arith.constant 2 : index
    %c0_80 = arith.constant 0 : index
    %111 = vector.load %arg3[%c1_78, %c2_79, %c0_80] : memref<3x80x128xf32, #tpu.memory_space<vmem>>, vector<1x16x128xf32>
    %112 = vector.shape_cast %111 : vector<1x16x128xf32> to vector<16x128xf32>
    %cst_81 = arith.constant 1.63333333 : f32
    %113 = vector.broadcast %cst_81 : f32 to vector<16x128xf32>
    %114 = arith.subf %112, %113 : vector<16x128xf32>
    %c1_82 = arith.constant 1 : index
    %c3_83 = arith.constant 3 : index
    %c0_84 = arith.constant 0 : index
    %115 = vector.load %arg3[%c1_82, %c3_83, %c0_84] : memref<3x80x128xf32, #tpu.memory_space<vmem>>, vector<1x16x128xf32>
    %116 = vector.shape_cast %115 : vector<1x16x128xf32> to vector<16x128xf32>
    %cst_85 = arith.constant 1.4083333 : f32
    %117 = vector.broadcast %cst_85 : f32 to vector<16x128xf32>
    %118 = arith.subf %116, %117 : vector<16x128xf32>
    %c1_86 = arith.constant 1 : index
    %c4_87 = arith.constant 4 : index
    %c0_88 = arith.constant 0 : index
    %119 = vector.load %arg3[%c1_86, %c4_87, %c0_88] : memref<3x80x128xf32, #tpu.memory_space<vmem>>, vector<1x16x128xf32>
    %120 = vector.shape_cast %119 : vector<1x16x128xf32> to vector<16x128xf32>
    %cst_89 = arith.constant 1.200000e+00 : f32
    %121 = vector.broadcast %cst_89 : f32 to vector<16x128xf32>
    %122 = arith.subf %120, %121 : vector<16x128xf32>
    %123 = arith.maximumf %106, %122 : vector<16x128xf32>
    %c1_90 = arith.constant 1 : index
    %c5_91 = arith.constant 5 : index
    %c0_92 = arith.constant 0 : index
    %124 = vector.load %arg3[%c1_90, %c5_91, %c0_92] : memref<3x80x128xf32, #tpu.memory_space<vmem>>, vector<1x16x128xf32>
    %125 = vector.shape_cast %124 : vector<1x16x128xf32> to vector<16x128xf32>
    %cst_93 = arith.constant 1.00833333 : f32
    %126 = vector.broadcast %cst_93 : f32 to vector<16x128xf32>
    %127 = arith.subf %125, %126 : vector<16x128xf32>
    %128 = arith.maximumf %110, %127 : vector<16x128xf32>
    %c1_94 = arith.constant 1 : index
    %c6_95 = arith.constant 6 : index
    %c0_96 = arith.constant 0 : index
    %129 = vector.load %arg3[%c1_94, %c6_95, %c0_96] : memref<3x80x128xf32, #tpu.memory_space<vmem>>, vector<1x16x128xf32>
    %130 = vector.shape_cast %129 : vector<1x16x128xf32> to vector<16x128xf32>
    %cst_97 = arith.constant 0.833333313 : f32
    %131 = vector.broadcast %cst_97 : f32 to vector<16x128xf32>
    %132 = arith.subf %130, %131 : vector<16x128xf32>
    %133 = arith.maximumf %114, %132 : vector<16x128xf32>
    %c1_98 = arith.constant 1 : index
    %c7_99 = arith.constant 7 : index
    %c0_100 = arith.constant 0 : index
    %134 = vector.load %arg3[%c1_98, %c7_99, %c0_100] : memref<3x80x128xf32, #tpu.memory_space<vmem>>, vector<1x16x128xf32>
    %135 = vector.shape_cast %134 : vector<1x16x128xf32> to vector<16x128xf32>
    %cst_101 = arith.constant 6.750000e-01 : f32
    %136 = vector.broadcast %cst_101 : f32 to vector<16x128xf32>
    %137 = arith.subf %135, %136 : vector<16x128xf32>
    %138 = arith.maximumf %118, %137 : vector<16x128xf32>
    %c1_102 = arith.constant 1 : index
    %c8_103 = arith.constant 8 : index
    %c0_104 = arith.constant 0 : index
    %139 = vector.load %arg3[%c1_102, %c8_103, %c0_104] : memref<3x80x128xf32, #tpu.memory_space<vmem>>, vector<1x16x128xf32>
    %140 = vector.shape_cast %139 : vector<1x16x128xf32> to vector<16x128xf32>
    %cst_105 = arith.constant 0.533333361 : f32
    %141 = vector.broadcast %cst_105 : f32 to vector<16x128xf32>
    %142 = arith.subf %140, %141 : vector<16x128xf32>
    %143 = arith.maximumf %123, %142 : vector<16x128xf32>
    %c1_106 = arith.constant 1 : index
    %c9_107 = arith.constant 9 : index
    %c0_108 = arith.constant 0 : index
    %144 = vector.load %arg3[%c1_106, %c9_107, %c0_108] : memref<3x80x128xf32, #tpu.memory_space<vmem>>, vector<1x16x128xf32>
    %145 = vector.shape_cast %144 : vector<1x16x128xf32> to vector<16x128xf32>
    %cst_109 = arith.constant 0.408333331 : f32
    %146 = vector.broadcast %cst_109 : f32 to vector<16x128xf32>
    %147 = arith.subf %145, %146 : vector<16x128xf32>
    %148 = arith.maximumf %128, %147 : vector<16x128xf32>
    %c1_110 = arith.constant 1 : index
    %c10_111 = arith.constant 10 : index
    %c0_112 = arith.constant 0 : index
    %149 = vector.load %arg3[%c1_110, %c10_111, %c0_112] : memref<3x80x128xf32, #tpu.memory_space<vmem>>, vector<1x16x128xf32>
    %150 = vector.shape_cast %149 : vector<1x16x128xf32> to vector<16x128xf32>
    %cst_113 = arith.constant 3.000000e-01 : f32
    %151 = vector.broadcast %cst_113 : f32 to vector<16x128xf32>
    %152 = arith.subf %150, %151 : vector<16x128xf32>
    %153 = arith.maximumf %133, %152 : vector<16x128xf32>
    %c1_114 = arith.constant 1 : index
    %c11_115 = arith.constant 11 : index
    %c0_116 = arith.constant 0 : index
    %154 = vector.load %arg3[%c1_114, %c11_115, %c0_116] : memref<3x80x128xf32, #tpu.memory_space<vmem>>, vector<1x16x128xf32>
    %155 = vector.shape_cast %154 : vector<1x16x128xf32> to vector<16x128xf32>
    %cst_117 = arith.constant 0.208333328 : f32
    %156 = vector.broadcast %cst_117 : f32 to vector<16x128xf32>
    %157 = arith.subf %155, %156 : vector<16x128xf32>
    %158 = arith.maximumf %138, %157 : vector<16x128xf32>
    %c1_118 = arith.constant 1 : index
    %c12_119 = arith.constant 12 : index
    %c0_120 = arith.constant 0 : index
    %159 = vector.load %arg3[%c1_118, %c12_119, %c0_120] : memref<3x80x128xf32, #tpu.memory_space<vmem>>, vector<1x16x128xf32>
    %160 = vector.shape_cast %159 : vector<1x16x128xf32> to vector<16x128xf32>
    %cst_121 = arith.constant 0.13333334 : f32
    %161 = vector.broadcast %cst_121 : f32 to vector<16x128xf32>
    %162 = arith.subf %160, %161 : vector<16x128xf32>
    %163 = arith.maximumf %143, %162 : vector<16x128xf32>
    %c1_122 = arith.constant 1 : index
    %c13_123 = arith.constant 13 : index
    %c0_124 = arith.constant 0 : index
    %164 = vector.load %arg3[%c1_122, %c13_123, %c0_124] : memref<3x80x128xf32, #tpu.memory_space<vmem>>, vector<1x16x128xf32>
    %165 = vector.shape_cast %164 : vector<1x16x128xf32> to vector<16x128xf32>
    %cst_125 = arith.constant 7.500000e-02 : f32
    %166 = vector.broadcast %cst_125 : f32 to vector<16x128xf32>
    %167 = arith.subf %165, %166 : vector<16x128xf32>
    %168 = arith.maximumf %148, %167 : vector<16x128xf32>
    %c1_126 = arith.constant 1 : index
    %c14_127 = arith.constant 14 : index
    %c0_128 = arith.constant 0 : index
    %169 = vector.load %arg3[%c1_126, %c14_127, %c0_128] : memref<3x80x128xf32, #tpu.memory_space<vmem>>, vector<1x16x128xf32>
    %170 = vector.shape_cast %169 : vector<1x16x128xf32> to vector<16x128xf32>
    %cst_129 = arith.constant 0.0333333351 : f32
    %171 = vector.broadcast %cst_129 : f32 to vector<16x128xf32>
    %172 = arith.subf %170, %171 : vector<16x128xf32>
    %173 = arith.maximumf %153, %172 : vector<16x128xf32>
    %c1_130 = arith.constant 1 : index
    %c15_131 = arith.constant 15 : index
    %c0_132 = arith.constant 0 : index
    %174 = vector.load %arg3[%c1_130, %c15_131, %c0_132] : memref<3x80x128xf32, #tpu.memory_space<vmem>>, vector<1x16x128xf32>
    %175 = vector.shape_cast %174 : vector<1x16x128xf32> to vector<16x128xf32>
    %cst_133 = arith.constant 0.00833333377 : f32
    %176 = vector.broadcast %cst_133 : f32 to vector<16x128xf32>
    %177 = arith.subf %175, %176 : vector<16x128xf32>
    %178 = arith.maximumf %158, %177 : vector<16x128xf32>
    %c1_134 = arith.constant 1 : index
    %c16_135 = arith.constant 16 : index
    %c0_136 = arith.constant 0 : index
    %179 = vector.load %arg3[%c1_134, %c16_135, %c0_136] : memref<3x80x128xf32, #tpu.memory_space<vmem>>, vector<1x16x128xf32>
    %180 = vector.shape_cast %179 : vector<1x16x128xf32> to vector<16x128xf32>
    %181 = arith.maximumf %163, %180 : vector<16x128xf32>
    %c1_137 = arith.constant 1 : index
    %c17 = arith.constant 17 : index
    %c0_138 = arith.constant 0 : index
    %182 = vector.load %arg3[%c1_137, %c17, %c0_138] : memref<3x80x128xf32, #tpu.memory_space<vmem>>, vector<1x16x128xf32>
    %183 = vector.shape_cast %182 : vector<1x16x128xf32> to vector<16x128xf32>
    %cst_139 = arith.constant 0.00833333377 : f32
    %184 = vector.broadcast %cst_139 : f32 to vector<16x128xf32>
    %185 = arith.subf %183, %184 : vector<16x128xf32>
    %186 = arith.maximumf %168, %185 : vector<16x128xf32>
    %c1_140 = arith.constant 1 : index
    %c18 = arith.constant 18 : index
    %c0_141 = arith.constant 0 : index
    %187 = vector.load %arg3[%c1_140, %c18, %c0_141] : memref<3x80x128xf32, #tpu.memory_space<vmem>>, vector<1x16x128xf32>
    %188 = vector.shape_cast %187 : vector<1x16x128xf32> to vector<16x128xf32>
    %cst_142 = arith.constant 0.0333333351 : f32
    %189 = vector.broadcast %cst_142 : f32 to vector<16x128xf32>
    %190 = arith.subf %188, %189 : vector<16x128xf32>
    %191 = arith.maximumf %173, %190 : vector<16x128xf32>
    %c1_143 = arith.constant 1 : index
    %c19 = arith.constant 19 : index
    %c0_144 = arith.constant 0 : index
    %192 = vector.load %arg3[%c1_143, %c19, %c0_144] : memref<3x80x128xf32, #tpu.memory_space<vmem>>, vector<1x16x128xf32>
    %193 = vector.shape_cast %192 : vector<1x16x128xf32> to vector<16x128xf32>
    %cst_145 = arith.constant 7.500000e-02 : f32
    %194 = vector.broadcast %cst_145 : f32 to vector<16x128xf32>
    %195 = arith.subf %193, %194 : vector<16x128xf32>
    %196 = arith.maximumf %178, %195 : vector<16x128xf32>
    %c1_146 = arith.constant 1 : index
    %c20 = arith.constant 20 : index
    %c0_147 = arith.constant 0 : index
    %197 = vector.load %arg3[%c1_146, %c20, %c0_147] : memref<3x80x128xf32, #tpu.memory_space<vmem>>, vector<1x16x128xf32>
    %198 = vector.shape_cast %197 : vector<1x16x128xf32> to vector<16x128xf32>
    %cst_148 = arith.constant 0.13333334 : f32
    %199 = vector.broadcast %cst_148 : f32 to vector<16x128xf32>
    %200 = arith.subf %198, %199 : vector<16x128xf32>
    %201 = arith.maximumf %181, %200 : vector<16x128xf32>
    %c1_149 = arith.constant 1 : index
    %c21 = arith.constant 21 : index
    %c0_150 = arith.constant 0 : index
    %202 = vector.load %arg3[%c1_149, %c21, %c0_150] : memref<3x80x128xf32, #tpu.memory_space<vmem>>, vector<1x16x128xf32>
    %203 = vector.shape_cast %202 : vector<1x16x128xf32> to vector<16x128xf32>
    %cst_151 = arith.constant 0.208333328 : f32
    %204 = vector.broadcast %cst_151 : f32 to vector<16x128xf32>
    %205 = arith.subf %203, %204 : vector<16x128xf32>
    %206 = arith.maximumf %186, %205 : vector<16x128xf32>
    %c1_152 = arith.constant 1 : index
    %c22 = arith.constant 22 : index
    %c0_153 = arith.constant 0 : index
    %207 = vector.load %arg3[%c1_152, %c22, %c0_153] : memref<3x80x128xf32, #tpu.memory_space<vmem>>, vector<1x16x128xf32>
    %208 = vector.shape_cast %207 : vector<1x16x128xf32> to vector<16x128xf32>
    %cst_154 = arith.constant 3.000000e-01 : f32
    %209 = vector.broadcast %cst_154 : f32 to vector<16x128xf32>
    %210 = arith.subf %208, %209 : vector<16x128xf32>
    %211 = arith.maximumf %191, %210 : vector<16x128xf32>
    %c1_155 = arith.constant 1 : index
    %c23 = arith.constant 23 : index
    %c0_156 = arith.constant 0 : index
    %212 = vector.load %arg3[%c1_155, %c23, %c0_156] : memref<3x80x128xf32, #tpu.memory_space<vmem>>, vector<1x16x128xf32>
    %213 = vector.shape_cast %212 : vector<1x16x128xf32> to vector<16x128xf32>
    %cst_157 = arith.constant 0.408333331 : f32
    %214 = vector.broadcast %cst_157 : f32 to vector<16x128xf32>
    %215 = arith.subf %213, %214 : vector<16x128xf32>
    %216 = arith.maximumf %196, %215 : vector<16x128xf32>
    %c1_158 = arith.constant 1 : index
    %c24 = arith.constant 24 : index
    %c0_159 = arith.constant 0 : index
    %217 = vector.load %arg3[%c1_158, %c24, %c0_159] : memref<3x80x128xf32, #tpu.memory_space<vmem>>, vector<1x16x128xf32>
    %218 = vector.shape_cast %217 : vector<1x16x128xf32> to vector<16x128xf32>
    %cst_160 = arith.constant 0.533333361 : f32
    %219 = vector.broadcast %cst_160 : f32 to vector<16x128xf32>
    %220 = arith.subf %218, %219 : vector<16x128xf32>
    %221 = arith.maximumf %201, %220 : vector<16x128xf32>
    %c1_161 = arith.constant 1 : index
    %c25 = arith.constant 25 : index
    %c0_162 = arith.constant 0 : index
    %222 = vector.load %arg3[%c1_161, %c25, %c0_162] : memref<3x80x128xf32, #tpu.memory_space<vmem>>, vector<1x16x128xf32>
    %223 = vector.shape_cast %222 : vector<1x16x128xf32> to vector<16x128xf32>
    %cst_163 = arith.constant 6.750000e-01 : f32
    %224 = vector.broadcast %cst_163 : f32 to vector<16x128xf32>
    %225 = arith.subf %223, %224 : vector<16x128xf32>
    %226 = arith.maximumf %206, %225 : vector<16x128xf32>
    %c1_164 = arith.constant 1 : index
    %c26 = arith.constant 26 : index
    %c0_165 = arith.constant 0 : index
    %227 = vector.load %arg3[%c1_164, %c26, %c0_165] : memref<3x80x128xf32, #tpu.memory_space<vmem>>, vector<1x16x128xf32>
    %228 = vector.shape_cast %227 : vector<1x16x128xf32> to vector<16x128xf32>
    %cst_166 = arith.constant 0.833333313 : f32
    %229 = vector.broadcast %cst_166 : f32 to vector<16x128xf32>
    %230 = arith.subf %228, %229 : vector<16x128xf32>
    %231 = arith.maximumf %211, %230 : vector<16x128xf32>
    %c1_167 = arith.constant 1 : index
    %c27 = arith.constant 27 : index
    %c0_168 = arith.constant 0 : index
    %232 = vector.load %arg3[%c1_167, %c27, %c0_168] : memref<3x80x128xf32, #tpu.memory_space<vmem>>, vector<1x16x128xf32>
    %233 = vector.shape_cast %232 : vector<1x16x128xf32> to vector<16x128xf32>
    %cst_169 = arith.constant 1.00833333 : f32
    %234 = vector.broadcast %cst_169 : f32 to vector<16x128xf32>
    %235 = arith.subf %233, %234 : vector<16x128xf32>
    %236 = arith.maximumf %216, %235 : vector<16x128xf32>
    %c1_170 = arith.constant 1 : index
    %c28 = arith.constant 28 : index
    %c0_171 = arith.constant 0 : index
    %237 = vector.load %arg3[%c1_170, %c28, %c0_171] : memref<3x80x128xf32, #tpu.memory_space<vmem>>, vector<1x16x128xf32>
    %238 = vector.shape_cast %237 : vector<1x16x128xf32> to vector<16x128xf32>
    %cst_172 = arith.constant 1.200000e+00 : f32
    %239 = vector.broadcast %cst_172 : f32 to vector<16x128xf32>
    %240 = arith.subf %238, %239 : vector<16x128xf32>
    %241 = arith.maximumf %221, %240 : vector<16x128xf32>
    %c1_173 = arith.constant 1 : index
    %c29 = arith.constant 29 : index
    %c0_174 = arith.constant 0 : index
    %242 = vector.load %arg3[%c1_173, %c29, %c0_174] : memref<3x80x128xf32, #tpu.memory_space<vmem>>, vector<1x16x128xf32>
    %243 = vector.shape_cast %242 : vector<1x16x128xf32> to vector<16x128xf32>
    %cst_175 = arith.constant 1.4083333 : f32
    %244 = vector.broadcast %cst_175 : f32 to vector<16x128xf32>
    %245 = arith.subf %243, %244 : vector<16x128xf32>
    %246 = arith.maximumf %226, %245 : vector<16x128xf32>
    %c1_176 = arith.constant 1 : index
    %c30 = arith.constant 30 : index
    %c0_177 = arith.constant 0 : index
    %247 = vector.load %arg3[%c1_176, %c30, %c0_177] : memref<3x80x128xf32, #tpu.memory_space<vmem>>, vector<1x16x128xf32>
    %248 = vector.shape_cast %247 : vector<1x16x128xf32> to vector<16x128xf32>
    %cst_178 = arith.constant 1.63333333 : f32
    %249 = vector.broadcast %cst_178 : f32 to vector<16x128xf32>
    %250 = arith.subf %248, %249 : vector<16x128xf32>
    %251 = arith.maximumf %231, %250 : vector<16x128xf32>
    %c1_179 = arith.constant 1 : index
    %c31 = arith.constant 31 : index
    %c0_180 = arith.constant 0 : index
    %252 = vector.load %arg3[%c1_179, %c31, %c0_180] : memref<3x80x128xf32, #tpu.memory_space<vmem>>, vector<1x16x128xf32>
    %253 = vector.shape_cast %252 : vector<1x16x128xf32> to vector<16x128xf32>
    %cst_181 = arith.constant 1.875000e+00 : f32
    %254 = vector.broadcast %cst_181 : f32 to vector<16x128xf32>
    %255 = arith.subf %253, %254 : vector<16x128xf32>
    %256 = arith.maximumf %236, %255 : vector<16x128xf32>
    %c1_182 = arith.constant 1 : index
    %c32_183 = arith.constant 32 : index
    %c0_184 = arith.constant 0 : index
    %257 = vector.load %arg3[%c1_182, %c32_183, %c0_184] : memref<3x80x128xf32, #tpu.memory_space<vmem>>, vector<1x16x128xf32>
    %258 = vector.shape_cast %257 : vector<1x16x128xf32> to vector<16x128xf32>
    %cst_185 = arith.constant 2.13333344 : f32
    %259 = vector.broadcast %cst_185 : f32 to vector<16x128xf32>
    %260 = arith.subf %258, %259 : vector<16x128xf32>
    %261 = arith.maximumf %241, %260 : vector<16x128xf32>
    %262 = arith.maximumf %261, %246 : vector<16x128xf32>
    %263 = arith.maximumf %262, %251 : vector<16x128xf32>
    %264 = arith.maximumf %263, %256 : vector<16x128xf32>
    %c1_186 = arith.constant 1 : index
    %c0_187 = arith.constant 0 : index
    %c0_188 = arith.constant 0 : index
    %265 = vector.load %arg2[%c1_186, %c0_187, %c0_188] : memref<3x16x128xf32, #tpu.memory_space<vmem>>, vector<1x16x128xf32>
    %266 = vector.shape_cast %265 : vector<1x16x128xf32> to vector<16x128xf32>
    %267 = vector.shape_cast %264 : vector<16x128xf32> to vector<1x16x128xf32>
    tpu.vector_store %arg2[%c1_186, %c0_187, %c0_188], %267 {strides = array<i32>} : memref<3x16x128xf32, #tpu.memory_space<vmem>>, vector<1x16x128xf32>,
    %c2_189 = arith.constant 2 : index
    %c0_190 = arith.constant 0 : index
    %c0_191 = arith.constant 0 : index
    %268 = vector.load %arg3[%c2_189, %c0_190, %c0_191] : memref<3x80x128xf32, #tpu.memory_space<vmem>>, vector<1x16x128xf32>
    %269 = vector.shape_cast %268 : vector<1x16x128xf32> to vector<16x128xf32>
    %cst_192 = arith.constant 2.03174615 : f32
    %270 = vector.broadcast %cst_192 : f32 to vector<16x128xf32>
    %271 = arith.subf %269, %270 : vector<16x128xf32>
    %c2_193 = arith.constant 2 : index
    %c1_194 = arith.constant 1 : index
    %c0_195 = arith.constant 0 : index
    %272 = vector.load %arg3[%c2_193, %c1_194, %c0_195] : memref<3x80x128xf32, #tpu.memory_space<vmem>>, vector<1x16x128xf32>
    %273 = vector.shape_cast %272 : vector<1x16x128xf32> to vector<16x128xf32>
    %cst_196 = arith.constant 1.90674603 : f32
    %274 = vector.broadcast %cst_196 : f32 to vector<16x128xf32>
    %275 = arith.subf %273, %274 : vector<16x128xf32>
    %c2_197 = arith.constant 2 : index
    %c2_198 = arith.constant 2 : index
    %c0_199 = arith.constant 0 : index
    %276 = vector.load %arg3[%c2_197, %c2_198, %c0_199] : memref<3x80x128xf32, #tpu.memory_space<vmem>>, vector<1x16x128xf32>
    %277 = vector.shape_cast %276 : vector<1x16x128xf32> to vector<16x128xf32>
    %cst_200 = arith.constant 1.78571427 : f32
    %278 = vector.broadcast %cst_200 : f32 to vector<16x128xf32>
    %279 = arith.subf %277, %278 : vector<16x128xf32>
    %c2_201 = arith.constant 2 : index
    %c3_202 = arith.constant 3 : index
    %c0_203 = arith.constant 0 : index
    %280 = vector.load %arg3[%c2_201, %c3_202, %c0_203] : memref<3x80x128xf32, #tpu.memory_space<vmem>>, vector<1x16x128xf32>
    %281 = vector.shape_cast %280 : vector<1x16x128xf32> to vector<16x128xf32>
    %cst_204 = arith.constant 1.66865075 : f32
    %282 = vector.broadcast %cst_204 : f32 to vector<16x128xf32>
    %283 = arith.subf %281, %282 : vector<16x128xf32>
    %c2_205 = arith.constant 2 : index
    %c4_206 = arith.constant 4 : index
    %c0_207 = arith.constant 0 : index
    %284 = vector.load %arg3[%c2_205, %c4_206, %c0_207] : memref<3x80x128xf32, #tpu.memory_space<vmem>>, vector<1x16x128xf32>
    %285 = vector.shape_cast %284 : vector<1x16x128xf32> to vector<16x128xf32>
    %cst_208 = arith.constant 1.55555558 : f32
    %286 = vector.broadcast %cst_208 : f32 to vector<16x128xf32>
    %287 = arith.subf %285, %286 : vector<16x128xf32>
    %288 = arith.maximumf %271, %287 : vector<16x128xf32>
    %c2_209 = arith.constant 2 : index
    %c5_210 = arith.constant 5 : index
    %c0_211 = arith.constant 0 : index
    %289 = vector.load %arg3[%c2_209, %c5_210, %c0_211] : memref<3x80x128xf32, #tpu.memory_space<vmem>>, vector<1x16x128xf32>
    %290 = vector.shape_cast %289 : vector<1x16x128xf32> to vector<16x128xf32>
    %cst_212 = arith.constant 1.44642854 : f32
    %291 = vector.broadcast %cst_212 : f32 to vector<16x128xf32>
    %292 = arith.subf %290, %291 : vector<16x128xf32>
    %293 = arith.maximumf %275, %292 : vector<16x128xf32>
    %c2_213 = arith.constant 2 : index
    %c6_214 = arith.constant 6 : index
    %c0_215 = arith.constant 0 : index
    %294 = vector.load %arg3[%c2_213, %c6_214, %c0_215] : memref<3x80x128xf32, #tpu.memory_space<vmem>>, vector<1x16x128xf32>
    %295 = vector.shape_cast %294 : vector<1x16x128xf32> to vector<16x128xf32>
    %cst_216 = arith.constant 1.34126985 : f32
    %296 = vector.broadcast %cst_216 : f32 to vector<16x128xf32>
    %297 = arith.subf %295, %296 : vector<16x128xf32>
    %298 = arith.maximumf %279, %297 : vector<16x128xf32>
    %c2_217 = arith.constant 2 : index
    %c7_218 = arith.constant 7 : index
    %c0_219 = arith.constant 0 : index
    %299 = vector.load %arg3[%c2_217, %c7_218, %c0_219] : memref<3x80x128xf32, #tpu.memory_space<vmem>>, vector<1x16x128xf32>
    %300 = vector.shape_cast %299 : vector<1x16x128xf32> to vector<16x128xf32>
    %cst_220 = arith.constant 1.2400794 : f32
    %301 = vector.broadcast %cst_220 : f32 to vector<16x128xf32>
    %302 = arith.subf %300, %301 : vector<16x128xf32>
    %303 = arith.maximumf %283, %302 : vector<16x128xf32>
    %c2_221 = arith.constant 2 : index
    %c8_222 = arith.constant 8 : index
    %c0_223 = arith.constant 0 : index
    %304 = vector.load %arg3[%c2_221, %c8_222, %c0_223] : memref<3x80x128xf32, #tpu.memory_space<vmem>>, vector<1x16x128xf32>
    %305 = vector.shape_cast %304 : vector<1x16x128xf32> to vector<16x128xf32>
    %cst_224 = arith.constant 1.14285719 : f32
    %306 = vector.broadcast %cst_224 : f32 to vector<16x128xf32>
    %307 = arith.subf %305, %306 : vector<16x128xf32>
    %308 = arith.maximumf %288, %307 : vector<16x128xf32>
    %c2_225 = arith.constant 2 : index
    %c9_226 = arith.constant 9 : index
    %c0_227 = arith.constant 0 : index
    %309 = vector.load %arg3[%c2_225, %c9_226, %c0_227] : memref<3x80x128xf32, #tpu.memory_space<vmem>>, vector<1x16x128xf32>
    %310 = vector.shape_cast %309 : vector<1x16x128xf32> to vector<16x128xf32>
    %cst_228 = arith.constant 1.04960322 : f32
    %311 = vector.broadcast %cst_228 : f32 to vector<16x128xf32>
    %312 = arith.subf %310, %311 : vector<16x128xf32>
    %313 = arith.maximumf %293, %312 : vector<16x128xf32>
    %c2_229 = arith.constant 2 : index
    %c10_230 = arith.constant 10 : index
    %c0_231 = arith.constant 0 : index
    %314 = vector.load %arg3[%c2_229, %c10_230, %c0_231] : memref<3x80x128xf32, #tpu.memory_space<vmem>>, vector<1x16x128xf32>
    %315 = vector.shape_cast %314 : vector<1x16x128xf32> to vector<16x128xf32>
    %cst_232 = arith.constant 0.960317432 : f32
    %316 = vector.broadcast %cst_232 : f32 to vector<16x128xf32>
    %317 = arith.subf %315, %316 : vector<16x128xf32>
    %318 = arith.maximumf %298, %317 : vector<16x128xf32>
    %c2_233 = arith.constant 2 : index
    %c11_234 = arith.constant 11 : index
    %c0_235 = arith.constant 0 : index
    %319 = vector.load %arg3[%c2_233, %c11_234, %c0_235] : memref<3x80x128xf32, #tpu.memory_space<vmem>>, vector<1x16x128xf32>
    %320 = vector.shape_cast %319 : vector<1x16x128xf32> to vector<16x128xf32>
    %cst_236 = arith.constant 8.750000e-01 : f32
    %321 = vector.broadcast %cst_236 : f32 to vector<16x128xf32>
    %322 = arith.subf %320, %321 : vector<16x128xf32>
    %323 = arith.maximumf %303, %322 : vector<16x128xf32>
    %c2_237 = arith.constant 2 : index
    %c12_238 = arith.constant 12 : index
    %c0_239 = arith.constant 0 : index
    %324 = vector.load %arg3[%c2_237, %c12_238, %c0_239] : memref<3x80x128xf32, #tpu.memory_space<vmem>>, vector<1x16x128xf32>
    %325 = vector.shape_cast %324 : vector<1x16x128xf32> to vector<16x128xf32>
    %cst_240 = arith.constant 0.793650805 : f32
    %326 = vector.broadcast %cst_240 : f32 to vector<16x128xf32>
    %327 = arith.subf %325, %326 : vector<16x128xf32>
    %328 = arith.maximumf %308, %327 : vector<16x128xf32>
    %c2_241 = arith.constant 2 : index
    %c13_242 = arith.constant 13 : index
    %c0_243 = arith.constant 0 : index
    %329 = vector.load %arg3[%c2_241, %c13_242, %c0_243] : memref<3x80x128xf32, #tpu.memory_space<vmem>>, vector<1x16x128xf32>
    %330 = vector.shape_cast %329 : vector<1x16x128xf32> to vector<16x128xf32>
    %cst_244 = arith.constant 0.716269851 : f32
    %331 = vector.broadcast %cst_244 : f32 to vector<16x128xf32>
    %332 = arith.subf %330, %331 : vector<16x128xf32>
    %333 = arith.maximumf %313, %332 : vector<16x128xf32>
    %c2_245 = arith.constant 2 : index
    %c14_246 = arith.constant 14 : index
    %c0_247 = arith.constant 0 : index
    %334 = vector.load %arg3[%c2_245, %c14_246, %c0_247] : memref<3x80x128xf32, #tpu.memory_space<vmem>>, vector<1x16x128xf32>
    %335 = vector.shape_cast %334 : vector<1x16x128xf32> to vector<16x128xf32>
    %cst_248 = arith.constant 0.642857134 : f32
    %336 = vector.broadcast %cst_248 : f32 to vector<16x128xf32>
    %337 = arith.subf %335, %336 : vector<16x128xf32>
    %338 = arith.maximumf %318, %337 : vector<16x128xf32>
    %c2_249 = arith.constant 2 : index
    %c15_250 = arith.constant 15 : index
    %c0_251 = arith.constant 0 : index
    %339 = vector.load %arg3[%c2_249, %c15_250, %c0_251] : memref<3x80x128xf32, #tpu.memory_space<vmem>>, vector<1x16x128xf32>
    %340 = vector.shape_cast %339 : vector<1x16x128xf32> to vector<16x128xf32>
    %cst_252 = arith.constant 0.573412716 : f32
    %341 = vector.broadcast %cst_252 : f32 to vector<16x128xf32>
    %342 = arith.subf %340, %341 : vector<16x128xf32>
    %343 = arith.maximumf %323, %342 : vector<16x128xf32>
    %c2_253 = arith.constant 2 : index
    %c16_254 = arith.constant 16 : index
    %c0_255 = arith.constant 0 : index
    %344 = vector.load %arg3[%c2_253, %c16_254, %c0_255] : memref<3x80x128xf32, #tpu.memory_space<vmem>>, vector<1x16x128xf32>
    %345 = vector.shape_cast %344 : vector<1x16x128xf32> to vector<16x128xf32>
    %cst_256 = arith.constant 0.507936537 : f32
    %346 = vector.broadcast %cst_256 : f32 to vector<16x128xf32>
    %347 = arith.subf %345, %346 : vector<16x128xf32>
    %348 = arith.maximumf %328, %347 : vector<16x128xf32>
    %c2_257 = arith.constant 2 : index
    %c17_258 = arith.constant 17 : index
    %c0_259 = arith.constant 0 : index
    %349 = vector.load %arg3[%c2_257, %c17_258, %c0_259] : memref<3x80x128xf32, #tpu.memory_space<vmem>>, vector<1x16x128xf32>
    %350 = vector.shape_cast %349 : vector<1x16x128xf32> to vector<16x128xf32>
    %cst_260 = arith.constant 0.446428567 : f32
    %351 = vector.broadcast %cst_260 : f32 to vector<16x128xf32>
    %352 = arith.subf %350, %351 : vector<16x128xf32>
    %353 = arith.maximumf %333, %352 : vector<16x128xf32>
    %c2_261 = arith.constant 2 : index
    %c18_262 = arith.constant 18 : index
    %c0_263 = arith.constant 0 : index
    %354 = vector.load %arg3[%c2_261, %c18_262, %c0_263] : memref<3x80x128xf32, #tpu.memory_space<vmem>>, vector<1x16x128xf32>
    %355 = vector.shape_cast %354 : vector<1x16x128xf32> to vector<16x128xf32>
    %cst_264 = arith.constant 0.388888896 : f32
    %356 = vector.broadcast %cst_264 : f32 to vector<16x128xf32>
    %357 = arith.subf %355, %356 : vector<16x128xf32>
    %358 = arith.maximumf %338, %357 : vector<16x128xf32>
    %c2_265 = arith.constant 2 : index
    %c19_266 = arith.constant 19 : index
    %c0_267 = arith.constant 0 : index
    %359 = vector.load %arg3[%c2_265, %c19_266, %c0_267] : memref<3x80x128xf32, #tpu.memory_space<vmem>>, vector<1x16x128xf32>
    %360 = vector.shape_cast %359 : vector<1x16x128xf32> to vector<16x128xf32>
    %cst_268 = arith.constant 0.335317463 : f32
    %361 = vector.broadcast %cst_268 : f32 to vector<16x128xf32>
    %362 = arith.subf %360, %361 : vector<16x128xf32>
    %363 = arith.maximumf %343, %362 : vector<16x128xf32>
    %c2_269 = arith.constant 2 : index
    %c20_270 = arith.constant 20 : index
    %c0_271 = arith.constant 0 : index
    %364 = vector.load %arg3[%c2_269, %c20_270, %c0_271] : memref<3x80x128xf32, #tpu.memory_space<vmem>>, vector<1x16x128xf32>
    %365 = vector.shape_cast %364 : vector<1x16x128xf32> to vector<16x128xf32>
    %cst_272 = arith.constant 0.285714298 : f32
    %366 = vector.broadcast %cst_272 : f32 to vector<16x128xf32>
    %367 = arith.subf %365, %366 : vector<16x128xf32>
    %368 = arith.maximumf %348, %367 : vector<16x128xf32>
    %c2_273 = arith.constant 2 : index
    %c21_274 = arith.constant 21 : index
    %c0_275 = arith.constant 0 : index
    %369 = vector.load %arg3[%c2_273, %c21_274, %c0_275] : memref<3x80x128xf32, #tpu.memory_space<vmem>>, vector<1x16x128xf32>
    %370 = vector.shape_cast %369 : vector<1x16x128xf32> to vector<16x128xf32>
    %cst_276 = arith.constant 0.240079358 : f32
    %371 = vector.broadcast %cst_276 : f32 to vector<16x128xf32>
    %372 = arith.subf %370, %371 : vector<16x128xf32>
    %373 = arith.maximumf %353, %372 : vector<16x128xf32>
    %c2_277 = arith.constant 2 : index
    %c22_278 = arith.constant 22 : index
    %c0_279 = arith.constant 0 : index
    %374 = vector.load %arg3[%c2_277, %c22_278, %c0_279] : memref<3x80x128xf32, #tpu.memory_space<vmem>>, vector<1x16x128xf32>
    %375 = vector.shape_cast %374 : vector<1x16x128xf32> to vector<16x128xf32>
    %cst_280 = arith.constant 0.198412701 : f32
    %376 = vector.broadcast %cst_280 : f32 to vector<16x128xf32>
    %377 = arith.subf %375, %376 : vector<16x128xf32>
    %378 = arith.maximumf %358, %377 : vector<16x128xf32>
    %c2_281 = arith.constant 2 : index
    %c23_282 = arith.constant 23 : index
    %c0_283 = arith.constant 0 : index
    %379 = vector.load %arg3[%c2_281, %c23_282, %c0_283] : memref<3x80x128xf32, #tpu.memory_space<vmem>>, vector<1x16x128xf32>
    %380 = vector.shape_cast %379 : vector<1x16x128xf32> to vector<16x128xf32>
    %cst_284 = arith.constant 0.160714284 : f32
    %381 = vector.broadcast %cst_284 : f32 to vector<16x128xf32>
    %382 = arith.subf %380, %381 : vector<16x128xf32>
    %383 = arith.maximumf %363, %382 : vector<16x128xf32>
    %c2_285 = arith.constant 2 : index
    %c24_286 = arith.constant 24 : index
    %c0_287 = arith.constant 0 : index
    %384 = vector.load %arg3[%c2_285, %c24_286, %c0_287] : memref<3x80x128xf32, #tpu.memory_space<vmem>>, vector<1x16x128xf32>
    %385 = vector.shape_cast %384 : vector<1x16x128xf32> to vector<16x128xf32>
    %cst_288 = arith.constant 0.126984134 : f32
    %386 = vector.broadcast %cst_288 : f32 to vector<16x128xf32>
    %387 = arith.subf %385, %386 : vector<16x128xf32>
    %388 = arith.maximumf %368, %387 : vector<16x128xf32>
    %c2_289 = arith.constant 2 : index
    %c25_290 = arith.constant 25 : index
    %c0_291 = arith.constant 0 : index
    %389 = vector.load %arg3[%c2_289, %c25_290, %c0_291] : memref<3x80x128xf32, #tpu.memory_space<vmem>>, vector<1x16x128xf32>
    %390 = vector.shape_cast %389 : vector<1x16x128xf32> to vector<16x128xf32>
    %cst_292 = arith.constant 0.0972222238 : f32
    %391 = vector.broadcast %cst_292 : f32 to vector<16x128xf32>
    %392 = arith.subf %390, %391 : vector<16x128xf32>
    %393 = arith.maximumf %373, %392 : vector<16x128xf32>
    %c2_293 = arith.constant 2 : index
    %c26_294 = arith.constant 26 : index
    %c0_295 = arith.constant 0 : index
    %394 = vector.load %arg3[%c2_293, %c26_294, %c0_295] : memref<3x80x128xf32, #tpu.memory_space<vmem>>, vector<1x16x128xf32>
    %395 = vector.shape_cast %394 : vector<1x16x128xf32> to vector<16x128xf32>
    %cst_296 = arith.constant 0.0714285746 : f32
    %396 = vector.broadcast %cst_296 : f32 to vector<16x128xf32>
    %397 = arith.subf %395, %396 : vector<16x128xf32>
    %398 = arith.maximumf %378, %397 : vector<16x128xf32>
    %c2_297 = arith.constant 2 : index
    %c27_298 = arith.constant 27 : index
    %c0_299 = arith.constant 0 : index
    %399 = vector.load %arg3[%c2_297, %c27_298, %c0_299] : memref<3x80x128xf32, #tpu.memory_space<vmem>>, vector<1x16x128xf32>
    %400 = vector.shape_cast %399 : vector<1x16x128xf32> to vector<16x128xf32>
    %cst_300 = arith.constant 0.0496031754 : f32
    %401 = vector.broadcast %cst_300 : f32 to vector<16x128xf32>
    %402 = arith.subf %400, %401 : vector<16x128xf32>
    %403 = arith.maximumf %383, %402 : vector<16x128xf32>
    %c2_301 = arith.constant 2 : index
    %c28_302 = arith.constant 28 : index
    %c0_303 = arith.constant 0 : index
    %404 = vector.load %arg3[%c2_301, %c28_302, %c0_303] : memref<3x80x128xf32, #tpu.memory_space<vmem>>, vector<1x16x128xf32>
    %405 = vector.shape_cast %404 : vector<1x16x128xf32> to vector<16x128xf32>
    %cst_304 = arith.constant 0.0317460336 : f32
    %406 = vector.broadcast %cst_304 : f32 to vector<16x128xf32>
    %407 = arith.subf %405, %406 : vector<16x128xf32>
    %408 = arith.maximumf %388, %407 : vector<16x128xf32>
    %c2_305 = arith.constant 2 : index
    %c29_306 = arith.constant 29 : index
    %c0_307 = arith.constant 0 : index
    %409 = vector.load %arg3[%c2_305, %c29_306, %c0_307] : memref<3x80x128xf32, #tpu.memory_space<vmem>>, vector<1x16x128xf32>
    %410 = vector.shape_cast %409 : vector<1x16x128xf32> to vector<16x128xf32>
    %cst_308 = arith.constant 0.0178571437 : f32
    %411 = vector.broadcast %cst_308 : f32 to vector<16x128xf32>
    %412 = arith.subf %410, %411 : vector<16x128xf32>
    %413 = arith.maximumf %393, %412 : vector<16x128xf32>
    %c2_309 = arith.constant 2 : index
    %c30_310 = arith.constant 30 : index
    %c0_311 = arith.constant 0 : index
    %414 = vector.load %arg3[%c2_309, %c30_310, %c0_311] : memref<3x80x128xf32, #tpu.memory_space<vmem>>, vector<1x16x128xf32>
    %415 = vector.shape_cast %414 : vector<1x16x128xf32> to vector<16x128xf32>
    %cst_312 = arith.constant 0.00793650839 : f32
    %416 = vector.broadcast %cst_312 : f32 to vector<16x128xf32>
    %417 = arith.subf %415, %416 : vector<16x128xf32>
    %418 = arith.maximumf %398, %417 : vector<16x128xf32>
    %c2_313 = arith.constant 2 : index
    %c31_314 = arith.constant 31 : index
    %c0_315 = arith.constant 0 : index
    %419 = vector.load %arg3[%c2_313, %c31_314, %c0_315] : memref<3x80x128xf32, #tpu.memory_space<vmem>>, vector<1x16x128xf32>
    %420 = vector.shape_cast %419 : vector<1x16x128xf32> to vector<16x128xf32>
    %cst_316 = arith.constant 0.0019841271 : f32
    %421 = vector.broadcast %cst_316 : f32 to vector<16x128xf32>
    %422 = arith.subf %420, %421 : vector<16x128xf32>
    %423 = arith.maximumf %403, %422 : vector<16x128xf32>
    %c2_317 = arith.constant 2 : index
    %c32_318 = arith.constant 32 : index
    %c0_319 = arith.constant 0 : index
    %424 = vector.load %arg3[%c2_317, %c32_318, %c0_319] : memref<3x80x128xf32, #tpu.memory_space<vmem>>, vector<1x16x128xf32>
    %425 = vector.shape_cast %424 : vector<1x16x128xf32> to vector<16x128xf32>
    %426 = arith.maximumf %408, %425 : vector<16x128xf32>
    %c2_320 = arith.constant 2 : index
    %c33 = arith.constant 33 : index
    %c0_321 = arith.constant 0 : index
    %427 = vector.load %arg3[%c2_320, %c33, %c0_321] : memref<3x80x128xf32, #tpu.memory_space<vmem>>, vector<1x16x128xf32>
    %428 = vector.shape_cast %427 : vector<1x16x128xf32> to vector<16x128xf32>
    %cst_322 = arith.constant 0.0019841271 : f32
    %429 = vector.broadcast %cst_322 : f32 to vector<16x128xf32>
    %430 = arith.subf %428, %429 : vector<16x128xf32>
    %431 = arith.maximumf %413, %430 : vector<16x128xf32>
    %c2_323 = arith.constant 2 : index
    %c34 = arith.constant 34 : index
    %c0_324 = arith.constant 0 : index
    %432 = vector.load %arg3[%c2_323, %c34, %c0_324] : memref<3x80x128xf32, #tpu.memory_space<vmem>>, vector<1x16x128xf32>
    %433 = vector.shape_cast %432 : vector<1x16x128xf32> to vector<16x128xf32>
    %cst_325 = arith.constant 0.00793650839 : f32
    %434 = vector.broadcast %cst_325 : f32 to vector<16x128xf32>
    %435 = arith.subf %433, %434 : vector<16x128xf32>
    %436 = arith.maximumf %418, %435 : vector<16x128xf32>
    %c2_326 = arith.constant 2 : index
    %c35 = arith.constant 35 : index
    %c0_327 = arith.constant 0 : index
    %437 = vector.load %arg3[%c2_326, %c35, %c0_327] : memref<3x80x128xf32, #tpu.memory_space<vmem>>, vector<1x16x128xf32>
    %438 = vector.shape_cast %437 : vector<1x16x128xf32> to vector<16x128xf32>
    %cst_328 = arith.constant 0.0178571437 : f32
    %439 = vector.broadcast %cst_328 : f32 to vector<16x128xf32>
    %440 = arith.subf %438, %439 : vector<16x128xf32>
    %441 = arith.maximumf %423, %440 : vector<16x128xf32>
    %c2_329 = arith.constant 2 : index
    %c36 = arith.constant 36 : index
    %c0_330 = arith.constant 0 : index
    %442 = vector.load %arg3[%c2_329, %c36, %c0_330] : memref<3x80x128xf32, #tpu.memory_space<vmem>>, vector<1x16x128xf32>
    %443 = vector.shape_cast %442 : vector<1x16x128xf32> to vector<16x128xf32>
    %cst_331 = arith.constant 0.0317460336 : f32
    %444 = vector.broadcast %cst_331 : f32 to vector<16x128xf32>
    %445 = arith.subf %443, %444 : vector<16x128xf32>
    %446 = arith.maximumf %426, %445 : vector<16x128xf32>
    %c2_332 = arith.constant 2 : index
    %c37 = arith.constant 37 : index
    %c0_333 = arith.constant 0 : index
    %447 = vector.load %arg3[%c2_332, %c37, %c0_333] : memref<3x80x128xf32, #tpu.memory_space<vmem>>, vector<1x16x128xf32>
    %448 = vector.shape_cast %447 : vector<1x16x128xf32> to vector<16x128xf32>
    %cst_334 = arith.constant 0.0496031754 : f32
    %449 = vector.broadcast %cst_334 : f32 to vector<16x128xf32>
    %450 = arith.subf %448, %449 : vector<16x128xf32>
    %451 = arith.maximumf %431, %450 : vector<16x128xf32>
    %c2_335 = arith.constant 2 : index
    %c38 = arith.constant 38 : index
    %c0_336 = arith.constant 0 : index
    %452 = vector.load %arg3[%c2_335, %c38, %c0_336] : memref<3x80x128xf32, #tpu.memory_space<vmem>>, vector<1x16x128xf32>
    %453 = vector.shape_cast %452 : vector<1x16x128xf32> to vector<16x128xf32>
    %cst_337 = arith.constant 0.0714285746 : f32
    %454 = vector.broadcast %cst_337 : f32 to vector<16x128xf32>
    %455 = arith.subf %453, %454 : vector<16x128xf32>
    %456 = arith.maximumf %436, %455 : vector<16x128xf32>
    %c2_338 = arith.constant 2 : index
    %c39 = arith.constant 39 : index
    %c0_339 = arith.constant 0 : index
    %457 = vector.load %arg3[%c2_338, %c39, %c0_339] : memref<3x80x128xf32, #tpu.memory_space<vmem>>, vector<1x16x128xf32>
    %458 = vector.shape_cast %457 : vector<1x16x128xf32> to vector<16x128xf32>
    %cst_340 = arith.constant 0.0972222238 : f32
    %459 = vector.broadcast %cst_340 : f32 to vector<16x128xf32>
    %460 = arith.subf %458, %459 : vector<16x128xf32>
    %461 = arith.maximumf %441, %460 : vector<16x128xf32>
    %c2_341 = arith.constant 2 : index
    %c40 = arith.constant 40 : index
    %c0_342 = arith.constant 0 : index
    %462 = vector.load %arg3[%c2_341, %c40, %c0_342] : memref<3x80x128xf32, #tpu.memory_space<vmem>>, vector<1x16x128xf32>
    %463 = vector.shape_cast %462 : vector<1x16x128xf32> to vector<16x128xf32>
    %cst_343 = arith.constant 0.126984134 : f32
    %464 = vector.broadcast %cst_343 : f32 to vector<16x128xf32>
    %465 = arith.subf %463, %464 : vector<16x128xf32>
    %466 = arith.maximumf %446, %465 : vector<16x128xf32>
    %c2_344 = arith.constant 2 : index
    %c41 = arith.constant 41 : index
    %c0_345 = arith.constant 0 : index
    %467 = vector.load %arg3[%c2_344, %c41, %c0_345] : memref<3x80x128xf32, #tpu.memory_space<vmem>>, vector<1x16x128xf32>
    %468 = vector.shape_cast %467 : vector<1x16x128xf32> to vector<16x128xf32>
    %cst_346 = arith.constant 0.160714284 : f32
    %469 = vector.broadcast %cst_346 : f32 to vector<16x128xf32>
    %470 = arith.subf %468, %469 : vector<16x128xf32>
    %471 = arith.maximumf %451, %470 : vector<16x128xf32>
    %c2_347 = arith.constant 2 : index
    %c42 = arith.constant 42 : index
    %c0_348 = arith.constant 0 : index
    %472 = vector.load %arg3[%c2_347, %c42, %c0_348] : memref<3x80x128xf32, #tpu.memory_space<vmem>>, vector<1x16x128xf32>
    %473 = vector.shape_cast %472 : vector<1x16x128xf32> to vector<16x128xf32>
    %cst_349 = arith.constant 0.198412701 : f32
    %474 = vector.broadcast %cst_349 : f32 to vector<16x128xf32>
    %475 = arith.subf %473, %474 : vector<16x128xf32>
    %476 = arith.maximumf %456, %475 : vector<16x128xf32>
    %c2_350 = arith.constant 2 : index
    %c43 = arith.constant 43 : index
    %c0_351 = arith.constant 0 : index
    %477 = vector.load %arg3[%c2_350, %c43, %c0_351] : memref<3x80x128xf32, #tpu.memory_space<vmem>>, vector<1x16x128xf32>
    %478 = vector.shape_cast %477 : vector<1x16x128xf32> to vector<16x128xf32>
    %cst_352 = arith.constant 0.240079358 : f32
    %479 = vector.broadcast %cst_352 : f32 to vector<16x128xf32>
    %480 = arith.subf %478, %479 : vector<16x128xf32>
    %481 = arith.maximumf %461, %480 : vector<16x128xf32>
    %c2_353 = arith.constant 2 : index
    %c44 = arith.constant 44 : index
    %c0_354 = arith.constant 0 : index
    %482 = vector.load %arg3[%c2_353, %c44, %c0_354] : memref<3x80x128xf32, #tpu.memory_space<vmem>>, vector<1x16x128xf32>
    %483 = vector.shape_cast %482 : vector<1x16x128xf32> to vector<16x128xf32>
    %cst_355 = arith.constant 0.285714298 : f32
    %484 = vector.broadcast %cst_355 : f32 to vector<16x128xf32>
    %485 = arith.subf %483, %484 : vector<16x128xf32>
    %486 = arith.maximumf %466, %485 : vector<16x128xf32>
    %c2_356 = arith.constant 2 : index
    %c45 = arith.constant 45 : index
    %c0_357 = arith.constant 0 : index
    %487 = vector.load %arg3[%c2_356, %c45, %c0_357] : memref<3x80x128xf32, #tpu.memory_space<vmem>>, vector<1x16x128xf32>
    %488 = vector.shape_cast %487 : vector<1x16x128xf32> to vector<16x128xf32>
    %cst_358 = arith.constant 0.335317463 : f32
    %489 = vector.broadcast %cst_358 : f32 to vector<16x128xf32>
    %490 = arith.subf %488, %489 : vector<16x128xf32>
    %491 = arith.maximumf %471, %490 : vector<16x128xf32>
    %c2_359 = arith.constant 2 : index
    %c46 = arith.constant 46 : index
    %c0_360 = arith.constant 0 : index
    %492 = vector.load %arg3[%c2_359, %c46, %c0_360] : memref<3x80x128xf32, #tpu.memory_space<vmem>>, vector<1x16x128xf32>
    %493 = vector.shape_cast %492 : vector<1x16x128xf32> to vector<16x128xf32>
    %cst_361 = arith.constant 0.388888896 : f32
    %494 = vector.broadcast %cst_361 : f32 to vector<16x128xf32>
    %495 = arith.subf %493, %494 : vector<16x128xf32>
    %496 = arith.maximumf %476, %495 : vector<16x128xf32>
    %c2_362 = arith.constant 2 : index
    %c47 = arith.constant 47 : index
    %c0_363 = arith.constant 0 : index
    %497 = vector.load %arg3[%c2_362, %c47, %c0_363] : memref<3x80x128xf32, #tpu.memory_space<vmem>>, vector<1x16x128xf32>
    %498 = vector.shape_cast %497 : vector<1x16x128xf32> to vector<16x128xf32>
    %cst_364 = arith.constant 0.446428567 : f32
    %499 = vector.broadcast %cst_364 : f32 to vector<16x128xf32>
    %500 = arith.subf %498, %499 : vector<16x128xf32>
    %501 = arith.maximumf %481, %500 : vector<16x128xf32>
    %c2_365 = arith.constant 2 : index
    %c48 = arith.constant 48 : index
    %c0_366 = arith.constant 0 : index
    %502 = vector.load %arg3[%c2_365, %c48, %c0_366] : memref<3x80x128xf32, #tpu.memory_space<vmem>>, vector<1x16x128xf32>
    %503 = vector.shape_cast %502 : vector<1x16x128xf32> to vector<16x128xf32>
    %cst_367 = arith.constant 0.507936537 : f32
    %504 = vector.broadcast %cst_367 : f32 to vector<16x128xf32>
    %505 = arith.subf %503, %504 : vector<16x128xf32>
    %506 = arith.maximumf %486, %505 : vector<16x128xf32>
    %c2_368 = arith.constant 2 : index
    %c49 = arith.constant 49 : index
    %c0_369 = arith.constant 0 : index
    %507 = vector.load %arg3[%c2_368, %c49, %c0_369] : memref<3x80x128xf32, #tpu.memory_space<vmem>>, vector<1x16x128xf32>
    %508 = vector.shape_cast %507 : vector<1x16x128xf32> to vector<16x128xf32>
    %cst_370 = arith.constant 0.573412716 : f32
    %509 = vector.broadcast %cst_370 : f32 to vector<16x128xf32>
    %510 = arith.subf %508, %509 : vector<16x128xf32>
    %511 = arith.maximumf %491, %510 : vector<16x128xf32>
    %c2_371 = arith.constant 2 : index
    %c50 = arith.constant 50 : index
    %c0_372 = arith.constant 0 : index
    %512 = vector.load %arg3[%c2_371, %c50, %c0_372] : memref<3x80x128xf32, #tpu.memory_space<vmem>>, vector<1x16x128xf32>
    %513 = vector.shape_cast %512 : vector<1x16x128xf32> to vector<16x128xf32>
    %cst_373 = arith.constant 0.642857134 : f32
    %514 = vector.broadcast %cst_373 : f32 to vector<16x128xf32>
    %515 = arith.subf %513, %514 : vector<16x128xf32>
    %516 = arith.maximumf %496, %515 : vector<16x128xf32>
    %c2_374 = arith.constant 2 : index
    %c51 = arith.constant 51 : index
    %c0_375 = arith.constant 0 : index
    %517 = vector.load %arg3[%c2_374, %c51, %c0_375] : memref<3x80x128xf32, #tpu.memory_space<vmem>>, vector<1x16x128xf32>
    %518 = vector.shape_cast %517 : vector<1x16x128xf32> to vector<16x128xf32>
    %cst_376 = arith.constant 0.716269851 : f32
    %519 = vector.broadcast %cst_376 : f32 to vector<16x128xf32>
    %520 = arith.subf %518, %519 : vector<16x128xf32>
    %521 = arith.maximumf %501, %520 : vector<16x128xf32>
    %c2_377 = arith.constant 2 : index
    %c52 = arith.constant 52 : index
    %c0_378 = arith.constant 0 : index
    %522 = vector.load %arg3[%c2_377, %c52, %c0_378] : memref<3x80x128xf32, #tpu.memory_space<vmem>>, vector<1x16x128xf32>
    %523 = vector.shape_cast %522 : vector<1x16x128xf32> to vector<16x128xf32>
    %cst_379 = arith.constant 0.793650805 : f32
    %524 = vector.broadcast %cst_379 : f32 to vector<16x128xf32>
    %525 = arith.subf %523, %524 : vector<16x128xf32>
    %526 = arith.maximumf %506, %525 : vector<16x128xf32>
    %c2_380 = arith.constant 2 : index
    %c53 = arith.constant 53 : index
    %c0_381 = arith.constant 0 : index
    %527 = vector.load %arg3[%c2_380, %c53, %c0_381] : memref<3x80x128xf32, #tpu.memory_space<vmem>>, vector<1x16x128xf32>
    %528 = vector.shape_cast %527 : vector<1x16x128xf32> to vector<16x128xf32>
    %cst_382 = arith.constant 8.750000e-01 : f32
    %529 = vector.broadcast %cst_382 : f32 to vector<16x128xf32>
    %530 = arith.subf %528, %529 : vector<16x128xf32>
    %531 = arith.maximumf %511, %530 : vector<16x128xf32>
    %c2_383 = arith.constant 2 : index
    %c54 = arith.constant 54 : index
    %c0_384 = arith.constant 0 : index
    %532 = vector.load %arg3[%c2_383, %c54, %c0_384] : memref<3x80x128xf32, #tpu.memory_space<vmem>>, vector<1x16x128xf32>
    %533 = vector.shape_cast %532 : vector<1x16x128xf32> to vector<16x128xf32>
    %cst_385 = arith.constant 0.960317432 : f32
    %534 = vector.broadcast %cst_385 : f32 to vector<16x128xf32>
    %535 = arith.subf %533, %534 : vector<16x128xf32>
    %536 = arith.maximumf %516, %535 : vector<16x128xf32>
    %c2_386 = arith.constant 2 : index
    %c55 = arith.constant 55 : index
    %c0_387 = arith.constant 0 : index
    %537 = vector.load %arg3[%c2_386, %c55, %c0_387] : memref<3x80x128xf32, #tpu.memory_space<vmem>>, vector<1x16x128xf32>
    %538 = vector.shape_cast %537 : vector<1x16x128xf32> to vector<16x128xf32>
    %cst_388 = arith.constant 1.04960322 : f32
    %539 = vector.broadcast %cst_388 : f32 to vector<16x128xf32>
    %540 = arith.subf %538, %539 : vector<16x128xf32>
    %541 = arith.maximumf %521, %540 : vector<16x128xf32>
    %c2_389 = arith.constant 2 : index
    %c56 = arith.constant 56 : index
    %c0_390 = arith.constant 0 : index
    %542 = vector.load %arg3[%c2_389, %c56, %c0_390] : memref<3x80x128xf32, #tpu.memory_space<vmem>>, vector<1x16x128xf32>
    %543 = vector.shape_cast %542 : vector<1x16x128xf32> to vector<16x128xf32>
    %cst_391 = arith.constant 1.14285719 : f32
    %544 = vector.broadcast %cst_391 : f32 to vector<16x128xf32>
    %545 = arith.subf %543, %544 : vector<16x128xf32>
    %546 = arith.maximumf %526, %545 : vector<16x128xf32>
    %c2_392 = arith.constant 2 : index
    %c57 = arith.constant 57 : index
    %c0_393 = arith.constant 0 : index
    %547 = vector.load %arg3[%c2_392, %c57, %c0_393] : memref<3x80x128xf32, #tpu.memory_space<vmem>>, vector<1x16x128xf32>
    %548 = vector.shape_cast %547 : vector<1x16x128xf32> to vector<16x128xf32>
    %cst_394 = arith.constant 1.2400794 : f32
    %549 = vector.broadcast %cst_394 : f32 to vector<16x128xf32>
    %550 = arith.subf %548, %549 : vector<16x128xf32>
    %551 = arith.maximumf %531, %550 : vector<16x128xf32>
    %c2_395 = arith.constant 2 : index
    %c58 = arith.constant 58 : index
    %c0_396 = arith.constant 0 : index
    %552 = vector.load %arg3[%c2_395, %c58, %c0_396] : memref<3x80x128xf32, #tpu.memory_space<vmem>>, vector<1x16x128xf32>
    %553 = vector.shape_cast %552 : vector<1x16x128xf32> to vector<16x128xf32>
    %cst_397 = arith.constant 1.34126985 : f32
    %554 = vector.broadcast %cst_397 : f32 to vector<16x128xf32>
    %555 = arith.subf %553, %554 : vector<16x128xf32>
    %556 = arith.maximumf %536, %555 : vector<16x128xf32>
    %c2_398 = arith.constant 2 : index
    %c59 = arith.constant 59 : index
    %c0_399 = arith.constant 0 : index
    %557 = vector.load %arg3[%c2_398, %c59, %c0_399] : memref<3x80x128xf32, #tpu.memory_space<vmem>>, vector<1x16x128xf32>
    %558 = vector.shape_cast %557 : vector<1x16x128xf32> to vector<16x128xf32>
    %cst_400 = arith.constant 1.44642854 : f32
    %559 = vector.broadcast %cst_400 : f32 to vector<16x128xf32>
    %560 = arith.subf %558, %559 : vector<16x128xf32>
    %561 = arith.maximumf %541, %560 : vector<16x128xf32>
    %c2_401 = arith.constant 2 : index
    %c60 = arith.constant 60 : index
    %c0_402 = arith.constant 0 : index
    %562 = vector.load %arg3[%c2_401, %c60, %c0_402] : memref<3x80x128xf32, #tpu.memory_space<vmem>>, vector<1x16x128xf32>
    %563 = vector.shape_cast %562 : vector<1x16x128xf32> to vector<16x128xf32>
    %cst_403 = arith.constant 1.55555558 : f32
    %564 = vector.broadcast %cst_403 : f32 to vector<16x128xf32>
    %565 = arith.subf %563, %564 : vector<16x128xf32>
    %566 = arith.maximumf %546, %565 : vector<16x128xf32>
    %c2_404 = arith.constant 2 : index
    %c61 = arith.constant 61 : index
    %c0_405 = arith.constant 0 : index
    %567 = vector.load %arg3[%c2_404, %c61, %c0_405] : memref<3x80x128xf32, #tpu.memory_space<vmem>>, vector<1x16x128xf32>
    %568 = vector.shape_cast %567 : vector<1x16x128xf32> to vector<16x128xf32>
    %cst_406 = arith.constant 1.66865075 : f32
    %569 = vector.broadcast %cst_406 : f32 to vector<16x128xf32>
    %570 = arith.subf %568, %569 : vector<16x128xf32>
    %571 = arith.maximumf %551, %570 : vector<16x128xf32>
    %c2_407 = arith.constant 2 : index
    %c62 = arith.constant 62 : index
    %c0_408 = arith.constant 0 : index
    %572 = vector.load %arg3[%c2_407, %c62, %c0_408] : memref<3x80x128xf32, #tpu.memory_space<vmem>>, vector<1x16x128xf32>
    %573 = vector.shape_cast %572 : vector<1x16x128xf32> to vector<16x128xf32>
    %cst_409 = arith.constant 1.78571427 : f32
    %574 = vector.broadcast %cst_409 : f32 to vector<16x128xf32>
    %575 = arith.subf %573, %574 : vector<16x128xf32>
    %576 = arith.maximumf %556, %575 : vector<16x128xf32>
    %c2_410 = arith.constant 2 : index
    %c63 = arith.constant 63 : index
    %c0_411 = arith.constant 0 : index
    %577 = vector.load %arg3[%c2_410, %c63, %c0_411] : memref<3x80x128xf32, #tpu.memory_space<vmem>>, vector<1x16x128xf32>
    %578 = vector.shape_cast %577 : vector<1x16x128xf32> to vector<16x128xf32>
    %cst_412 = arith.constant 1.90674603 : f32
    %579 = vector.broadcast %cst_412 : f32 to vector<16x128xf32>
    %580 = arith.subf %578, %579 : vector<16x128xf32>
    %581 = arith.maximumf %561, %580 : vector<16x128xf32>
    %c2_413 = arith.constant 2 : index
    %c64 = arith.constant 64 : index
    %c0_414 = arith.constant 0 : index
    %582 = vector.load %arg3[%c2_413, %c64, %c0_414] : memref<3x80x128xf32, #tpu.memory_space<vmem>>, vector<1x16x128xf32>
    %583 = vector.shape_cast %582 : vector<1x16x128xf32> to vector<16x128xf32>
    %cst_415 = arith.constant 2.03174615 : f32
    %584 = vector.broadcast %cst_415 : f32 to vector<16x128xf32>
    %585 = arith.subf %583, %584 : vector<16x128xf32>
    %586 = arith.maximumf %566, %585 : vector<16x128xf32>
    %587 = arith.maximumf %586, %571 : vector<16x128xf32>
    %588 = arith.maximumf %587, %576 : vector<16x128xf32>
    %589 = arith.maximumf %588, %581 : vector<16x128xf32>
    %c2_416 = arith.constant 2 : index
    %c0_417 = arith.constant 0 : index
    %c0_418 = arith.constant 0 : index
    %590 = vector.load %arg2[%c2_416, %c0_417, %c0_418] : memref<3x16x128xf32, #tpu.memory_space<vmem>>, vector<1x16x128xf32>
    %591 = vector.shape_cast %590 : vector<1x16x128xf32> to vector<16x128xf32>
    %592 = vector.shape_cast %589 : vector<16x128xf32> to vector<1x16x128xf32>
    tpu.vector_store %arg2[%c2_416, %c0_417, %c0_418], %592 {strides = array<i32>} : memref<3x16x128xf32, #tpu.memory_space<vmem>>, vector<1x16x128xf32>,
    return
  }
  func.func @transform_0(%arg0: i32) -> (i32, i32, i32) {
    %c0_i32 = arith.constant 0 : i32
    %c0_i32_0 = arith.constant 0 : i32
    %c0_i32_1 = arith.constant 0 : i32
    return %c0_i32, %c0_i32_0, %arg0 : i32, i32, i32
  }
  func.func @transform_1(%arg0: i32) -> (i32, i32, i32) {
    %c0_i32 = arith.constant 0 : i32
    %c0_i32_0 = arith.constant 0 : i32
    %c0_i32_1 = arith.constant 0 : i32
    return %c0_i32, %c0_i32_0, %arg0 : i32, i32, i32
  }
}

</mosaic_0001>

<bundles_post_ra>
// kernel: _lambda_.2
= control target key start
LH: loop header
LB: loop body
LE: loop exit
PB: predicated region body
PF: predicated region fallthrough
CT: control target
= control target key end

     0   :  { %v847_v0 = vmov -10000.0   ;;  %s1257_s0 = inlined_call_operand.vmem [shape: f32[16,128], index: 0, kind: input, shape index: {}]   ;;  %s1258_s1 = inlined_call_operand.vmem [shape: f32[3,16,128], index: 1, kind: output, shape index: {}]  }
   0x1   :  { %12 = vst [vmem:[#allocation2] sm:$0xff] %v847_v0  ;;  %13 = vst [vmem:[#allocation2 + $0x8] sm:$0xff] %v847_v0  ;;  %v861_v1 = vld [vmem:[%s1257_s0] sm:$0xff]  ;;  %v866_v2 = vld [vmem:[%s1257_s0 + $0x8] sm:$0xff] }
   0x2   :  { %14 = vst [vmem:[#allocation2 + $0x10] sm:$0xff] %v847_v0  ;;  %15 = vst [vmem:[#allocation2 + $0x18] sm:$0xff] %v847_v0  ;;  %v873_v4 = vadd.f32 -2.6666667, %v861_v1  ;;  %v876_v5 = vadd.f32 -2.6666667, %v866_v2 }
   0x3   :  { %16 = vst [vmem:[#allocation2 + $0x30] sm:$0xff] %v847_v0  ;;  %17 = vst [vmem:[#allocation2 + $0x38] sm:$0xff] %v847_v0  ;;  %v879_v6 = vadd.f32 -0.53333336, %v861_v1  ;;  %v882_v7 = vadd.f32 -0.53333336, %v866_v2 }
   0x4   :  { %18 = vst [vmem:[#allocation2 + $0x40] sm:$0xff] %v847_v0  ;;  %19 = vst [vmem:[#allocation2 + $0x48] sm:$0xff] %v847_v0  ;;  %v907_v23 = vadd.f32 -0.12698413, %v866_v2 }
   0x5   :  { %22 = vst [vmem:[#allocation2 + $0x20] sm:$0xff] %v861_v1  ;;  %23 = vst [vmem:[#allocation2 + $0x28] sm:$0xff] %v866_v2 }
   0x6   :  { %1281 = vst [vmem:[#allocation7_spill] sm:$0xff] %v907_v23 }
   0x8   :  { %v289_v8 = vld [vmem:[#allocation2 + $0x1] sm:$0xff] }
   0x9   :  { %v870_v3 = vld [vmem:[#allocation2 + $0x9] sm:$0xff]  ;;  %v903_v19 = vadd.f32 -1.906746, %v289_v8  ;;  %v980_v21 = vld [vmem:[#allocation2 + $0x11] sm:$0xff] }
   0xa   :  { %v885_v9 = vadd.f32 -1.906746, %v870_v3  ;;  %v887_v10 = vld [vmem:[#allocation2 + $0xc] sm:$0xff]  ;;  %v293_v11 = vld [vmem:[#allocation2 + $0x2] sm:$0xff]  ;;  %1284 = vst [vmem:[#allocation10_spill] sm:$0xff] %v980_v21 }
   0xb   :  { %v889_v12 = vld [vmem:[#allocation2 + $0xa] sm:$0xff]  ;;  %v892_v13 = vadd.f32 -1.5555556, %v887_v10  ;;  %v909_v24 = vadd.f32 -1.7857143, %v293_v11 }
   0xc   :  { %1277 = vst [vmem:[#allocation3_spill] sm:$0xff] %v885_v9  ;;  %v894_v14 = vld [vmem:[#allocation2 + $0xd] sm:$0xff]  ;;  %v297_v15 = vld [vmem:[#allocation2 + $0x3] sm:$0xff]  ;;  %v912_v25 = vadd.f32 -1.7857143, %v889_v12  ;;  %v916_v27 = vld [vmem:[#allocation2 + $0x19] sm:$0xff] }
   0xd   :  { %1278 = vst [vmem:[#allocation4_spill] sm:$0xff] %v892_v13  ;;  %v896_v16 = vld [vmem:[#allocation2 + $0xb] sm:$0xff]  ;;  %v899_v17 = vadd.f32 -1.4464285, %v894_v14  ;;  %v918_v28 = vadd.f32 -1.6686507, %v297_v15 }
   0xe   :  { %v901_v18 = vld [vmem:[#allocation2 + $0xe] sm:$0xff]  ;;  %v301_v20 = vld [vmem:[#allocation2 + $0x4] sm:$0xff]  ;;  %1282 = vst [vmem:[#allocation8_spill] sm:$0xff] %v912_v25  ;;  %v921_v29 = vadd.f32 -1.6686507, %v896_v16  ;;  %v932_v34 = vld [vmem:[#allocation2 + $0x1a] sm:$0xff] }
   0xf   :  { %1279 = vst [vmem:[#allocation5_spill] sm:$0xff] %v899_v17  ;;  %1280 = vst [vmem:[#allocation6_spill] sm:$0xff] %v901_v18  ;;  %v307_v22 = vld [vmem:[#allocation2 + $0x5] sm:$0xff]  ;;  %v924_v30 = vadd.f32 -1.3412699, %v901_v18  ;;  %v625_v37 = vadd.f32 -1.5, %v932_v34 }
  0x10   :  { %v926_v31 = vadd.f32 -1.5555556, %v301_v20  ;;  %v928_v32 = vadd.f32 -1.4464285, %v307_v22  ;;  %v930_v33 = vld [vmem:[#allocation2 + $0x21] sm:$0xff]  ;;  %v1012_v25 = vld [vmem:[#allocation2 + $0x15] sm:$0xff] }
  0x11   :  { %1283 = vst [vmem:[#allocation9_spill] sm:$0xff] %v924_v30  ;;  %v623_v35 = vadd.f32 -2.0416667, %v916_v27  ;;  %v935_v36 = vld [vmem:[#allocation2 + $0x22] sm:$0xff]  ;;  %v637_v60 = vadd.f32 -0.041666668, %v930_v33 }
  0x12   :  { %v938_v38 = vld [vmem:[#allocation2 + $0x1b] sm:$0xff]  ;;  %v942_v40 = vld [vmem:[#allocation2 + $0x23] sm:$0xff]  ;;  %v639_v8 = vadd.f32 -0.16666667, %v935_v36  ;;  %v624_v51 = vadd.f32 -2.0416667, %v930_v33 }
  0x13   :  { %v940_v39 = vld [vmem:[#allocation2 + $0x1c] sm:$0xff]  ;;  %v627_v41 = vadd.f32 -1.0416666, %v938_v38  ;;  %v945_v42 = vld [vmem:[#allocation2 + $0x24] sm:$0xff]  ;;  %v641_v61 = vadd.f32 -0.375, %v942_v40  ;;  %1288 = vst [vmem:[#allocation14_spill] sm:$0xff] %v1012_v25 }
  0x14   :  { %v629_v43 = vadd.f32 -0.6666667, %v940_v39  ;;  %v948_v44 = vld [vmem:[#allocation2 + $0x1d] sm:$0xff]  ;;  %v630_v45 = vadd.f32 -0.6666667, %v945_v42  ;;  %v951_v46 = vld [vmem:[#allocation2 + $0x25] sm:$0xff] }
  0x15   :  { %v631_v47 = vadd.f32 -0.375, %v948_v44  ;;  %v954_v48 = vld [vmem:[#allocation2 + $0x1e] sm:$0xff]  ;;  %v956_v49 = vld [vmem:[#allocation2 + $0x26] sm:$0xff]  ;;  %v632_v53 = vadd.f32 -0.375, %v951_v46  ;;  %v644_v20 = vadd.f32 -1.0416666, %v951_v46 }
  0x16   :  { %v44_v52 = vmax.f32 %v629_v43, -10002.667  ;;  %v633_v54 = vadd.f32 -0.16666667, %v954_v48  ;;  %v634_v55 = vadd.f32 -0.16666667, %v956_v49 }
  0x17   :  { %v964_v56 = vld [vmem:[#allocation2 + $0x1f] sm:$0xff]  ;;  %v50_v57 = vmax.f32 %v623_v35, %v631_v47  ;;  %v966_v58 = vld [vmem:[#allocation2 + $0x27] sm:$0xff]  ;;  %v646_v22 = vadd.f32 -1.5, %v956_v49  ;;  %v654_v9 = vadd.f32 -1.875, %v980_v21  ;;  %v1016_v13 = vld [vmem:[#allocation2 + $0x16] sm:$0xff] }
  0x18   :  { %v635_v59 = vadd.f32 -0.041666668, %v964_v56  ;;  %v56_v62 = vmax.f32 %v625_v37, %v633_v54  ;;  %v636_v63 = vadd.f32 -0.041666668, %v966_v58  ;;  %v65_v0 = vmax.f32 %v44_v52, %v861_v1  ;;  %1289 = vst [vmem:[#allocation15_spill] sm:$0xff] %v1016_v13  ;;  %v313_v18 = vld [vmem:[#allocation2 + $0x6] sm:$0xff] }
  0x19   :  { %v70_v15 = vmax.f32 %v50_v57, %v637_v60  ;;  %v648_v47 = vadd.f32 -2.0416667, %v966_v58  ;;  %v626_v54 = vadd.f32 -1.5, %v935_v36  ;;  %v628_v52 = vadd.f32 -1.0416666, %v942_v40 }
  0x1a   :  { %v62_v11 = vmax.f32 %v627_v41, %v635_v59  ;;  %v75_v35 = vmax.f32 %v56_v62, %v639_v8  ;;  %v84_v43 = vmax.f32 %v65_v0, %v630_v45  ;;  %v45_v59 = vmax.f32 %v873_v4, %v630_v45  ;;  %v984_v62 = vld [vmem:[#allocation2 + $0x29] sm:$0xff] }
  0x1b   :  { %v89_v37 = vmax.f32 %v70_v15, %v644_v20  ;;  %v51_v60 = vmax.f32 %v624_v51, %v632_v53  ;;  %v57_v8 = vmax.f32 %v626_v54, %v634_v55  ;;  %v63_v50 = vmax.f32 %v628_v52, %v636_v63  ;;  %v989_v15 = vld [vmem:[#allocation2 + $0x2b] sm:$0xff] }
  0x1c   :  { %v80_v26 = vmax.f32 %v62_v11, %v641_v61  ;;  %v94_v41 = vmax.f32 %v75_v35, %v646_v22  ;;  %v104_v57 = vmax.f32 %v84_v43, %v876_v5  ;;  %v638_v61 = vadd.f32 -0.041666668, %v984_v62  ;;  %v987_v11 = vld [vmem:[#allocation2 + $0x2a] sm:$0xff]  ;;  %v1005_v43 = vld [vmem:[#allocation2 + $0x12] sm:$0xff] }
  0x1d   :  { %v991_v20 = vld [vmem:[#allocation2 + $0x2c] sm:$0xff]  ;;  %v66_v22 = vmax.f32 %v45_v59, %v866_v2  ;;  %v640_v5 = vadd.f32 -0.16666667, %v987_v11  ;;  %v642_v4 = vadd.f32 -0.375, %v989_v15  ;;  %1285 = vst [vmem:[#allocation11_spill] sm:$0xff] %v1005_v43 }
  0x1e   :  { %v99_v0 = vmax.f32 %v80_v26, %v648_v47  ;;  %v106_v30 = vmax.f32 %v104_v57, %v89_v37  ;;  %v996_v45 = vld [vmem:[#allocation2 + $0x2d] sm:$0xff]  ;;  %v71_v53 = vmax.f32 %v51_v60, %v638_v61  ;;  %v643_v55 = vadd.f32 -0.6666667, %v991_v20 }
  0x1f   :  { %v998_v26 = vld [vmem:[#allocation2 + $0x2e] sm:$0xff]  ;;  %v645_v63 = vadd.f32 -1.0416666, %v996_v45  ;;  %v76_v54 = vmax.f32 %v57_v8, %v640_v5  ;;  %v81_v52 = vmax.f32 %v63_v50, %v642_v4  ;;  %v305_v23 = vmax.f32 %v926_v31, -10002.032  ;;  %v1020_v8 = vld [vmem:[#allocation2 + $0x17] sm:$0xff] }
  0x20   :  { %v1000_v51 = vld [vmem:[#allocation2 + $0x2f] sm:$0xff]  ;;  %v647_v35 = vadd.f32 -1.5, %v998_v26  ;;  %v108_v37 = vmax.f32 %v106_v30, %v94_v41  ;;  %v85_v61 = vmax.f32 %v66_v22, %v643_v55  ;;  %v656_v50 = vadd.f32 -1.6333333, %v1005_v43 }
  0x21   :  { %v1007_v47 = vld [vmem:[#allocation2 + $0x14] sm:$0xff]  ;;  %v649_v57 = vadd.f32 -2.0416667, %v1000_v51  ;;  %v90_v17 = vmax.f32 %v71_v53, %v645_v63  ;;  %v662_v22 = vadd.f32 -1.0083333, %v1012_v25 }
  0x22   :  { %1286 = vst [vmem:[#allocation12_spill] sm:$0xff] %v1007_v47  ;;  %v1010_v59 = vld [vmem:[#allocation2 + $0x13] sm:$0xff]  ;;  %v110_v30 = vmax.f32 %v108_v37, %v99_v0  ;;  %v95_v41 = vmax.f32 %v76_v54, %v647_v35  ;;  %v105_v5 = vmax.f32 %v85_v61, -10002.667  ;;  %v660_v60 = vadd.f32 -1.2, %v1007_v47 }
  0x23   :  { %1287 = vst [vmem:[#allocation13_spill] sm:$0xff] %v1010_v59  ;;  %v658_v4 = vadd.f32 -1.4083333, %v1010_v59  ;;  %v100_v53 = vmax.f32 %v81_v52, %v649_v57  ;;  %v663_v31 = vadd.f32 -1.0083333, %v948_v44  ;;  %v140_v37 = vmax.f32 %v654_v9, %v662_v22  ;;  %v319_v61 = vld [vmem:[#allocation2 + $0x7] sm:$0xff] }
  0x24   :  { %112 = vst [vmem:[%s1258_s1] sm:$0xff] %v110_v30  ;;  %v664_v0 = vadd.f32 -0.8333333, %v1016_v13  ;;  %v665_v55 = vadd.f32 -0.8333333, %v954_v48  ;;  %v107_v63 = vmax.f32 %v105_v5, %v90_v17  ;;  %v134_v35 = vmax.f32 %v660_v60, -10002.134 }
  0x25   :  { %v666_v54 = vadd.f32 -0.675, %v1020_v8  ;;  %v1290_v47 = vmax.f32 %v866_v2, -10002.134  ;;  %v667_v59 = vadd.f32 -0.675, %v964_v56  ;;  %v311_v17 = vmax.f32 %v903_v19, %v928_v32 }
  0x26   :  { %v146_v21 = vmax.f32 %v656_v50, %v664_v0  ;;  %v670_v52 = vadd.f32 -0.40833333, %v916_v27  ;;  %v1036_v57 = vadd.f32 -1.3412699, %v313_v18  ;;  %v109_v30 = vmax.f32 %v107_v63, %v95_v41 }
  0x27   :  { %v147_v25 = vmax.f32 %v663_v31, %v1290_v47  ;;  %v152_v13 = vmax.f32 %v658_v4, %v666_v54  ;;  %v157_v43 = vmax.f32 %v134_v35, -10000.533  ;;  %v672_v5 = vadd.f32 -0.3, %v932_v34 }
  0x28   :  { %v162_v60 = vmax.f32 %v140_v37, %v670_v52  ;;  %v1041_v22 = vadd.f32 -1.2400794, %v319_v61  ;;  %v111_v47 = vmax.f32 %v109_v30, %v100_v53  ;;  %v674_v50 = vadd.f32 -0.20833333, %v938_v38 }
  0x29   :  { %v153_v9 = vmax.f32 %v665_v55, %v147_v25  ;;  %v676_v31 = vadd.f32 -0.13333334, %v940_v39  ;;  %v735_v18 = vadd.f32 -1.0496032, %v870_v3  ;;  %v167_v41 = vmax.f32 %v146_v21, %v672_v5 }
  0x2a   :  { %v678_v4 = vadd.f32 -0.075, %v948_v44  ;;  %113 = vst [vmem:[%s1258_s1 + $0x8] sm:$0xff] %v111_v47  ;;  %v671_v19 = vadd.f32 -0.40833333, %v930_v33  ;;  %v172_v25 = vmax.f32 %v152_v13, %v674_v50 }
  0x2b   :  { %v158_v0 = vmax.f32 %v667_v59, %v153_v9  ;;  %v177_v32 = vmax.f32 %v157_v43, %v676_v31  ;;  %v680_v53 = vadd.f32 -0.033333335, %v954_v48  ;;  %v677_v63 = vadd.f32 -0.13333334, %v945_v42 }
  0x2c   :  { %v182_v35 = vmax.f32 %v162_v60, %v678_v4  ;;  %v682_v3 = vadd.f32 -0.008333334, %v964_v56  ;;  %v1054_v59 = vmax.f32 %v305_v23, -10001.143  ;;  %v684_v54 = vadd.f32 -0.008333334, %v930_v33 }
  0x2d   :  { %v163_v55 = vmax.f32 %v158_v0, -10000.533  ;;  %v187_v21 = vmax.f32 %v167_v41, %v680_v53  ;;  %v195_v37 = vmax.f32 %v177_v32, %v861_v1  ;;  %v673_v13 = vadd.f32 -0.3, %v935_v36 }
  0x2e   :  { %v192_v43 = vmax.f32 %v172_v25, %v682_v3  ;;  %v686_v52 = vadd.f32 -0.033333335, %v935_v36  ;;  %v737_v30 = vadd.f32 -0.96031743, %v889_v12  ;;  %v1063_v9 = vadd.f32 -0.7936508, %v887_v10 }
  0x2f   :  { %v168_v61 = vmax.f32 %v879_v6, %v163_v55  ;;  %v200_v60 = vmax.f32 %v182_v35, %v684_v54  ;;  %v688_v23 = vadd.f32 -0.075, %v942_v40  ;;  %v675_v47 = vadd.f32 -0.20833333, %v942_v40 }
  0x30   :  { %v205_v50 = vmax.f32 %v187_v21, %v686_v52  ;;  %v214_v31 = vmax.f32 %v195_v37, %v677_v63  ;;  %v1068_v6 = vadd.f32 -0.71626985, %v894_v14  ;;  %v691_v41 = vadd.f32 -0.20833333, %v951_v46 }
  0x31   :  { %v173_v5 = vmax.f32 %v671_v19, %v168_v61  ;;  %v210_v0 = vmax.f32 %v192_v43, %v688_v23  ;;  %v693_v4 = vadd.f32 -0.3, %v956_v49  ;;  %v1291_v12 = vmax.f32 %v921_v29, -10000.508 }
  0x32   :  { %v695_v32 = vadd.f32 -0.40833333, %v966_v58  ;;  %v317_v19 = vmax.f32 %v909_v24, %v1036_v57  ;;  %v219_v53 = vmax.f32 %v200_v60, %v691_v41  ;;  %v234_v14 = vmax.f32 %v214_v31, %v882_v7 }
  0x33   :  { %v339_v10 = vmax.f32 %v866_v2, %v1291_v12  ;;  %v178_v25 = vmax.f32 %v673_v13, %v173_v5  ;;  %v224_v55 = vmax.f32 %v205_v50, %v693_v4  ;;  %v699_v35 = vadd.f32 -0.675, %v984_v62 }
  0x34   :  { %v229_v21 = vmax.f32 %v210_v0, %v695_v32  ;;  %v701_v37 = vadd.f32 -0.8333333, %v987_v11  ;;  %v703_v29 = vadd.f32 -1.0083333, %v989_v15  ;;  %v705_v2 = vadd.f32 -1.2, %v991_v20 }
  0x35   :  { %v183_v3 = vmax.f32 %v675_v47, %v178_v25  ;;  %v239_v54 = vmax.f32 %v219_v53, %v699_v35  ;;  %v707_v61 = vadd.f32 -1.4083333, %v996_v45  ;;  %v333_v13 = vmax.f32 %v311_v17, %v735_v18  ;;  %v320_v18 = vld [vmem:[#allocation2 + $0xf] sm:$0xff] }
  0x36   :  { %v679_v24 = vadd.f32 -0.075, %v951_v46  ;;  %v323_v7 = vmax.f32 %v918_v28, %v1041_v22  ;;  %v348_v57 = vmax.f32 %v1054_v59, %v1063_v9  ;;  %v244_v52 = vmax.f32 %v224_v55, %v701_v37  ;;  %v1293_v37 = vld [vmem:[#allocation6_spill] sm:$0xff] }
  0x37   :  { %v188_v43 = vmax.f32 %v677_v63, %v183_v3  ;;  %v254_v60 = vmax.f32 %v234_v14, %v705_v2  ;;  %v709_v23 = vadd.f32 -1.6333333, %v998_v26  ;;  %v338_v5 = vmax.f32 %v317_v19, %v737_v30  ;;  %v1292_v3 = vld [vmem:[#allocation11_spill] sm:$0xff] }
  0x38   :  { %v681_v50 = vadd.f32 -0.033333335, %v956_v49  ;;  %v249_v31 = vmax.f32 %v229_v21, %v703_v29  ;;  %v711_v17 = vadd.f32 -1.875, %v1000_v51  ;;  %v1093_v63 = vadd.f32 -1.2, %v940_v39 }
  0x39   :  { %v193_v47 = vmax.f32 %v679_v24, %v188_v43  ;;  %v259_v0 = vmax.f32 %v239_v54, %v707_v61  ;;  %v274_v28 = vmax.f32 %v254_v60, -10002.134  ;;  %v353_v22 = vmax.f32 %v333_v13, %v1068_v6 }
  0x3a   :  { %v683_v9 = vadd.f32 -0.008333334, %v966_v58  ;;  %v685_v41 = vadd.f32 -0.008333334, %v984_v62  ;;  %v687_v30 = vadd.f32 -0.033333335, %v987_v11  ;;  %v264_v12 = vmax.f32 %v244_v52, %v709_v23 }
  0x3b   :  { %v196_v59 = vmax.f32 %v681_v50, %v193_v47  ;;  %v689_v4 = vadd.f32 -0.075, %v989_v15  ;;  %v276_v25 = vmax.f32 %v274_v28, %v259_v0  ;;  %v732_v32 = vadd.f32 -1.2400794, %v320_v18  ;;  %v1294_v52 = vld [vmem:[#allocation13_spill] sm:$0xff]  ;;  %v1296_v0 = vld [vmem:[#allocation14_spill] sm:$0xff] }
  0x3c   :  { %v690_v53 = vadd.f32 -0.13333334, %v991_v20  ;;  %v269_v55 = vmax.f32 %v249_v31, %v711_v17  ;;  %v739_v14 = vadd.f32 -0.875, %v896_v16  ;;  %v738_v21 = vadd.f32 -0.96031743, %v1292_v3  ;;  %v1295_v31 = vld [vmem:[#allocation10_spill] sm:$0xff] }
  0x3d   :  { %v201_v19 = vmax.f32 %v683_v9, %v196_v59  ;;  %v278_v35 = vmax.f32 %v276_v25, %v264_v12  ;;  %v344_v6 = vmax.f32 %v732_v32, %v339_v10  ;;  %v745_v29 = vadd.f32 -0.64285713, %v1293_v37  ;;  %v1297_v12 = vld [vmem:[#allocation15_spill] sm:$0xff] }
  0x3e   :  { %v692_v2 = vadd.f32 -0.20833333, %v996_v45  ;;  %v343_v61 = vmax.f32 %v323_v7, %v739_v14  ;;  %v747_v13 = vadd.f32 -0.5734127, %v320_v18  ;;  %v740_v60 = vadd.f32 -0.875, %v1294_v52 }
  0x3f   :  { %v206_v54 = vmax.f32 %v685_v41, %v201_v19  ;;  %v280_v43 = vmax.f32 %v278_v35, %v269_v55  ;;  %v354_v24 = vmax.f32 %v738_v21, %v344_v6  ;;  %v358_v23 = vmax.f32 %v338_v5, %v745_v29  ;;  %v1298_v19 = vld [vmem:[#allocation12_spill] sm:$0xff] }
  0x40   :  { %v694_v50 = vadd.f32 -0.3, %v998_v26  ;;  %v363_v16 = vmax.f32 %v343_v61, %v747_v13  ;;  %v751_v10 = vadd.f32 -0.44642857, %v1295_v31  ;;  %v744_v28 = vadd.f32 -0.71626985, %v1296_v0 }
  0x41   :  { %v211_v47 = vmax.f32 %v687_v30, %v206_v54  ;;  %715 = vst [vmem:[%s1258_s1 + $0x10] sm:$0xff] %v280_v43  ;;  %v359_v17 = vmax.f32 %v740_v60, %v354_v24  ;;  %v368_v7 = vmax.f32 %v348_v57, -10000.508  ;;  %v753_v18 = vadd.f32 -0.3888889, %v1292_v3 }
  0x42   :  { %v696_v9 = vadd.f32 -0.40833333, %v1000_v51  ;;  %v373_v5 = vmax.f32 %v353_v22, %v751_v10  ;;  %v755_v41 = vadd.f32 -0.33531746, %v1294_v52  ;;  %v746_v25 = vadd.f32 -0.64285713, %v1297_v12 }
  0x43   :  { %v215_v59 = vmax.f32 %v689_v4, %v211_v47  ;;  %v364_v30 = vmax.f32 %v744_v28, %v359_v17  ;;  %v378_v32 = vmax.f32 %v358_v23, %v753_v18  ;;  %v757_v55 = vadd.f32 -0.2857143, %v1298_v19 }
  0x44   :  { %v655_v35 = vadd.f32 -1.875, %v916_v27  ;;  %v383_v6 = vmax.f32 %v363_v16, %v755_v41  ;;  %v759_v57 = vadd.f32 -0.24007936, %v1296_v0  ;;  %v748_v4 = vadd.f32 -0.5734127, %v1020_v8 }
  0x45   :  { %v220_v14 = vmax.f32 %v690_v53, %v215_v59  ;;  %v374_v21 = vmax.f32 %v746_v25, %v364_v30  ;;  %v388_v3 = vmax.f32 %v368_v7, %v757_v55  ;;  %v761_v22 = vadd.f32 -0.1984127, %v1297_v12 }
  0x46   :  { %v657_v29 = vadd.f32 -1.6333333, %v932_v34  ;;  %v393_v54 = vmax.f32 %v373_v5, %v759_v57  ;;  %v763_v61 = vadd.f32 -0.16071428, %v1020_v8  ;;  %v752_v53 = vadd.f32 -0.44642857, %v916_v27 }
  0x47   :  { %v225_v37 = vmax.f32 %v692_v2, %v220_v14  ;;  %v379_v13 = vmax.f32 %v748_v4, %v374_v21  ;;  %v398_v43 = vmax.f32 %v378_v32, %v761_v22  ;;  %v767_v24 = vadd.f32 -0.097222224, %v916_v27  ;;  %v1140_v57 = vld [vmem:[#allocation2 + $0x31] sm:$0xff] }
  0x48   :  { %v403_v60 = vmax.f32 %v383_v6, %v763_v61  ;;  %v408_v23 = vmax.f32 %v388_v3, -10000.127  ;;  %v769_v47 = vadd.f32 -0.071428575, %v932_v34  ;;  %v754_v10 = vadd.f32 -0.3888889, %v932_v34 }
  0x49   :  { %v230_v52 = vmax.f32 %v694_v50, %v225_v37  ;;  %v384_v16 = vmax.f32 %v752_v53, %v379_v13  ;;  %v413_v2 = vmax.f32 %v393_v54, %v767_v24  ;;  %v771_v17 = vadd.f32 -0.049603175, %v938_v38 }
  0x4a   :  { %v659_v8 = vadd.f32 -1.4083333, %v938_v38  ;;  %v418_v28 = vmax.f32 %v398_v43, %v769_v47  ;;  %v773_v7 = vadd.f32 -0.031746034, %v940_v39  ;;  %v756_v27 = vadd.f32 -0.33531746, %v938_v38 }
  0x4b   :  { %v235_v0 = vmax.f32 %v696_v9, %v230_v52  ;;  %v389_v18 = vmax.f32 %v754_v10, %v384_v16  ;;  %v423_v50 = vmax.f32 %v403_v60, %v771_v17  ;;  %v775_v59 = vadd.f32 -0.017857144, %v948_v44  ;;  %v1157_v17 = vld [vmem:[#allocation2 + $0x33] sm:$0xff] }
  0x4c   :  { %v135_v41 = vmax.f32 %v1093_v63, -10002.134  ;;  %v428_v30 = vmax.f32 %v408_v23, %v773_v7  ;;  %v777_v34 = vadd.f32 -0.007936508, %v954_v48  ;;  %v758_v9 = vadd.f32 -0.2857143, %v940_v39 }
  0x4d   :  { %v240_v5 = vmax.f32 %v655_v35, %v235_v0  ;;  %v394_v12 = vmax.f32 %v756_v27, %v389_v18  ;;  %v433_v25 = vmax.f32 %v413_v2, %v775_v59  ;;  %v779_v32 = vadd.f32 -0.001984127, %v964_v56  ;;  %v1142_v35 = vld [vmem:[#allocation2 + $0x32] sm:$0xff] }
  0x4e   :  { %v1137_v14 = vadd.f32 -0.031746034, %v945_v42  ;;  %v438_v38 = vmax.f32 %v418_v28, %v777_v34  ;;  %v446_v6 = vmax.f32 %v428_v30, %v861_v1  ;;  %v760_v21 = vadd.f32 -0.24007936, %v948_v44  ;;  %v1299_v28 = vld [vmem:[#allocation7_spill] sm:$0xff] }
  0x4f   :  { %v245_v55 = vmax.f32 %v657_v29, %v240_v5  ;;  %v399_v63 = vmax.f32 %v758_v9, %v394_v12  ;;  %v443_v4 = vmax.f32 %v423_v50, %v779_v32  ;;  %v781_v39 = vadd.f32 -0.001984127, %v930_v33  ;;  %v1162_v59 = vld [vmem:[#allocation2 + $0x34] sm:$0xff] }
  0x50   :  { %v700_v22 = vadd.f32 -0.675, %v1140_v57  ;;  %v783_v37 = vadd.f32 -0.007936508, %v935_v36  ;;  %v785_v42 = vadd.f32 -0.017857144, %v942_v40  ;;  %v465_v44 = vmax.f32 %v446_v6, %v1137_v14 }
  0x51   :  { %v250_v3 = vmax.f32 %v659_v8, %v245_v55  ;;  %v702_v29 = vadd.f32 -0.8333333, %v1142_v35  ;;  %v404_v54 = vmax.f32 %v760_v21, %v399_v63  ;;  %v762_v61 = vadd.f32 -0.1984127, %v954_v48 }
  0x52   :  { %v451_v13 = vmax.f32 %v433_v25, %v781_v39  ;;  %v456_v43 = vmax.f32 %v438_v38, %v783_v37  ;;  %v461_v24 = vmax.f32 %v443_v4, %v785_v42  ;;  %v764_v60 = vadd.f32 -0.16071428, %v964_v56  ;;  %v1168_v25 = vld [vmem:[#allocation2 + $0x35] sm:$0xff] }
  0x53   :  { %v255_v53 = vmax.f32 %v135_v41, %v250_v3  ;;  %v409_v52 = vmax.f32 %v762_v61, %v404_v54  ;;  %v788_v23 = vadd.f32 -0.049603175, %v951_v46  ;;  %v790_v47 = vadd.f32 -0.071428575, %v956_v49  ;;  %v1172_v4 = vld [vmem:[#allocation2 + $0x36] sm:$0xff] }
  0x54   :  { %v766_v10 = vadd.f32 -0.12698413, %v861_v1  ;;  %v792_v2 = vadd.f32 -0.097222224, %v966_v58  ;;  %v485_v7 = vmax.f32 %v465_v44, %v1299_v28  ;;  %v704_v27 = vadd.f32 -1.0083333, %v1157_v17 }
  0x55   :  { %v260_v16 = vmax.f32 %v700_v22, %v255_v53  ;;  %v414_v48 = vmax.f32 %v764_v60, %v409_v52  ;;  %v470_v0 = vmax.f32 %v451_v13, %v788_v23  ;;  %v475_v8 = vmax.f32 %v456_v43, %v790_v47  ;;  %v1180_v53 = vld [vmem:[#allocation2 + $0x37] sm:$0xff] }
  0x56   :  { %v480_v56 = vmax.f32 %v461_v24, %v792_v2  ;;  %v796_v50 = vadd.f32 -0.16071428, %v984_v62  ;;  %v798_v1 = vadd.f32 -0.1984127, %v987_v11  ;;  %v800_v41 = vadd.f32 -0.24007936, %v989_v15 }
  0x57   :  { %v265_v18 = vmax.f32 %v702_v29, %v260_v16  ;;  %v419_v5 = vmax.f32 %v414_v48, -10000.127  ;;  %v706_v34 = vadd.f32 -1.2, %v1162_v59  ;;  %v802_v9 = vadd.f32 -0.2857143, %v991_v20 }
  0x58   :  { %v490_v12 = vmax.f32 %v470_v0, %v796_v50  ;;  %v768_v55 = vadd.f32 -0.097222224, %v930_v33  ;;  %v495_v38 = vmax.f32 %v475_v8, %v798_v1  ;;  %v500_v6 = vmax.f32 %v480_v56, %v800_v41  ;;  %v1300_v16 = vld [vmem:[#allocation4_spill] sm:$0xff] }
  0x59   :  { %v270_v30 = vmax.f32 %v704_v27, %v265_v18  ;;  %v424_v32 = vmax.f32 %v766_v10, %v419_v5  ;;  %v708_v21 = vadd.f32 -1.4083333, %v1168_v25  ;;  %v505_v39 = vmax.f32 %v485_v7, %v802_v9  ;;  %v1191_v7 = vld [vmem:[#allocation2 + $0x39] sm:$0xff] }
  0x5a   :  { %v804_v3 = vadd.f32 -0.33531746, %v996_v45  ;;  %v770_v37 = vadd.f32 -0.071428575, %v935_v36  ;;  %v806_v42 = vadd.f32 -0.3888889, %v998_v26 }
  0x5b   :  { %v275_v63 = vmax.f32 %v706_v34, %v270_v30  ;;  %v429_v22 = vmax.f32 %v768_v55, %v424_v32  ;;  %v808_v29 = vadd.f32 -0.44642857, %v1000_v51  ;;  %v710_v33 = vadd.f32 -1.6333333, %v1172_v4  ;;  %v1196_v5 = vld [vmem:[#allocation2 + $0x3a] sm:$0xff] }
  0x5c   :  { %v772_v61 = vadd.f32 -0.049603175, %v942_v40  ;;  %v510_v13 = vmax.f32 %v490_v12, %v804_v3  ;;  %v515_v24 = vmax.f32 %v495_v38, %v806_v42  ;;  %v812_v52 = vadd.f32 -0.5734127, %v1140_v57  ;;  %v1198_v1 = vld [vmem:[#allocation2 + $0x3b] sm:$0xff] }
  0x5d   :  { %v277_v54 = vmax.f32 %v275_v63, %v708_v21  ;;  %v434_v43 = vmax.f32 %v770_v37, %v429_v22  ;;  %v520_v44 = vmax.f32 %v500_v6, %v808_v29  ;;  %v712_v36 = vadd.f32 -1.875, %v1180_v53  ;;  %v1200_v30 = vld [vmem:[#allocation2 + $0x3c] sm:$0xff] }
  0x5e   :  { %v525_v23 = vmax.f32 %v505_v39, -10000.508  ;;  %v814_v47 = vadd.f32 -0.64285713, %v1142_v35  ;;  %v1301_v10 = vmax.f32 %v1300_v16, -10002.032  ;;  %v530_v40 = vmax.f32 %v510_v13, %v812_v52 }
  0x5f   :  { %v279_v60 = vmax.f32 %v277_v54, %v710_v33  ;;  %v439_v48 = vmax.f32 %v772_v61, %v434_v43  ;;  %v816_v0 = vadd.f32 -0.71626985, %v1157_v17  ;;  %v736_v8 = vadd.f32 -1.0496032, %v1295_v31  ;;  %v1210_v55 = vld [vmem:[#allocation2 + $0x3d] sm:$0xff]  ;;  %v1302_v52 = vld [vmem:[#allocation3_spill] sm:$0xff] }
  0x60   :  { %v1187_v2 = vmax.f32 %v1301_v10, -10001.143  ;;  %v535_v18 = vmax.f32 %v515_v24, %v814_v47  ;;  %v818_v27 = vadd.f32 -0.7936508, %v1162_v59  ;;  %v776_v50 = vadd.f32 -0.017857144, %v951_v46 }
  0x61   :  { %v281_v28 = vmax.f32 %v279_v60, %v712_v36  ;;  %v444_v56 = vmax.f32 %v1137_v14, %v439_v48  ;;  %v540_v41 = vmax.f32 %v520_v44, %v816_v0  ;;  %v820_v34 = vadd.f32 -0.875, %v1168_v25  ;;  %v1213_v63 = vld [vmem:[#allocation2 + $0x3e] sm:$0xff] }
  0x62   :  { %v778_v31 = vadd.f32 -0.007936508, %v956_v49  ;;  %v545_v12 = vmax.f32 %v525_v23, %v818_v27  ;;  %v822_v14 = vadd.f32 -0.96031743, %v1172_v4  ;;  %v824_v46 = vadd.f32 -1.0496032, %v1180_v53 }
  0x63   :  { %716 = vst [vmem:[%s1258_s1 + $0x18] sm:$0xff] %v281_v28  ;;  %v447_v9 = vmax.f32 %v776_v50, %v444_v56  ;;  %v780_v32 = vadd.f32 -0.001984127, %v966_v58  ;;  %v550_v38 = vmax.f32 %v530_v40, %v820_v34  ;;  %v828_v6 = vadd.f32 -1.2400794, %v1191_v7  ;;  %v557_v37 = vld [vmem:[#allocation2 + $0x3f] sm:$0xff] }
  0x64   :  { %v555_v21 = vmax.f32 %v535_v18, %v822_v14  ;;  %v560_v39 = vmax.f32 %v540_v41, %v824_v46  ;;  %v565_v3 = vmax.f32 %v545_v12, -10001.143  ;;  %v830_v49 = vadd.f32 -1.3412699, %v1196_v5  ;;  %v1303_v60 = vld [vmem:[#allocation5_spill] sm:$0xff] }
  0x65   :  { %v452_v22 = vmax.f32 %v778_v31, %v447_v9  ;;  %v570_v42 = vmax.f32 %v550_v38, %v828_v6  ;;  %v832_v29 = vadd.f32 -1.4464285, %v1198_v1  ;;  %v834_v54 = vadd.f32 -1.5555556, %v1200_v30 }
  0x66   :  { %v1219_v58 = vadd.f32 -0.7936508, %v1298_v19  ;;  %v782_v33 = vadd.f32 -0.001984127, %v984_v62  ;;  %v575_v61 = vmax.f32 %v555_v21, %v830_v49  ;;  %v836_v13 = vadd.f32 -1.6686507, %v1210_v55 }
  0x67   :  { %v457_v43 = vmax.f32 %v780_v32, %v452_v22  ;;  %v585_v24 = vmax.f32 %v565_v3, %v834_v54  ;;  %v838_v44 = vadd.f32 -1.7857143, %v1213_v63  ;;  %v1304_v36 = vmax.f32 %v1302_v52, %v1303_v60 }
  0x68   :  { %v784_v47 = vadd.f32 -0.007936508, %v987_v11  ;;  %v840_v16 = vadd.f32 -1.906746, %v557_v37  ;;  %v349_v19 = vmax.f32 %v1187_v2, %v1219_v58  ;;  %v580_v48 = vmax.f32 %v560_v39, %v832_v29 }
  0x69   :  { %v334_v23 = vmax.f32 %v1304_v36, %v736_v8  ;;  %v462_v10 = vmax.f32 %v782_v33, %v457_v43  ;;  %v590_v62 = vmax.f32 %v570_v42, %v836_v13  ;;  %v606_v40 = vmax.f32 %v585_v24, -10002.032 }
  0x6a   :  { %v786_v28 = vadd.f32 -0.017857144, %v989_v15  ;;  %v595_v18 = vmax.f32 %v575_v61, %v838_v44  ;;  %v787_v50 = vadd.f32 -0.031746034, %v991_v20  ;;  %v600_v41 = vmax.f32 %v580_v48, %v840_v16  ;;  %v1306_v44 = vld [vmem:[#allocation9_spill] sm:$0xff] }
  0x6b   :  { %v466_v0 = vmax.f32 %v784_v47, %v462_v10  ;;  %v608_v27 = vmax.f32 %v606_v40, %v590_v62  ;;  %v789_v11 = vadd.f32 -0.049603175, %v996_v45  ;;  %v791_v2 = vadd.f32 -0.071428575, %v998_v26  ;;  %v572_v16 = vld [vmem:[#allocation2 + $0x42] sm:$0xff] }
  0x6c   :  { %v793_v15 = vadd.f32 -0.097222224, %v1000_v51  ;;  %v797_v9 = vadd.f32 -0.16071428, %v1140_v57  ;;  %v799_v32 = vadd.f32 -0.1984127, %v1142_v35 }
  0x6d   :  { %v471_v56 = vmax.f32 %v786_v28, %v466_v0  ;;  %v610_v8 = vmax.f32 %v608_v27, %v595_v18  ;;  %v801_v45 = vadd.f32 -0.24007936, %v1157_v17  ;;  %v803_v21 = vadd.f32 -0.2857143, %v1162_v59  ;;  %v577_v48 = vld [vmem:[#allocation2 + $0x43] sm:$0xff] }
  0x6e   :  { %v805_v39 = vadd.f32 -0.33531746, %v1168_v25  ;;  %v807_v49 = vadd.f32 -0.3888889, %v1172_v4  ;;  %v809_v51 = vadd.f32 -0.44642857, %v1180_v53 }
  0x6f   :  { %v476_v34 = vmax.f32 %v787_v50, %v471_v56  ;;  %v612_v31 = vmax.f32 %v610_v8, %v600_v41  ;;  %v813_v57 = vadd.f32 -0.5734127, %v1191_v7  ;;  %v815_v35 = vadd.f32 -0.64285713, %v1196_v5  ;;  %v1305_v7 = vld [vmem:[#allocation8_spill] sm:$0xff]  ;;  %v582_v40 = vld [vmem:[#allocation2 + $0x44] sm:$0xff] }
  0x70   :  { %v817_v17 = vadd.f32 -0.71626985, %v1198_v1  ;;  %v819_v59 = vadd.f32 -0.7936508, %v1200_v30  ;;  %v821_v25 = vadd.f32 -0.875, %v1210_v55  ;;  %v1307_v52 = vmax.f32 %v1305_v7, %v1306_v44  ;;  %v567_v1 = vld [vmem:[#allocation2 + $0x41] sm:$0xff] }
  0x71   :  { %v481_v12 = vmax.f32 %v789_v11, %v476_v34  ;;  %844 = vst [vmem:[%s1258_s1 + $0x20] sm:$0xff] %v612_v31  ;;  %v823_v4 = vadd.f32 -0.96031743, %v1213_v63  ;;  %v825_v53 = vadd.f32 -1.0496032, %v557_v37  ;;  %v587_v37 = vld [vmem:[#allocation2 + $0x45] sm:$0xff] }
  0x72   :  { %v369_v36 = vmax.f32 %v349_v19, -10000.508  ;;  %v829_v10 = vadd.f32 -1.2400794, %v567_v1  ;;  %v831_v62 = vadd.f32 -1.3412699, %v572_v16 }
  0x73   :  { %v486_v14 = vmax.f32 %v791_v2, %v481_v12  ;;  %v833_v0 = vadd.f32 -1.4464285, %v577_v48  ;;  %v835_v18 = vadd.f32 -1.5555556, %v582_v40  ;;  %v592_v27 = vld [vmem:[#allocation2 + $0x46] sm:$0xff] }
  0x74   :  { %v837_v50 = vadd.f32 -1.6686507, %v587_v37  ;;  %v597_v41 = vld [vmem:[#allocation2 + $0x47] sm:$0xff]  ;;  %v839_v19 = vadd.f32 -1.7857143, %v592_v27 }
  0x75   :  { %v491_v46 = vmax.f32 %v793_v15, %v486_v14  ;;  %v841_v34 = vadd.f32 -1.906746, %v597_v41 }
  0x77   :  { %v496_v20 = vmax.f32 %v797_v9, %v491_v46 }
  0x79   :  { %v501_v38 = vmax.f32 %v799_v32, %v496_v20 }
  0x7b   :  { %v506_v6 = vmax.f32 %v801_v45, %v501_v38 }
  0x7d   :  { %v511_v26 = vmax.f32 %v803_v21, %v506_v6 }
  0x7f   :  { %v516_v3 = vmax.f32 %v805_v39, %v511_v26 }
  0x81   :  { %v521_v22 = vmax.f32 %v807_v49, %v516_v3 }
  0x83   :  { %v526_v42 = vmax.f32 %v809_v51, %v521_v22 }
  0x85   :  { %v531_v29 = vmax.f32 %v526_v42, %v813_v57 }
  0x87   :  { %v536_v54 = vmax.f32 %v531_v29, %v815_v35 }
  0x89   :  { %v541_v58 = vmax.f32 %v536_v54, %v817_v17 }
  0x8b   :  { %v546_v33 = vmax.f32 %v541_v58, %v819_v59 }
  0x8d   :  { %v551_v61 = vmax.f32 %v546_v33, %v821_v25 }
  0x8f   :  { %v556_v13 = vmax.f32 %v551_v61, %v823_v4 }
  0x91   :  { %v561_v43 = vmax.f32 %v556_v13, %v825_v53 }
  0x93   :  { %v566_v24 = vmax.f32 %v561_v43, -10002.032 }
  0x95   :  { %v571_v5 = vmax.f32 %v1307_v52, %v566_v24 }
  0x97   :  { %v576_v60 = vmax.f32 %v334_v23, %v571_v5 }
  0x99   :  { %v581_v47 = vmax.f32 %v369_v36, %v576_v60 }
  0x9b   :  { %v586_v30 = vmax.f32 %v581_v47, -10001.143 }
  0x9d   :  { %v591_v55 = vmax.f32 %v829_v10, %v586_v30 }
  0x9f   :  { %v596_v63 = vmax.f32 %v831_v62, %v591_v55 }
  0xa1   :  { %v601_v28 = vmax.f32 %v833_v0, %v596_v63 }
  0xa3   :  { %v607_v56 = vmax.f32 %v835_v18, %v601_v28 }
  0xa5   :  { %v609_v23 = vmax.f32 %v607_v56, %v837_v50 }
  0xa7   :  { %v611_v8 = vmax.f32 %v609_v23, %v839_v19 }
  0xa9   :  { %v613_v11 = vmax.f32 %v611_v8, %v841_v34 }
  0xab   :  { %845 = vst [vmem:[%s1258_s1 + $0x28] sm:$0xff] %v613_v11 }

// kernel: _lambda_.3
= control target key start
LH: loop header
LB: loop body
LE: loop exit
PB: predicated region body
PF: predicated region fallthrough
CT: control target
= control target key end

     0   :  { %v870_v0 = vmov -10000.0   ;;  %s1206_s0 = inlined_call_operand.vmem [shape: f32[3,16,128], index: 0, kind: input, shape index: {}]   ;;  %s1207_s1 = inlined_call_operand.vmem [shape: f32[3,16,128], index: 1, kind: output, shape index: {}]  }
   0x1   :  { %20 = vst [vmem:[#allocation2 + $0xa0] sm:$0xff] %v870_v0  ;;  %12 = vst [vmem:[#allocation2] sm:$0xff] %v870_v0  ;;  %v884_v1 = vld [vmem:[%s1206_s0 + $0x20] sm:$0xff]  ;;  %v889_v2 = vld [vmem:[%s1206_s0 + $0x10] sm:$0xff] }
   0x2   :  { %13 = vst [vmem:[#allocation2 + $0x18] sm:$0xff] %v870_v0  ;;  %15 = vst [vmem:[#allocation2 + $0x50] sm:$0xff] %v870_v0  ;;  %v894_v3 = vld [vmem:[%s1206_s0 + $0x28] sm:$0xff]  ;;  %v902_v4 = vld [vmem:[%s1206_s0 + $0x18] sm:$0xff]  ;;  %v918_v8 = vadd.f32 -0.53333336, %v889_v2 }
   0x3   :  { %16 = vst [vmem:[#allocation2 + $0x58] sm:$0xff] %v870_v0  ;;  %17 = vst [vmem:[#allocation2 + $0x70] sm:$0xff] %v870_v0  ;;  %v907_v5 = vld [vmem:[%s1206_s0] sm:$0xff]  ;;  %v912_v6 = vld [vmem:[%s1206_s0 + $0x8] sm:$0xff]  ;;  %v921_v9 = vadd.f32 -0.53333336, %v902_v4 }
   0x4   :  { %18 = vst [vmem:[#allocation2 + $0x78] sm:$0xff] %v870_v0  ;;  %21 = vst [vmem:[#allocation2 + $0xa8] sm:$0xff] %v870_v0  ;;  %v924_v10 = vadd.f32 -2.6666667, %v907_v5  ;;  %v929_v13 = vadd.f32 -2.6666667, %v912_v6 }
   0x5   :  { %22 = vst [vmem:[#allocation2 + $0xb0] sm:$0xff] %v870_v0  ;;  %23 = vst [vmem:[#allocation2 + $0xb8] sm:$0xff] %v870_v0  ;;  %v947_v30 = vadd.f32 -0.12698413, %v894_v3  ;;  %v161_v47 = vmax.f32 %v902_v4, -10002.134 }
   0x6   :  { %24 = vst [vmem:[#allocation2 + $0xd0] sm:$0xff] %v870_v0  ;;  %25 = vst [vmem:[#allocation2 + $0xd8] sm:$0xff] %v870_v0 }
   0x7   :  { %26 = vst [vmem:[#allocation2 + $0xe0] sm:$0xff] %v870_v0  ;;  %27 = vst [vmem:[#allocation2 + $0xe8] sm:$0xff] %v870_v0 }
   0x8   :  { %1215 = vst [vmem:[#allocation3_spill] sm:$0xff] %v884_v1  ;;  %42 = vst [vmem:[#allocation2 + $0xc0] sm:$0xff] %v884_v1 }
   0x9   :  { %36 = vst [vmem:[#allocation2 + $0x60] sm:$0xff] %v889_v2  ;;  %43 = vst [vmem:[#allocation2 + $0xc8] sm:$0xff] %v894_v3 }
   0xa   :  { %37 = vst [vmem:[#allocation2 + $0x68] sm:$0xff] %v902_v4  ;;  %30 = vst [vmem:[#allocation2 + $0x8] sm:$0xff] %v907_v5  ;;  %v138_v34 = vld [vmem:[#allocation2 + $0x51] sm:$0xff] }
   0xb   :  { %31 = vst [vmem:[#allocation2 + $0x10] sm:$0xff] %v912_v6  ;;  %v321_v12 = vld [vmem:[#allocation2 + $0xa4] sm:$0xff]  ;;  %1221 = vst [vmem:[#allocation9_spill] sm:$0xff] %v947_v30  ;;  %v142_v38 = vld [vmem:[#allocation2 + $0x52] sm:$0xff]  ;;  %v677_v44 = vadd.f32 -1.875, %v138_v34 }
   0xc   :  { %v310_v7 = vld [vmem:[#allocation2 + $0xa9] sm:$0xff]  ;;  %v309_v14 = vld [vmem:[#allocation2 + $0xa1] sm:$0xff]  ;;  %v748_v19 = vadd.f32 -1.5555556, %v321_v12  ;;  %v146_v45 = vld [vmem:[#allocation2 + $0x53] sm:$0xff] }
   0xd   :  { %v926_v11 = vld [vmem:[#allocation2 + $0xab] sm:$0xff]  ;;  %v931_v15 = vadd.f32 -1.906746, %v310_v7  ;;  %v313_v16 = vld [vmem:[#allocation2 + $0xa2] sm:$0xff]  ;;  %v941_v26 = vadd.f32 -1.906746, %v309_v14 }
   0xe   :  { %1216 = vst [vmem:[#allocation4_spill] sm:$0xff] %v926_v11  ;;  %v322_v17 = vld [vmem:[#allocation2 + $0xac] sm:$0xff]  ;;  %v317_v18 = vld [vmem:[#allocation2 + $0xa3] sm:$0xff]  ;;  %v747_v22 = vadd.f32 -1.6686507, %v926_v11  ;;  %v150_v46 = vld [vmem:[#allocation2 + $0x54] sm:$0xff] }
   0xf   :  { %1217 = vst [vmem:[#allocation5_spill] sm:$0xff] %v931_v15  ;;  %v933_v20 = vadd.f32 -1.5555556, %v322_v17  ;;  %v935_v21 = vld [vmem:[#allocation2 + $0xad] sm:$0xff]  ;;  %v327_v23 = vld [vmem:[#allocation2 + $0xa5] sm:$0xff]  ;;  %v156_v52 = vld [vmem:[#allocation2 + $0x55] sm:$0xff] }
  0x10   :  { %v939_v24 = vadd.f32 -1.4464285, %v935_v21  ;;  %v333_v25 = vld [vmem:[#allocation2 + $0xa6] sm:$0xff]  ;;  %v949_v31 = vadd.f32 -1.7857143, %v313_v16  ;;  %v967_v48 = vld [vmem:[#allocation2 + $0x59] sm:$0xff] }
  0x11   :  { %1218 = vst [vmem:[#allocation6_spill] sm:$0xff] %v933_v20  ;;  %v943_v27 = vld [vmem:[#allocation2 + $0xaa] sm:$0xff]  ;;  %v951_v32 = vadd.f32 -1.6686507, %v317_v18  ;;  %v325_v35 = vmax.f32 %v748_v19, -10002.032 }
  0x12   :  { %1219 = vst [vmem:[#allocation7_spill] sm:$0xff] %v939_v24  ;;  %1220 = vst [vmem:[#allocation8_spill] sm:$0xff] %v943_v27  ;;  %v339_v29 = vld [vmem:[#allocation2 + $0xa7] sm:$0xff]  ;;  %v955_v36 = vadd.f32 -1.4464285, %v327_v23  ;;  %v969_v49 = vld [vmem:[#allocation2 + $0x5a] sm:$0xff] }
  0x13   :  { %v957_v37 = vadd.f32 -1.3412699, %v333_v25  ;;  %v959_v39 = vadd.f32 -1.2400794, %v339_v29  ;;  %v344_v40 = vmax.f32 %v747_v22, -10001.143 }
  0x14   :  { %v758_v41 = vadd.f32 -1.0496032, %v310_v7  ;;  %v962_v42 = vadd.f32 -0.96031743, %v943_v27  ;;  %v964_v43 = vadd.f32 -0.7936508, %v322_v17  ;;  %v331_v53 = vmax.f32 %v941_v26, %v955_v36 }
  0x15   :  { %v679_v50 = vadd.f32 -1.6333333, %v142_v38  ;;  %v683_v51 = vadd.f32 -1.2, %v150_v46  ;;  %v973_v54 = vmax.f32 %v325_v35, -10001.143 }
  0x16   :  { %v975_v55 = vld [vmem:[#allocation2 + $0x5b] sm:$0xff]  ;;  %v681_v56 = vadd.f32 -1.4083333, %v146_v45  ;;  %v685_v58 = vadd.f32 -1.0083333, %v156_v52  ;;  %v189_v34 = vld [vmem:[#allocation2 + $0x63] sm:$0xff]  ;;  %v993_v24 = vmax.f32 %v331_v53, %v758_v41 }
  0x17   :  { %v157_v57 = vld [vmem:[#allocation2 + $0x5d] sm:$0xff]  ;;  %v977_v60 = vmax.f32 %v344_v40, -10000.508  ;;  %v154_v62 = vmax.f32 %v683_v51, -10002.134  ;;  %v209_v33 = vld [vmem:[#allocation2 + $0x67] sm:$0xff] }
  0x18   :  { %v162_v59 = vld [vmem:[#allocation2 + $0x56] sm:$0xff]  ;;  %v686_v63 = vadd.f32 -1.0083333, %v157_v57  ;;  %v163_v0 = vld [vmem:[#allocation2 + $0x5e] sm:$0xff]  ;;  %v160_v12 = vmax.f32 %v677_v44, %v685_v58  ;;  %v693_v38 = vadd.f32 -0.40833333, %v967_v48 }
  0x19   :  { %v979_v61 = vld [vmem:[#allocation2 + $0x5c] sm:$0xff]  ;;  %v687_v4 = vadd.f32 -0.8333333, %v162_v59  ;;  %v688_v14 = vadd.f32 -0.8333333, %v163_v0  ;;  %v194_v35 = vld [vmem:[#allocation2 + $0x64] sm:$0xff] }
  0x1a   :  { %v168_v7 = vld [vmem:[#allocation2 + $0x57] sm:$0xff]  ;;  %v169_v16 = vld [vmem:[#allocation2 + $0x5f] sm:$0xff]  ;;  %v167_v22 = vmax.f32 %v686_v63, %v161_v47  ;;  %v177_v26 = vmax.f32 %v154_v62, -10000.533  ;;  %v695_v44 = vadd.f32 -0.3, %v969_v49  ;;  %v182_v58 = vmax.f32 %v160_v12, %v693_v38 }
  0x1b   :  { %v689_v17 = vadd.f32 -0.675, %v168_v7  ;;  %v179_v18 = vld [vmem:[#allocation2 + $0x61] sm:$0xff]  ;;  %v166_v23 = vmax.f32 %v679_v50, %v687_v4  ;;  %v690_v25 = vadd.f32 -0.675, %v169_v16  ;;  %v217_v19 = vld [vmem:[#allocation2 + $0x69] sm:$0xff] }
  0x1c   :  { %v184_v29 = vld [vmem:[#allocation2 + $0x62] sm:$0xff]  ;;  %v694_v40 = vadd.f32 -0.40833333, %v179_v18  ;;  %v173_v45 = vmax.f32 %v688_v14, %v167_v22  ;;  %v697_v51 = vadd.f32 -0.20833333, %v975_v55  ;;  %v227_v15 = vld [vmem:[#allocation2 + $0x6b] sm:$0xff] }
  0x1d   :  { %v172_v36 = vmax.f32 %v681_v56, %v689_v17  ;;  %v696_v46 = vadd.f32 -0.3, %v184_v29  ;;  %v986_v52 = vadd.f32 -0.20833333, %v189_v34  ;;  %v187_v47 = vmax.f32 %v166_v23, %v695_v44  ;;  %v199_v62 = vld [vmem:[#allocation2 + $0x65] sm:$0xff] }
  0x1e   :  { %v699_v50 = vadd.f32 -0.13333334, %v979_v61  ;;  %v989_v59 = vadd.f32 -0.13333334, %v194_v35  ;;  %v204_v63 = vld [vmem:[#allocation2 + $0x66] sm:$0xff]  ;;  %v178_v56 = vmax.f32 %v690_v25, %v173_v45 }
  0x1f   :  { %v192_v4 = vmax.f32 %v172_v36, %v697_v51  ;;  %v701_v7 = vadd.f32 -0.075, %v157_v57  ;;  %v991_v17 = vadd.f32 -0.075, %v199_v62  ;;  %v703_v22 = vadd.f32 -0.033333335, %v163_v0 }
  0x20   :  { %v197_v14 = vmax.f32 %v177_v26, %v699_v50  ;;  %v705_v28 = vadd.f32 -0.008333334, %v169_v16  ;;  %v183_v12 = vmax.f32 %v178_v56, -10000.533  ;;  %v995_v38 = vadd.f32 -0.033333335, %v204_v63 }
  0x21   :  { %v202_v23 = vmax.f32 %v182_v58, %v701_v7  ;;  %v707_v35 = vadd.f32 -0.008333334, %v179_v18  ;;  %v222_v44 = vld [vmem:[#allocation2 + $0x6a] sm:$0xff]  ;;  %v207_v20 = vmax.f32 %v187_v47, %v703_v22  ;;  %v997_v25 = vadd.f32 -0.008333334, %v209_v33  ;;  %v48_v27 = vld [vmem:[#allocation2 + $0x1] sm:$0xff] }
  0x22   :  { %v212_v57 = vmax.f32 %v192_v4, %v705_v28  ;;  %v215_v36 = vmax.f32 %v197_v14, %v889_v2  ;;  %v232_v45 = vld [vmem:[#allocation2 + $0x6c] sm:$0xff]  ;;  %v188_v0 = vmax.f32 %v918_v8, %v183_v12  ;;  %v1001_v16 = vadd.f32 -0.008333334, %v217_v19  ;;  %v60_v30 = vld [vmem:[#allocation2 + $0x4] sm:$0xff] }
  0x23   :  { %v220_v41 = vmax.f32 %v202_v23, %v707_v35  ;;  %v709_v53 = vadd.f32 -0.033333335, %v184_v29  ;;  %v236_v26 = vld [vmem:[#allocation2 + $0x6d] sm:$0xff]  ;;  %v1003_v58 = vadd.f32 -0.033333335, %v222_v44 }
  0x24   :  { %v241_v51 = vld [vmem:[#allocation2 + $0x6e] sm:$0xff]  ;;  %v711_v18 = vadd.f32 -0.075, %v189_v34  ;;  %v1005_v50 = vadd.f32 -0.075, %v227_v15  ;;  %v234_v47 = vmax.f32 %v215_v36, %v989_v59  ;;  %v193_v56 = vmax.f32 %v694_v40, %v188_v0 }
  0x25   :  { %v225_v28 = vmax.f32 %v207_v20, %v709_v53  ;;  %v1008_v4 = vadd.f32 -0.13333334, %v232_v45  ;;  %v714_v2 = vadd.f32 -0.20833333, %v199_v62  ;;  %v1010_v8 = vadd.f32 -0.20833333, %v236_v26 }
  0x26   :  { %v230_v7 = vmax.f32 %v212_v57, %v711_v18  ;;  %v716_v14 = vadd.f32 -0.3, %v204_v63  ;;  %v718_v22 = vadd.f32 -0.40833333, %v209_v33  ;;  %v198_v29 = vmax.f32 %v696_v46, %v193_v56  ;;  %v1014_v35 = vld [vmem:[#allocation2 + $0x6f] sm:$0xff]  ;;  %v52_v53 = vld [vmem:[#allocation2 + $0x2] sm:$0xff] }
  0x27   :  { %v239_v12 = vmax.f32 %v220_v41, %v714_v2  ;;  %v1012_v23 = vadd.f32 -0.3, %v241_v51  ;;  %v254_v34 = vmax.f32 %v234_v47, %v921_v9  ;;  %v722_v20 = vadd.f32 -0.675, %v217_v19  ;;  %v56_v62 = vld [vmem:[#allocation2 + $0x3] sm:$0xff]  ;;  %v61_v1 = vld [vmem:[#allocation2 + $0xc] sm:$0xff] }
  0x28   :  { %v244_v36 = vmax.f32 %v225_v28, %v716_v14  ;;  %v249_v40 = vmax.f32 %v230_v7, %v718_v22  ;;  %v724_v0 = vadd.f32 -0.8333333, %v222_v44  ;;  %v203_v57 = vmax.f32 %v986_v52, %v198_v29  ;;  %v66_v44 = vld [vmem:[#allocation2 + $0x5] sm:$0xff]  ;;  %v67_v7 = vld [vmem:[#allocation2 + $0xd] sm:$0xff] }
  0x29   :  { %v726_v18 = vadd.f32 -1.0083333, %v227_v15  ;;  %v728_v63 = vadd.f32 -1.2, %v232_v45  ;;  %v730_v33 = vadd.f32 -1.4083333, %v236_v26  ;;  %v259_v46 = vmax.f32 %v239_v12, %v722_v20 }
  0x2a   :  { %v264_v41 = vmax.f32 %v244_v36, %v724_v0  ;;  %v732_v56 = vadd.f32 -1.6333333, %v241_v51  ;;  %v734_v2 = vadd.f32 -1.875, %v1014_v35  ;;  %v208_v9 = vmax.f32 %v989_v59, %v203_v57  ;;  %v72_v14 = vld [vmem:[#allocation2 + $0x6] sm:$0xff]  ;;  %v73_v26 = vld [vmem:[#allocation2 + $0xe] sm:$0xff] }
  0x2b   :  { %v269_v47 = vmax.f32 %v249_v40, %v726_v18  ;;  %v274_v28 = vmax.f32 %v254_v34, %v728_v63  ;;  %v646_v19 = vadd.f32 -2.0416667, %v48_v27  ;;  %v279_v22 = vmax.f32 %v259_v46, %v730_v33  ;;  %v78_v20 = vld [vmem:[#allocation2 + $0x7] sm:$0xff]  ;;  %v79_v0 = vld [vmem:[#allocation2 + $0xf] sm:$0xff] }
  0x2c   :  { %v284_v52 = vmax.f32 %v264_v41, %v732_v56  ;;  %v648_v15 = vadd.f32 -1.5, %v52_v53  ;;  %v650_v45 = vadd.f32 -1.0416666, %v56_v62  ;;  %v213_v29 = vmax.f32 %v991_v17, %v208_v9  ;;  %v49_v33 = vld [vmem:[#allocation2 + $0x9] sm:$0xff] }
  0x2d   :  { %v289_v51 = vmax.f32 %v269_v47, %v734_v2  ;;  %v294_v12 = vmax.f32 %v274_v28, -10002.134  ;;  %v652_v36 = vadd.f32 -0.6666667, %v60_v30  ;;  %v653_v11 = vadd.f32 -0.6666667, %v61_v1 }
  0x2e   :  { %v654_v59 = vadd.f32 -0.375, %v66_v44  ;;  %v655_v40 = vadd.f32 -0.375, %v67_v7  ;;  %v656_v34 = vadd.f32 -0.16666667, %v72_v14  ;;  %v216_v27 = vmax.f32 %v995_v38, %v213_v29  ;;  %v53_v30 = vld [vmem:[#allocation2 + $0xa] sm:$0xff] }
  0x2f   :  { %v296_v57 = vmax.f32 %v294_v12, %v279_v22  ;;  %v64_v18 = vmax.f32 %v652_v36, -10002.667  ;;  %v657_v63 = vadd.f32 -0.16666667, %v73_v26  ;;  %v658_v46 = vadd.f32 -0.041666668, %v78_v20 }
  0x30   :  { %v70_v53 = vmax.f32 %v646_v19, %v654_v59  ;;  %v76_v62 = vmax.f32 %v648_v15, %v656_v34  ;;  %v659_v41 = vadd.f32 -0.041666668, %v79_v0  ;;  %v221_v17 = vmax.f32 %v997_v25, %v216_v27  ;;  %v57_v2 = vld [vmem:[#allocation2 + $0xb] sm:$0xff] }
  0x31   :  { %v298_v56 = vmax.f32 %v296_v57, %v284_v52  ;;  %v85_v1 = vmax.f32 %v64_v18, %v907_v5  ;;  %v660_v9 = vadd.f32 -0.041666668, %v49_v33  ;;  %v82_v47 = vmax.f32 %v650_v45, %v658_v46  ;;  %v92_v59 = vld [vmem:[#allocation2 + $0x12] sm:$0xff] }
  0x32   :  { %v662_v28 = vadd.f32 -0.16666667, %v53_v30  ;;  %v664_v44 = vadd.f32 -0.375, %v57_v2  ;;  %v667_v38 = vadd.f32 -1.0416666, %v67_v7  ;;  %v226_v14 = vmax.f32 %v1001_v16, %v221_v17  ;;  %v87_v7 = vld [vmem:[#allocation2 + $0x11] sm:$0xff] }
  0x33   :  { %v300_v22 = vmax.f32 %v298_v56, %v289_v51  ;;  %v90_v29 = vmax.f32 %v70_v53, %v660_v9  ;;  %v104_v19 = vmax.f32 %v85_v1, %v653_v11  ;;  %v669_v36 = vadd.f32 -1.5, %v73_v26  ;;  %v97_v57 = vld [vmem:[#allocation2 + $0x13] sm:$0xff] }
  0x34   :  { %v95_v15 = vmax.f32 %v76_v62, %v662_v28  ;;  %v100_v12 = vmax.f32 %v82_v47, %v664_v44  ;;  %v671_v20 = vadd.f32 -2.0416667, %v79_v0  ;;  %v231_v25 = vmax.f32 %v1003_v58, %v226_v14  ;;  %v102_v53 = vld [vmem:[#allocation2 + $0x14] sm:$0xff] }
  0x35   :  { %738 = vst [vmem:[%s1207_s1 + $0x10] sm:$0xff] %v300_v22  ;;  %v109_v5 = vmax.f32 %v90_v29, %v667_v38  ;;  %v124_v52 = vmax.f32 %v104_v19, %v929_v13  ;;  %v647_v45 = vadd.f32 -2.0416667, %v49_v33  ;;  %v649_v34 = vadd.f32 -1.5, %v53_v30  ;;  %v106_v62 = vld [vmem:[#allocation2 + $0x15] sm:$0xff] }
  0x36   :  { %v114_v16 = vmax.f32 %v95_v15, %v669_v36  ;;  %v119_v51 = vmax.f32 %v100_v12, %v671_v20  ;;  %v651_v27 = vadd.f32 -1.0416666, %v57_v2  ;;  %v235_v26 = vmax.f32 %v1005_v50, %v231_v25  ;;  %v111_v33 = vld [vmem:[#allocation2 + $0x16] sm:$0xff] }
  0x37   :  { %v126_v0 = vmax.f32 %v124_v52, %v109_v5  ;;  %v65_v58 = vmax.f32 %v924_v10, %v653_v11  ;;  %v71_v18 = vmax.f32 %v647_v45, %v655_v40  ;;  %v77_v46 = vmax.f32 %v649_v34, %v657_v63  ;;  %v116_v47 = vld [vmem:[#allocation2 + $0x17] sm:$0xff]  ;;  %v340_v15 = vld [vmem:[#allocation2 + $0xaf] sm:$0xff] }
  0x38   :  { %v83_v17 = vmax.f32 %v651_v27, %v659_v41  ;;  %v661_v56 = vadd.f32 -0.041666668, %v87_v7  ;;  %v663_v13 = vadd.f32 -0.16666667, %v92_v59  ;;  %v240_v1 = vmax.f32 %v1008_v4, %v235_v26  ;;  %v355_v25 = vld [vmem:[#allocation2 + $0xb2] sm:$0xff] }
  0x39   :  { %v128_v9 = vmax.f32 %v126_v0, %v114_v16  ;;  %v86_v30 = vmax.f32 %v65_v58, %v912_v6  ;;  %v665_v2 = vadd.f32 -0.375, %v97_v57  ;;  %v666_v44 = vadd.f32 -0.6666667, %v102_v53  ;;  %v256_v45 = vld [vmem:[#allocation2 + $0x71] sm:$0xff] }
  0x3a   :  { %v91_v28 = vmax.f32 %v71_v18, %v661_v56  ;;  %v96_v50 = vmax.f32 %v77_v46, %v663_v13  ;;  %v668_v38 = vadd.f32 -1.0416666, %v106_v62  ;;  %v245_v10 = vmax.f32 %v1010_v8, %v240_v1  ;;  %v1059_v27 = vld [vmem:[#allocation2 + $0xb1] sm:$0xff] }
  0x3b   :  { %v719_v11 = vadd.f32 -0.40833333, %v1014_v35  ;;  %v130_v40 = vmax.f32 %v128_v9, %v119_v51  ;;  %v670_v63 = vadd.f32 -1.5, %v111_v33  ;;  %v101_v41 = vmax.f32 %v83_v17, %v665_v2  ;;  %v1223_v51 = vld [vmem:[#allocation4_spill] sm:$0xff] }
  0x3c   :  { %v105_v14 = vmax.f32 %v86_v30, %v666_v44  ;;  %v110_v22 = vmax.f32 %v91_v28, %v668_v38  ;;  %v672_v29 = vadd.f32 -2.0416667, %v116_v47  ;;  %v766_v4 = vadd.f32 -0.71626985, %v935_v21  ;;  %v1047_v21 = vld [vmem:[#allocation2 + $0xae] sm:$0xff]  ;;  %v375_v33 = vld [vmem:[#allocation2 + $0xb6] sm:$0xff] }
  0x3d   :  { %v684_v6 = vadd.f32 -1.2, %v979_v61  ;;  %v250_v19 = vmax.f32 %v1012_v23, %v245_v10  ;;  %132 = vst [vmem:[%s1207_s1] sm:$0xff] %v130_v40  ;;  %v678_v8 = vadd.f32 -1.875, %v967_v48  ;;  %v364_v35 = vmax.f32 %v894_v3, %v977_v60  ;;  %v370_v58 = vld [vmem:[#allocation2 + $0xb5] sm:$0xff] }
  0x3e   :  { %v115_v12 = vmax.f32 %v96_v50, %v670_v63  ;;  %v125_v36 = vmax.f32 %v105_v14, -10002.667  ;;  %v343_v20 = vmax.f32 %v951_v32, %v959_v39  ;;  %v680_v23 = vadd.f32 -1.6333333, %v969_v49  ;;  %v360_v49 = vld [vmem:[#allocation2 + $0xb3] sm:$0xff] }
  0x3f   :  { %v255_v61 = vmax.f32 %v719_v11, %v250_v19  ;;  %v1222_v5 = vmax.f32 %v949_v31, %v957_v37  ;;  %v368_v52 = vmax.f32 %v973_v54, %v964_v43  ;;  %v120_v3 = vmax.f32 %v101_v41, %v672_v29  ;;  %v261_v37 = vld [vmem:[#allocation2 + $0x72] sm:$0xff] }
  0x40   :  { %v127_v60 = vmax.f32 %v125_v36, %v110_v22  ;;  %v755_v7 = vadd.f32 -1.2400794, %v340_v15  ;;  %v373_v32 = vmax.f32 %v993_v24, %v766_v4  ;;  %v682_v59 = vadd.f32 -1.4083333, %v975_v55  ;;  %v266_v53 = vld [vmem:[#allocation2 + $0x73] sm:$0xff] }
  0x41   :  { %v358_v48 = vmax.f32 %v1222_v5, %v962_v42  ;;  %v260_v39 = vmax.f32 %v678_v8, %v255_v61  ;;  %v155_v16 = vmax.f32 %v684_v6, -10002.134  ;;  %v762_v34 = vadd.f32 -0.875, %v1223_v51  ;;  %v1062_v17 = vld [vmem:[#allocation2 + $0xb4] sm:$0xff] }
  0x42   :  { %v129_v31 = vmax.f32 %v127_v60, %v115_v12  ;;  %v374_v42 = vmax.f32 %v755_v7, %v364_v35  ;;  %v761_v57 = vadd.f32 -0.96031743, %v355_v25  ;;  %v768_v43 = vadd.f32 -0.64285713, %v1047_v21  ;;  %v271_v30 = vld [vmem:[#allocation2 + $0x74] sm:$0xff]  ;;  %v405_v7 = vld [vmem:[#allocation2 + $0xbc] sm:$0xff] }
  0x43   :  { %v265_v54 = vmax.f32 %v680_v23, %v260_v39  ;;  %v723_v26 = vadd.f32 -0.675, %v256_v45  ;;  %v363_v0 = vmax.f32 %v343_v20, %v762_v34  ;;  %v770_v24 = vadd.f32 -0.5734127, %v340_v15  ;;  %v380_v10 = vld [vmem:[#allocation2 + $0xb7] sm:$0xff] }
  0x44   :  { %v131_v18 = vmax.f32 %v129_v31, %v120_v3  ;;  %v379_v55 = vmax.f32 %v761_v57, %v374_v42  ;;  %v763_v62 = vadd.f32 -0.875, %v360_v49  ;;  %v378_v46 = vmax.f32 %v358_v48, %v768_v43  ;;  %v276_v63 = vld [vmem:[#allocation2 + $0x75] sm:$0xff]  ;;  %v415_v57 = vld [vmem:[#allocation2 + $0xbe] sm:$0xff] }
  0x45   :  { %v270_v56 = vmax.f32 %v682_v59, %v265_v54  ;;  %v725_v13 = vadd.f32 -0.8333333, %v261_v37  ;;  %v383_v1 = vmax.f32 %v363_v0, %v770_v24  ;;  %v774_v9 = vadd.f32 -0.44642857, %v1059_v27  ;;  %v390_v19 = vld [vmem:[#allocation2 + $0xb9] sm:$0xff] }
  0x46   :  { %133 = vst [vmem:[%s1207_s1 + $0x8] sm:$0xff] %v131_v18  ;;  %v384_v2 = vmax.f32 %v763_v62, %v379_v55  ;;  %v767_v47 = vadd.f32 -0.71626985, %v370_v58  ;;  %v388_v28 = vmax.f32 %v368_v52, -10000.508  ;;  %v395_v36 = vld [vmem:[#allocation2 + $0xba] sm:$0xff] }
  0x47   :  { %v776_v50 = vadd.f32 -0.3888889, %v355_v25  ;;  %v275_v44 = vmax.f32 %v155_v16, %v270_v56  ;;  %v727_v38 = vadd.f32 -1.0083333, %v266_v53  ;;  %v393_v11 = vmax.f32 %v373_v32, %v774_v9  ;;  %v400_v5 = vld [vmem:[#allocation2 + $0xbb] sm:$0xff] }
  0x48   :  { %v778_v40 = vadd.f32 -0.33531746, %v360_v49  ;;  %v394_v41 = vmax.f32 %v767_v47, %v384_v2  ;;  %v769_v14 = vadd.f32 -0.64285713, %v375_v33  ;;  %v780_v29 = vadd.f32 -0.2857143, %v1062_v17 }
  0x49   :  { %v398_v22 = vmax.f32 %v378_v46, %v776_v50  ;;  %v280_v4 = vmax.f32 %v723_v26, %v275_v44  ;;  %v729_v6 = vadd.f32 -1.2, %v271_v30  ;;  %v782_v15 = vadd.f32 -0.24007936, %v370_v58  ;;  %v281_v3 = vld [vmem:[#allocation2 + $0x76] sm:$0xff]  ;;  %v420_v58 = vld [vmem:[#allocation2 + $0xbf] sm:$0xff] }
  0x4a   :  { %v403_v8 = vmax.f32 %v383_v1, %v778_v40  ;;  %v399_v35 = vmax.f32 %v769_v14, %v394_v41  ;;  %v771_v12 = vadd.f32 -0.5734127, %v380_v10  ;;  %v408_v20 = vmax.f32 %v388_v28, %v780_v29  ;;  %v410_v16 = vld [vmem:[#allocation2 + $0xbd] sm:$0xff]  ;;  %v1076_v29 = vld [vmem:[#allocation2 + $0xc5] sm:$0xff] }
  0x4b   :  { %v784_v61 = vadd.f32 -0.1984127, %v375_v33  ;;  %v285_v23 = vmax.f32 %v725_v13, %v280_v4  ;;  %v731_v25 = vadd.f32 -1.4083333, %v276_v63  ;;  %v413_v48 = vmax.f32 %v393_v11, %v782_v15  ;;  %v286_v31 = vld [vmem:[#allocation2 + $0x77] sm:$0xff]  ;;  %v445_v46 = vld [vmem:[#allocation2 + $0xc4] sm:$0xff] }
  0x4c   :  { %v786_v52 = vadd.f32 -0.16071428, %v380_v10  ;;  %v404_v60 = vmax.f32 %v771_v12, %v399_v35  ;;  %v775_v45 = vadd.f32 -0.44642857, %v390_v19  ;;  %v790_v39 = vadd.f32 -0.097222224, %v390_v19 }
  0x4d   :  { %v418_v32 = vmax.f32 %v398_v22, %v784_v61  ;;  %v290_v59 = vmax.f32 %v727_v38, %v285_v23  ;;  %v428_v51 = vmax.f32 %v408_v20, -10000.127  ;;  %v792_v34 = vadd.f32 -0.071428575, %v395_v36  ;;  %v430_v1 = vld [vmem:[#allocation2 + $0xc1] sm:$0xff]  ;;  %v1224_v63 = vld [vmem:[#allocation3_spill] sm:$0xff] }
  0x4e   :  { %v423_v49 = vmax.f32 %v403_v8, %v786_v52  ;;  %v409_v37 = vmax.f32 %v775_v45, %v404_v60  ;;  %v777_v42 = vadd.f32 -0.3888889, %v395_v36  ;;  %v433_v43 = vmax.f32 %v413_v48, %v790_v39  ;;  %v1069_v28 = vld [vmem:[#allocation2 + $0xc2] sm:$0xff]  ;;  %v1091_v45 = vld [vmem:[#allocation2 + $0xca] sm:$0xff] }
  0x4f   :  { %v794_v54 = vadd.f32 -0.049603175, %v400_v5  ;;  %v295_v26 = vmax.f32 %v729_v6, %v290_v59  ;;  %v733_v0 = vadd.f32 -1.6333333, %v281_v3  ;;  %v438_v24 = vmax.f32 %v418_v32, %v792_v34  ;;  %v1071_v50 = vld [vmem:[#allocation2 + $0xc3] sm:$0xff]  ;;  %v1096_v39 = vld [vmem:[#allocation2 + $0xcc] sm:$0xff] }
  0x50   :  { %v796_v18 = vadd.f32 -0.031746034, %v405_v7  ;;  %v414_v53 = vmax.f32 %v777_v42, %v409_v37  ;;  %v779_v55 = vadd.f32 -0.33531746, %v400_v5  ;;  %v798_v56 = vadd.f32 -0.017857144, %v410_v16 }
  0x51   :  { %v443_v62 = vmax.f32 %v423_v49, %v794_v54  ;;  %v297_v13 = vmax.f32 %v295_v26, %v731_v25  ;;  %v735_v33 = vadd.f32 -1.875, %v286_v31  ;;  %v800_v30 = vadd.f32 -0.007936508, %v415_v57  ;;  %v1078_v8 = vld [vmem:[#allocation2 + $0xc6] sm:$0xff] }
  0x52   :  { %v448_v9 = vmax.f32 %v428_v51, %v796_v18  ;;  %v419_v2 = vmax.f32 %v779_v55, %v414_v53  ;;  %v781_v47 = vadd.f32 -0.2857143, %v405_v7  ;;  %v453_v44 = vmax.f32 %v433_v43, %v798_v56  ;;  %v1082_v20 = vld [vmem:[#allocation2 + $0xc7] sm:$0xff]  ;;  %v1111_v55 = vld [vmem:[#allocation2 + $0xd1] sm:$0xff] }
  0x53   :  { %v802_v38 = vadd.f32 -0.001984127, %v420_v58  ;;  %v299_v10 = vmax.f32 %v297_v13, %v733_v0  ;;  %v1073_v11 = vadd.f32 -0.031746034, %v445_v46  ;;  %v458_v40 = vmax.f32 %v438_v24, %v800_v30  ;;  %v1087_v23 = vld [vmem:[#allocation2 + $0xc9] sm:$0xff]  ;;  %v1225_v49 = vld [vmem:[#allocation9_spill] sm:$0xff] }
  0x54   :  { %v466_v41 = vmax.f32 %v448_v9, %v1224_v63  ;;  %v424_v14 = vmax.f32 %v781_v47, %v419_v2  ;;  %v783_v22 = vadd.f32 -0.24007936, %v410_v16  ;;  %v804_v6 = vadd.f32 -0.001984127, %v430_v1  ;;  %v1093_v7 = vld [vmem:[#allocation2 + $0xcb] sm:$0xff]  ;;  %v1226_v47 = vld [vmem:[#allocation8_spill] sm:$0xff] }
  0x55   :  { %v463_v4 = vmax.f32 %v443_v62, %v802_v38  ;;  %v301_v19 = vmax.f32 %v299_v10, %v735_v33  ;;  %v806_v15 = vadd.f32 -0.007936508, %v1069_v28  ;;  %v808_v35 = vadd.f32 -0.017857144, %v1071_v50  ;;  %v1101_v37 = vld [vmem:[#allocation2 + $0xcd] sm:$0xff] }
  0x56   :  { %v429_v12 = vmax.f32 %v783_v22, %v424_v14  ;;  %v785_v36 = vadd.f32 -0.1984127, %v415_v57  ;;  %v471_v61 = vmax.f32 %v453_v44, %v804_v6  ;;  %v485_v48 = vmax.f32 %v466_v41, %v1073_v11  ;;  %v1104_v43 = vld [vmem:[#allocation2 + $0xce] sm:$0xff] }
  0x57   :  { %739 = vst [vmem:[%s1207_s1 + $0x18] sm:$0xff] %v301_v19  ;;  %v476_v25 = vmax.f32 %v458_v40, %v806_v15  ;;  %v481_v5 = vmax.f32 %v463_v4, %v808_v35  ;;  %v811_v52 = vadd.f32 -0.049603175, %v1076_v29  ;;  %v787_v60 = vadd.f32 -0.16071428, %v420_v58  ;;  %v1108_v24 = vld [vmem:[#allocation2 + $0xcf] sm:$0xff] }
  0x58   :  { %v434_v3 = vmax.f32 %v785_v36, %v429_v12  ;;  %v813_v32 = vadd.f32 -0.071428575, %v1078_v8  ;;  %v815_v16 = vadd.f32 -0.097222224, %v1082_v20  ;;  %v505_v51 = vmax.f32 %v485_v48, %v1225_v49  ;;  %v1114_v9 = vld [vmem:[#allocation2 + $0xd2] sm:$0xff]  ;;  %v1227_v48 = vld [vmem:[#allocation6_spill] sm:$0xff] }
  0x59   :  { %v490_v59 = vmax.f32 %v471_v61, %v811_v52  ;;  %v789_v31 = vadd.f32 -0.12698413, %v1224_v63  ;;  %v819_v57 = vadd.f32 -0.16071428, %v1087_v23  ;;  %v821_v26 = vadd.f32 -0.1984127, %v1091_v45 }
  0x5a   :  { %v439_v34 = vmax.f32 %v787_v60, %v434_v3  ;;  %v495_v42 = vmax.f32 %v476_v25, %v813_v32  ;;  %v500_v54 = vmax.f32 %v481_v5, %v815_v16  ;;  %v823_v0 = vadd.f32 -0.24007936, %v1093_v7  ;;  %v1120_v38 = vld [vmem:[#allocation2 + $0xd3] sm:$0xff] }
  0x5b   :  { %v510_v18 = vmax.f32 %v490_v59, %v819_v57  ;;  %v825_v53 = vadd.f32 -0.2857143, %v1096_v39  ;;  %v827_v56 = vadd.f32 -0.33531746, %v1101_v37  ;;  %v791_v33 = vadd.f32 -0.097222224, %v430_v1 }
  0x5c   :  { %v444_v58 = vmax.f32 %v439_v34, -10000.127  ;;  %v515_v62 = vmax.f32 %v495_v42, %v821_v26  ;;  %v520_v46 = vmax.f32 %v500_v54, %v823_v0  ;;  %v829_v2 = vadd.f32 -0.3888889, %v1104_v43  ;;  %v1124_v14 = vld [vmem:[#allocation2 + $0xd4] sm:$0xff]  ;;  %v1154_v57 = vld [vmem:[#allocation2 + $0xdc] sm:$0xff] }
  0x5d   :  { %v525_v30 = vmax.f32 %v505_v51, %v825_v53  ;;  %v1118_v44 = vadd.f32 -1.7857143, %v1226_v47  ;;  %v530_v10 = vmax.f32 %v510_v18, %v827_v56  ;;  %v831_v40 = vadd.f32 -0.44642857, %v1108_v24  ;;  %v1126_v22 = vld [vmem:[#allocation2 + $0xd5] sm:$0xff]  ;;  %v1156_v26 = vld [vmem:[#allocation2 + $0xdd] sm:$0xff] }
  0x5e   :  { %v449_v13 = vmax.f32 %v789_v31, %v444_v58  ;;  %v793_v41 = vadd.f32 -0.071428575, %v1069_v28  ;;  %v535_v1 = vmax.f32 %v515_v62, %v829_v2  ;;  %v835_v4 = vadd.f32 -0.5734127, %v1111_v55  ;;  %v1132_v19 = vld [vmem:[#allocation2 + $0xd6] sm:$0xff] }
  0x5f   :  { %v1130_v6 = vadd.f32 -1.3412699, %v1047_v21  ;;  %v540_v15 = vmax.f32 %v520_v46, %v831_v40  ;;  %v545_v35 = vmax.f32 %v525_v30, -10000.508  ;;  %v837_v12 = vadd.f32 -0.64285713, %v1114_v9 }
  0x60   :  { %v454_v63 = vmax.f32 %v791_v33, %v449_v13  ;;  %v795_v61 = vadd.f32 -0.049603175, %v1071_v50  ;;  %v1136_v28 = vld [vmem:[#allocation2 + $0xd7] sm:$0xff]  ;;  %v550_v25 = vmax.f32 %v530_v10, %v835_v4  ;;  %v839_v5 = vadd.f32 -0.71626985, %v1120_v38  ;;  %v577_v40 = vld [vmem:[#allocation2 + $0xdf] sm:$0xff] }
  0x61   :  { %v1228_v52 = vmax.f32 %v1227_v48, -10002.032  ;;  %v1143_v21 = vld [vmem:[#allocation2 + $0xd9] sm:$0xff]  ;;  %v555_v60 = vmax.f32 %v535_v1, %v837_v12  ;;  %v841_v32 = vadd.f32 -0.7936508, %v1124_v14  ;;  %v843_v59 = vadd.f32 -0.875, %v1126_v22 }
  0x62   :  { %v459_v36 = vmax.f32 %v793_v41, %v454_v63  ;;  %v759_v16 = vadd.f32 -1.0496032, %v1059_v27  ;;  %v1148_v50 = vld [vmem:[#allocation2 + $0xda] sm:$0xff]  ;;  %v560_v34 = vmax.f32 %v540_v15, %v839_v5  ;;  %v845_v31 = vadd.f32 -0.96031743, %v1132_v19 }
  0x63   :  { %v1141_v3 = vmax.f32 %v1228_v52, -10001.143  ;;  %v1150_v51 = vld [vmem:[#allocation2 + $0xdb] sm:$0xff]  ;;  %v799_v42 = vadd.f32 -0.017857144, %v1076_v29  ;;  %v565_v54 = vmax.f32 %v545_v35, %v841_v32  ;;  %v570_v0 = vmax.f32 %v550_v25, %v843_v59 }
  0x64   :  { %v464_v49 = vmax.f32 %v795_v61, %v459_v36  ;;  %v847_v58 = vadd.f32 -1.0496032, %v1136_v28  ;;  %v801_v18 = vadd.f32 -0.007936508, %v1078_v8  ;;  %v575_v53 = vmax.f32 %v555_v60, %v845_v31  ;;  %v1162_v46 = vld [vmem:[#allocation2 + $0xde] sm:$0xff]  ;;  %v1230_v61 = vld [vmem:[#allocation7_spill] sm:$0xff] }
  0x65   :  { %v851_v62 = vadd.f32 -1.2400794, %v1143_v21  ;;  %v585_v13 = vmax.f32 %v565_v54, -10001.143  ;;  %v853_v29 = vadd.f32 -1.3412699, %v1148_v50  ;;  %v338_v15 = vmax.f32 %v1118_v44, %v1130_v6 }
  0x66   :  { %v467_v27 = vmax.f32 %v1073_v11, %v464_v49  ;;  %v580_v56 = vmax.f32 %v560_v34, %v847_v58  ;;  %v855_v33 = vadd.f32 -1.4464285, %v1150_v51  ;;  %v857_v47 = vadd.f32 -1.5555556, %v1154_v57  ;;  %v1229_v36 = vld [vmem:[#allocation5_spill] sm:$0xff] }
  0x67   :  { %v590_v2 = vmax.f32 %v570_v0, %v851_v62  ;;  %v859_v10 = vadd.f32 -1.6686507, %v1156_v26  ;;  %v1169_v11 = vadd.f32 -0.7936508, %v1062_v17  ;;  %v803_v8 = vadd.f32 -0.001984127, %v1082_v20 }
  0x68   :  { %v472_v30 = vmax.f32 %v799_v42, %v467_v27  ;;  %v595_v63 = vmax.f32 %v575_v53, %v853_v29  ;;  %v605_v1 = vmax.f32 %v585_v13, %v857_v47  ;;  %v861_v4 = vadd.f32 -1.7857143, %v1162_v46 }
  0x69   :  { %v805_v35 = vadd.f32 -0.001984127, %v1087_v23  ;;  %v600_v12 = vmax.f32 %v580_v56, %v855_v33  ;;  %v1231_v25 = vmax.f32 %v1229_v36, %v1230_v61  ;;  %v369_v17 = vmax.f32 %v1141_v3, %v1169_v11  ;;  %v587_v36 = vld [vmem:[#allocation2 + $0xe1] sm:$0xff] }
  0x6a   :  { %v477_v41 = vmax.f32 %v801_v18, %v472_v30  ;;  %v610_v48 = vmax.f32 %v590_v2, %v859_v10  ;;  %v863_v52 = vadd.f32 -1.906746, %v577_v40  ;;  %v625_v60 = vmax.f32 %v605_v1, -10002.032 }
  0x6b   :  { %v354_v5 = vmax.f32 %v1231_v25, %v759_v16  ;;  %v807_v59 = vadd.f32 -0.007936508, %v1091_v45  ;;  %v615_v49 = vmax.f32 %v595_v63, %v861_v4  ;;  %v809_v23 = vadd.f32 -0.017857144, %v1093_v7  ;;  %v592_v25 = vld [vmem:[#allocation2 + $0xe2] sm:$0xff] }
  0x6c   :  { %v482_v20 = vmax.f32 %v803_v8, %v477_v41  ;;  %v627_v34 = vmax.f32 %v625_v60, %v610_v48  ;;  %v620_v6 = vmax.f32 %v600_v12, %v863_v52  ;;  %v810_v16 = vadd.f32 -0.031746034, %v1096_v39  ;;  %v597_v48 = vld [vmem:[#allocation2 + $0xe3] sm:$0xff] }
  0x6d   :  { %v812_v3 = vadd.f32 -0.049603175, %v1101_v37  ;;  %v814_v45 = vadd.f32 -0.071428575, %v1104_v43  ;;  %v816_v18 = vadd.f32 -0.097222224, %v1108_v24 }
  0x6e   :  { %v486_v32 = vmax.f32 %v805_v35, %v482_v20  ;;  %v629_v31 = vmax.f32 %v627_v34, %v615_v49  ;;  %v820_v53 = vadd.f32 -0.16071428, %v1111_v55  ;;  %v822_v39 = vadd.f32 -0.1984127, %v1114_v9  ;;  %v602_v60 = vld [vmem:[#allocation2 + $0xe4] sm:$0xff] }
  0x6f   :  { %v824_v13 = vadd.f32 -0.24007936, %v1120_v38  ;;  %v826_v29 = vadd.f32 -0.2857143, %v1124_v14  ;;  %v828_v30 = vadd.f32 -0.33531746, %v1126_v22 }
  0x70   :  { %v491_v44 = vmax.f32 %v807_v59, %v486_v32  ;;  %v631_v54 = vmax.f32 %v629_v31, %v620_v6  ;;  %v830_v43 = vadd.f32 -0.3888889, %v1132_v19  ;;  %v832_v24 = vadd.f32 -0.44642857, %v1136_v28  ;;  %v607_v59 = vld [vmem:[#allocation2 + $0xe5] sm:$0xff] }
  0x71   :  { %v836_v55 = vadd.f32 -0.5734127, %v1143_v21  ;;  %v838_v9 = vadd.f32 -0.64285713, %v1148_v50  ;;  %v840_v38 = vadd.f32 -0.71626985, %v1150_v51 }
  0x72   :  { %v496_v42 = vmax.f32 %v809_v23, %v491_v44  ;;  %867 = vst [vmem:[%s1207_s1 + $0x20] sm:$0xff] %v631_v54  ;;  %v842_v14 = vadd.f32 -0.7936508, %v1154_v57  ;;  %v844_v22 = vadd.f32 -0.875, %v1156_v26  ;;  %v846_v19 = vadd.f32 -0.96031743, %v1162_v46 }
  0x73   :  { %v848_v28 = vadd.f32 -1.0496032, %v577_v40  ;;  %v389_v50 = vmax.f32 %v369_v17, -10000.508  ;;  %v852_v51 = vadd.f32 -1.2400794, %v587_v36 }
  0x74   :  { %v501_v0 = vmax.f32 %v810_v16, %v496_v42  ;;  %v854_v57 = vadd.f32 -1.3412699, %v592_v25  ;;  %v856_v26 = vadd.f32 -1.4464285, %v597_v48  ;;  %v858_v46 = vadd.f32 -1.5555556, %v602_v60 }
  0x75   :  { %v612_v34 = vld [vmem:[#allocation2 + $0xe6] sm:$0xff]  ;;  %v860_v44 = vadd.f32 -1.6686507, %v607_v59 }
  0x76   :  { %v506_v58 = vmax.f32 %v812_v3, %v501_v0  ;;  %v617_v23 = vld [vmem:[#allocation2 + $0xe7] sm:$0xff]  ;;  %v862_v6 = vadd.f32 -1.7857143, %v612_v34 }
  0x77   :  { %v864_v17 = vadd.f32 -1.906746, %v617_v23 }
  0x78   :  { %v511_v27 = vmax.f32 %v814_v45, %v506_v58 }
  0x7a   :  { %v516_v7 = vmax.f32 %v816_v18, %v511_v27 }
  0x7c   :  { %v521_v62 = vmax.f32 %v820_v53, %v516_v7 }
  0x7e   :  { %v526_v56 = vmax.f32 %v822_v39, %v521_v62 }
  0x80   :  { %v531_v37 = vmax.f32 %v824_v13, %v526_v56 }
  0x82   :  { %v536_v33 = vmax.f32 %v826_v29, %v531_v37 }
  0x84   :  { %v541_v2 = vmax.f32 %v828_v30, %v536_v33 }
  0x86   :  { %v546_v47 = vmax.f32 %v830_v43, %v541_v2 }
  0x88   :  { %v551_v10 = vmax.f32 %v832_v24, %v546_v47 }
  0x8a   :  { %v556_v11 = vmax.f32 %v836_v55, %v551_v10 }
  0x8c   :  { %v561_v8 = vmax.f32 %v838_v9, %v556_v11 }
  0x8e   :  { %v566_v63 = vmax.f32 %v840_v38, %v561_v8 }
  0x90   :  { %v571_v41 = vmax.f32 %v842_v14, %v566_v63 }
  0x92   :  { %v576_v1 = vmax.f32 %v844_v22, %v571_v41 }
  0x94   :  { %v581_v4 = vmax.f32 %v846_v19, %v576_v1 }
  0x96   :  { %v586_v35 = vmax.f32 %v848_v28, %v581_v4 }
  0x98   :  { %v591_v12 = vmax.f32 %v586_v35, -10002.032 }
  0x9a   :  { %v596_v21 = vmax.f32 %v338_v15, %v591_v12 }
  0x9c   :  { %v601_v61 = vmax.f32 %v354_v5, %v596_v21 }
  0x9e   :  { %v606_v20 = vmax.f32 %v389_v50, %v601_v61 }
  0xa0   :  { %v611_v52 = vmax.f32 %v852_v51, %v606_v20 }
  0xa2   :  { %v616_v32 = vmax.f32 %v854_v57, %v611_v52 }
  0xa4   :  { %v621_v49 = vmax.f32 %v856_v26, %v616_v32 }
  0xa6   :  { %v626_v40 = vmax.f32 %v858_v46, %v621_v49 }
  0xa8   :  { %v628_v15 = vmax.f32 %v626_v40, %v860_v44 }
  0xaa   :  { %v630_v5 = vmax.f32 %v628_v15, %v862_v6 }
  0xac   :  { %v632_v31 = vmax.f32 %v630_v5, %v864_v17 }
  0xae   :  { %868 = vst [vmem:[%s1207_s1 + $0x28] sm:$0xff] %v632_v31 }

</bundles_post_ra>
